<compile_context>
chip_gen: v7x
topology: tpu7x:2x2x1
jax: 0.10.0
libtpu: 0.0.40
codegen_flags: <defaults>
</compile_context>

<pallas_src>
import jax
import jax.numpy as jnp
from jax.experimental import pallas as pl
from jax.experimental.pallas import tpu as pltpu

CIN = 6
COUT = 30
KH = KW = 5
PAD = 3
STRIDE = 1
A_C = KH * CIN          # 30: (kh, cin) folded channels after stage 1
KGRP = 32               # lane stride per kw group (30 padded to 32, no vreg straddle)
K_PAD = 256             # contraction depth of the VMEM patch scratch (>= KW*KGRP=160)
COUT_PAD = 128          # lane-dense output width


def _cdiv(a, b):
    return -(-a // b)


def _round_up(a, b):
    return _cdiv(a, b) * b


def _vmem_tile_bytes(shape, itemsize):
    """VMEM footprint of one buffer, accounting for (8,128) tile padding."""
    s = list(shape)
    if len(s) >= 2:
        s[-1] = _round_up(s[-1], 128)
        s[-2] = _round_up(s[-2], 8)
    else:
        s[-1] = _round_up(s[-1], 128)
    n = 1
    for d in s:
        n *= d
    return n * itemsize


def _make_kernel(th, wo_pad):
    wp_pad = wo_pad + KW - 1

    def kernel(x_ref, w_ref, b_ref, o_ref, a_ref, p_ref):
        # x_ref : (th+KH-1, wp_pad, CIN)   halo'd padded-input slab (f32 or bf16)
        # w_ref : (K_PAD, COUT_PAD) f32    conv weights, rows = kw*32 + kh*6 + c
        # b_ref : (1, COUT_PAD) f32        bias (zero-padded lanes)
        # o_ref : (th*wo_pad, COUT_PAD)    lane-dense output tile
        # a_ref : (th, wp_pad, A_C) f32    scratch: KH taps folded into channels
        # p_ref : (th*wo_pad, K_PAD) f32   scratch: im2col patch tile (K padded)

        # Unwritten pad columns of the patch scratch must be 0 (scratch VMEM is
        # uninitialized; garbage * 0-weight could still be NaN).
        p_ref[...] = jnp.zeros_like(p_ref)

        # Stage 1: a[r, j, kh*CIN + c] = x[r + kh, j, c]
        # (5 static lane-strip stores; offsets 0,6,12,18,24 stay in one vreg col)
        for kh in range(KH):
            a_ref[:, :, kh * CIN:(kh + 1) * CIN] = (
                x_ref[kh:kh + th, :, :].astype(a_ref.dtype))

        # Stage 2: p[r*wo_pad + ow, kw*KGRP + (kh*CIN + c)] = a[r, ow + kw, :]
        # (aligned sublane-block stores; only the read has a small kw offset)
        for r in range(th):
            row0 = r * wo_pad
            for kw in range(KW):
                p_ref[row0:row0 + wo_pad, kw * KGRP:kw * KGRP + A_C] = (
                    a_ref[r, kw:kw + wo_pad, :])

        # Single MXU matmul + bias + SiLU epilogue (sigmoid goes to the EUP).
        v = jnp.dot(p_ref[...], w_ref[...],
                    preferred_element_type=jnp.float32) + b_ref[...]
        o_ref[...] = (v * jax.nn.sigmoid(v)).astype(o_ref.dtype)

    return kernel


def conv_silu(x_nchw, w_oihw, bias, *, th=None, use_bf16=False):
    """x_nchw: (N, 6, H, W); w_oihw: (30, 6, 5, 5); bias: (30,).
    Returns SiLU(conv(x)) in NCHW (f32, or bf16 when use_bf16=True)."""
    n, cin, h, w = x_nchw.shape
    assert cin == CIN
    ho = (h + 2 * PAD - KH) // STRIDE + 1
    wo = (w + 2 * PAD - KW) // STRIDE + 1

    wo_pad = _round_up(wo, 8)          # sublane-aligned patch-row groups
    wp_pad = wo_pad + KW - 1           # padded input width seen by the kernel

    # ---- row-tile heuristic (no "/2": sized for pipelining, not core count) --
    if th is None:
        th = 8
        # Grow the row tile for narrow images as long as every TensorCore still
        # gets >= 4 grid steps to double-buffer against.
        while (th < 32 and wo_pad * (th * 2) <= 1024
               and n * _cdiv(ho, th * 2) >= 8):
            th *= 2
    ho_pad = _round_up(ho, th)
    nt = ho_pad // th
    slab_h = th + KH - 1
    m_tile = th * wo_pad

    in_dtype = jnp.bfloat16 if use_bf16 else jnp.float32
    out_dtype = jnp.bfloat16 if use_bf16 else jnp.float32
    # NOTE: could default use_bf16=True per generation via pltpu.get_tpu_info();
    # kept opt-in here so the strict f32 reference check below stays valid.

    # ---- cheap wrapper-side layout work (no 25x patch matrix, no extra pad) --
    x_nhwc = jnp.transpose(x_nchw, (0, 2, 3, 1)).astype(in_dtype)      # (N,H,W,C)
    xp = jnp.pad(x_nhwc, ((0, 0),
                          (PAD, PAD + (ho_pad - ho)),
                          (PAD, PAD + (wo_pad - wo)),
                          (0, 0)))                  # (N, ho_pad+KH-1, wp_pad, C)
    # Overlapping halo'd row-slabs: ~(th+4)/th x the natural input bytes.
    slabs = jnp.stack([xp[:, t * th:t * th + slab_h] for t in range(nt)],
                      axis=1)                        # (N, nt, slab_h, wp_pad, C)

    # Weights: rows indexed kw*KGRP + kh*CIN + c, cols = Cout (lane-padded).
    wt = jnp.transpose(w_oihw, (3, 2, 1, 0)).astype(jnp.float32)  # (KW,KH,CIN,COUT)
    wt = wt.reshape(KW, A_C, COUT)
    wt = jnp.pad(wt, ((0, 0), (0, KGRP - A_C), (0, 0))).reshape(KW * KGRP, COUT)
    w_mat = jnp.pad(wt, ((0, K_PAD - KW * KGRP), (0, COUT_PAD - COUT)))
    b_vec = jnp.pad(bias.astype(jnp.float32),
                    (0, COUT_PAD - COUT)).reshape(1, COUT_PAD)

    # ---- VMEM budget: actual block sizes (+pipeline double buffers) ----------
    in_bytes = 2 if use_bf16 else 4
    out_bytes = 2 if use_bf16 else 4
    vmem_need = (2 * _vmem_tile_bytes((slab_h, wp_pad, CIN), in_bytes)
                 + 2 * _vmem_tile_bytes((K_PAD, COUT_PAD), 4)
                 + 2 * _vmem_tile_bytes((1, COUT_PAD), 4)
                 + 2 * _vmem_tile_bytes((m_tile, COUT_PAD), out_bytes)
                 + _vmem_tile_bytes((th, wp_pad, A_C), 4)
                 + _vmem_tile_bytes((m_tile, K_PAD), 4))
    vmem_limit = int(max(16 * 1024 * 1024, min(48 * 1024 * 1024, 2 * vmem_need)))

    kernel = _make_kernel(th, wo_pad)
    out_flat = pl.pallas_call(
        kernel,
        out_shape=jax.ShapeDtypeStruct((n * ho_pad * wo_pad, COUT_PAD), out_dtype),
        grid_spec=pltpu.PrefetchScalarGridSpec(
            num_scalar_prefetch=0,
            grid=(n, nt),
            in_specs=[
                pl.BlockSpec((None, None, slab_h, wp_pad, CIN),
                             lambda b, t: (b, t, 0, 0, 0)),
                pl.BlockSpec((K_PAD, COUT_PAD), lambda b, t: (0, 0)),
                pl.BlockSpec((1, COUT_PAD), lambda b, t: (0, 0)),
            ],
            out_specs=pl.BlockSpec((m_tile, COUT_PAD),
                                   lambda b, t: (b * nt + t, 0)),
            scratch_shapes=[
                pltpu.VMEM((th, wp_pad, A_C), jnp.float32),
                pltpu.VMEM((m_tile, K_PAD), jnp.float32),
            ],
        ),
        compiler_params=pltpu.CompilerParams(
            dimension_semantics=("parallel", "parallel"),
            vmem_limit_bytes=vmem_limit,
        ),
    )(slabs, w_mat, b_vec)

    out = out_flat.reshape(n, ho_pad, wo_pad, COUT_PAD)[:, :ho, :wo, :COUT]
    return jnp.transpose(out, (0, 3, 1, 2))  # NCHW


def _reference(x_nchw, w_oihw, bias):
    v1 = jax.lax.conv_general_dilated(
        x_nchw, w_oihw, window_strides=(1, 1),
        padding=((PAD, PAD), (PAD, PAD)),
        dimension_numbers=("NCHW", "OIHW", "NCHW"))
    v1 = v1 + bias[None, :, None, None]
    return v1 * jax.nn.sigmoid(v1)


if __name__ == "__main__":
    key = jax.random.PRNGKey(0)
    kx, kw_key, kb = jax.random.split(key, 3)

    # Small shapes consistent with the module (Cin must be 6).
    N, H, W = 2, 16, 16
    x = jax.random.normal(kx, (N, CIN, H, W), dtype=jnp.float32)

    # Deterministic synthetic Conv2d(6, 30, 5) parameters.
    fan_in = CIN * KH * KW
    bound = 1.0 / (fan_in ** 0.5)
    weight = jax.random.uniform(kw_key, (COUT, CIN, KH, KW), jnp.float32, -bound, bound)
    bias = jax.random.uniform(kb, (COUT,), jnp.float32, -bound, bound)

    ref = _reference(x, weight, bias)

    # Default f32 path: must match the f32 reference tightly.
    out = jax.block_until_ready(conv_silu(x, weight, bias))
    assert out.shape == ref.shape == (N, COUT, H + 2, W + 2)
    assert jnp.allclose(out, ref, atol=1e-4, rtol=1e-4), "f32 mismatch vs reference"

    # bf16 input/output path (f32 accumulation): looser check.
    out_bf16 = jax.block_until_ready(conv_silu(x, weight, bias, use_bf16=True))
    assert jnp.allclose(out_bf16.astype(jnp.float32), ref, atol=3e-2, rtol=3e-2), \
        "bf16 mismatch vs reference"

    # The module's actual input shape from the spec (odd Wo exercises padding).
    x_spec = jax.random.normal(kx, (1, CIN, 62, 66), dtype=jnp.float32)
    ref_spec = _reference(x_spec, weight, bias)
    out_spec = jax.block_until_ready(conv_silu(x_spec, weight, bias))
    assert jnp.allclose(out_spec, ref_spec, atol=1e-4, rtol=1e-4), "spec-shape mismatch"

    print("KERNEL_OK")
</pallas_src>

<mosaic_0001>
module attributes {stable_mosaic.version = 11 : i64} {
  func.func @kernel(%arg0: i32, %arg1: i32, %arg2: memref<1x1x12x28x6xf32, #tpu.memory_space<vmem>>, %arg3: memref<256x128xf32, #tpu.memory_space<vmem>>, %arg4: memref<1x128xf32, #tpu.memory_space<vmem>>, %arg5: memref<192x128xf32, #tpu.memory_space<vmem>>, %arg6: memref<8x28x30xf32, #tpu.memory_space<vmem>>, %arg7: memref<192x256xf32, #tpu.memory_space<vmem>>) attributes {dimension_semantics = [#tpu.dimension_semantics<parallel>, #tpu.dimension_semantics<parallel>], iteration_bounds = array<i64: 2, 3>, scalar_prefetch = 0 : i64, scratch_operands = 2 : i64, tpu.core_type = #tpu.core_type<tc>, window_params = [{transform_indices = @transform_0, window_bounds = array<i64: 1, 1, 12, 28, 6>}, {pipeline_mode = #tpu.pipeline_mode<synchronous>, transform_indices = @transform_1, window_bounds = array<i64: 256, 128>}, {pipeline_mode = #tpu.pipeline_mode<synchronous>, transform_indices = @transform_2, window_bounds = array<i64: 1, 128>}, {transform_indices = @transform_3, window_bounds = array<i64: 192, 128>}]} {
    %cst = arith.constant 0.000000e+00 : f32
    %0 = vector.broadcast %cst : f32 to vector<192x256xf32>
    %c0 = arith.constant 0 : index
    %c0_0 = arith.constant 0 : index
    %1 = vector.load %arg7[%c0, %c0_0] : memref<192x256xf32, #tpu.memory_space<vmem>>, vector<192x256xf32>
    tpu.vector_store %arg7[%c0, %c0_0], %0 {strides = array<i32>} : memref<192x256xf32, #tpu.memory_space<vmem>>, vector<192x256xf32>,
    %c0_1 = arith.constant 0 : index
    %c0_2 = arith.constant 0 : index
    %c0_3 = arith.constant 0 : index
    %c0_4 = arith.constant 0 : index
    %c0_5 = arith.constant 0 : index
    %2 = vector.load %arg2[%c0_1, %c0_2, %c0_3, %c0_4, %c0_5] : memref<1x1x12x28x6xf32, #tpu.memory_space<vmem>>, vector<1x1x8x28x6xf32>
    %3 = vector.shape_cast %2 : vector<1x1x8x28x6xf32> to vector<8x28x6xf32>
    %c0_6 = arith.constant 0 : index
    %c0_7 = arith.constant 0 : index
    %c0_8 = arith.constant 0 : index
    %4 = vector.load %arg6[%c0_6, %c0_7, %c0_8] : memref<8x28x30xf32, #tpu.memory_space<vmem>>, vector<8x28x6xf32>
    tpu.vector_store %arg6[%c0_6, %c0_7, %c0_8], %3 {strides = array<i32>} : memref<8x28x30xf32, #tpu.memory_space<vmem>>, vector<8x28x6xf32>,
    %c0_9 = arith.constant 0 : index
    %c0_10 = arith.constant 0 : index
    %c1 = arith.constant 1 : index
    %c0_11 = arith.constant 0 : index
    %c0_12 = arith.constant 0 : index
    %5 = vector.load %arg2[%c0_9, %c0_10, %c1, %c0_11, %c0_12] : memref<1x1x12x28x6xf32, #tpu.memory_space<vmem>>, vector<1x1x8x28x6xf32>
    %6 = vector.shape_cast %5 : vector<1x1x8x28x6xf32> to vector<8x28x6xf32>
    %c0_13 = arith.constant 0 : index
    %c0_14 = arith.constant 0 : index
    %c6 = arith.constant 6 : index
    %7 = vector.load %arg6[%c0_13, %c0_14, %c6] : memref<8x28x30xf32, #tpu.memory_space<vmem>>, vector<8x28x6xf32>
    tpu.vector_store %arg6[%c0_13, %c0_14, %c6], %6 {strides = array<i32>} : memref<8x28x30xf32, #tpu.memory_space<vmem>>, vector<8x28x6xf32>,
    %c0_15 = arith.constant 0 : index
    %c0_16 = arith.constant 0 : index
    %c2 = arith.constant 2 : index
    %c0_17 = arith.constant 0 : index
    %c0_18 = arith.constant 0 : index
    %8 = vector.load %arg2[%c0_15, %c0_16, %c2, %c0_17, %c0_18] : memref<1x1x12x28x6xf32, #tpu.memory_space<vmem>>, vector<1x1x8x28x6xf32>
    %9 = vector.shape_cast %8 : vector<1x1x8x28x6xf32> to vector<8x28x6xf32>
    %c0_19 = arith.constant 0 : index
    %c0_20 = arith.constant 0 : index
    %c12 = arith.constant 12 : index
    %10 = vector.load %arg6[%c0_19, %c0_20, %c12] : memref<8x28x30xf32, #tpu.memory_space<vmem>>, vector<8x28x6xf32>
    tpu.vector_store %arg6[%c0_19, %c0_20, %c12], %9 {strides = array<i32>} : memref<8x28x30xf32, #tpu.memory_space<vmem>>, vector<8x28x6xf32>,
    %c0_21 = arith.constant 0 : index
    %c0_22 = arith.constant 0 : index
    %c3 = arith.constant 3 : index
    %c0_23 = arith.constant 0 : index
    %c0_24 = arith.constant 0 : index
    %11 = vector.load %arg2[%c0_21, %c0_22, %c3, %c0_23, %c0_24] : memref<1x1x12x28x6xf32, #tpu.memory_space<vmem>>, vector<1x1x8x28x6xf32>
    %12 = vector.shape_cast %11 : vector<1x1x8x28x6xf32> to vector<8x28x6xf32>
    %c0_25 = arith.constant 0 : index
    %c0_26 = arith.constant 0 : index
    %c18 = arith.constant 18 : index
    %13 = vector.load %arg6[%c0_25, %c0_26, %c18] : memref<8x28x30xf32, #tpu.memory_space<vmem>>, vector<8x28x6xf32>
    tpu.vector_store %arg6[%c0_25, %c0_26, %c18], %12 {strides = array<i32>} : memref<8x28x30xf32, #tpu.memory_space<vmem>>, vector<8x28x6xf32>,
    %c0_27 = arith.constant 0 : index
    %c0_28 = arith.constant 0 : index
    %c4 = arith.constant 4 : index
    %c0_29 = arith.constant 0 : index
    %c0_30 = arith.constant 0 : index
    %14 = vector.load %arg2[%c0_27, %c0_28, %c4, %c0_29, %c0_30] : memref<1x1x12x28x6xf32, #tpu.memory_space<vmem>>, vector<1x1x8x28x6xf32>
    %15 = vector.shape_cast %14 : vector<1x1x8x28x6xf32> to vector<8x28x6xf32>
    %c0_31 = arith.constant 0 : index
    %c0_32 = arith.constant 0 : index
    %c24 = arith.constant 24 : index
    %16 = vector.load %arg6[%c0_31, %c0_32, %c24] : memref<8x28x30xf32, #tpu.memory_space<vmem>>, vector<8x28x6xf32>
    tpu.vector_store %arg6[%c0_31, %c0_32, %c24], %15 {strides = array<i32>} : memref<8x28x30xf32, #tpu.memory_space<vmem>>, vector<8x28x6xf32>,
    %c0_33 = arith.constant 0 : index
    %c0_34 = arith.constant 0 : index
    %c0_35 = arith.constant 0 : index
    %17 = vector.load %arg6[%c0_33, %c0_34, %c0_35] : memref<8x28x30xf32, #tpu.memory_space<vmem>>, vector<1x24x30xf32>
    %18 = vector.shape_cast %17 : vector<1x24x30xf32> to vector<24x30xf32>
    %c0_36 = arith.constant 0 : index
    %c0_37 = arith.constant 0 : index
    %19 = vector.load %arg7[%c0_36, %c0_37] : memref<192x256xf32, #tpu.memory_space<vmem>>, vector<24x30xf32>
    tpu.vector_store %arg7[%c0_36, %c0_37], %18 {strides = array<i32>} : memref<192x256xf32, #tpu.memory_space<vmem>>, vector<24x30xf32>,
    %c0_38 = arith.constant 0 : index
    %c1_39 = arith.constant 1 : index
    %c0_40 = arith.constant 0 : index
    %20 = vector.load %arg6[%c0_38, %c1_39, %c0_40] : memref<8x28x30xf32, #tpu.memory_space<vmem>>, vector<1x24x30xf32>
    %21 = vector.shape_cast %20 : vector<1x24x30xf32> to vector<24x30xf32>
    %c0_41 = arith.constant 0 : index
    %c32 = arith.constant 32 : index
    %22 = vector.load %arg7[%c0_41, %c32] : memref<192x256xf32, #tpu.memory_space<vmem>>, vector<24x30xf32>
    tpu.vector_store %arg7[%c0_41, %c32], %21 {strides = array<i32>} : memref<192x256xf32, #tpu.memory_space<vmem>>, vector<24x30xf32>,
    %c0_42 = arith.constant 0 : index
    %c2_43 = arith.constant 2 : index
    %c0_44 = arith.constant 0 : index
    %23 = vector.load %arg6[%c0_42, %c2_43, %c0_44] : memref<8x28x30xf32, #tpu.memory_space<vmem>>, vector<1x24x30xf32>
    %24 = vector.shape_cast %23 : vector<1x24x30xf32> to vector<24x30xf32>
    %c0_45 = arith.constant 0 : index
    %c64 = arith.constant 64 : index
    %25 = vector.load %arg7[%c0_45, %c64] : memref<192x256xf32, #tpu.memory_space<vmem>>, vector<24x30xf32>
    tpu.vector_store %arg7[%c0_45, %c64], %24 {strides = array<i32>} : memref<192x256xf32, #tpu.memory_space<vmem>>, vector<24x30xf32>,
    %c0_46 = arith.constant 0 : index
    %c3_47 = arith.constant 3 : index
    %c0_48 = arith.constant 0 : index
    %26 = vector.load %arg6[%c0_46, %c3_47, %c0_48] : memref<8x28x30xf32, #tpu.memory_space<vmem>>, vector<1x24x30xf32>
    %27 = vector.shape_cast %26 : vector<1x24x30xf32> to vector<24x30xf32>
    %c0_49 = arith.constant 0 : index
    %c96 = arith.constant 96 : index
    %28 = vector.load %arg7[%c0_49, %c96] : memref<192x256xf32, #tpu.memory_space<vmem>>, vector<24x30xf32>
    tpu.vector_store %arg7[%c0_49, %c96], %27 {strides = array<i32>} : memref<192x256xf32, #tpu.memory_space<vmem>>, vector<24x30xf32>,
    %c0_50 = arith.constant 0 : index
    %c4_51 = arith.constant 4 : index
    %c0_52 = arith.constant 0 : index
    %29 = vector.load %arg6[%c0_50, %c4_51, %c0_52] : memref<8x28x30xf32, #tpu.memory_space<vmem>>, vector<1x24x30xf32>
    %30 = vector.shape_cast %29 : vector<1x24x30xf32> to vector<24x30xf32>
    %c0_53 = arith.constant 0 : index
    %c128 = arith.constant 128 : index
    %31 = vector.load %arg7[%c0_53, %c128] : memref<192x256xf32, #tpu.memory_space<vmem>>, vector<24x30xf32>
    tpu.vector_store %arg7[%c0_53, %c128], %30 {strides = array<i32>} : memref<192x256xf32, #tpu.memory_space<vmem>>, vector<24x30xf32>,
    %c1_54 = arith.constant 1 : index
    %c0_55 = arith.constant 0 : index
    %c0_56 = arith.constant 0 : index
    %32 = vector.load %arg6[%c1_54, %c0_55, %c0_56] : memref<8x28x30xf32, #tpu.memory_space<vmem>>, vector<1x24x30xf32>
    %33 = vector.shape_cast %32 : vector<1x24x30xf32> to vector<24x30xf32>
    %c24_57 = arith.constant 24 : index
    %c0_58 = arith.constant 0 : index
    %34 = vector.load %arg7[%c24_57, %c0_58] : memref<192x256xf32, #tpu.memory_space<vmem>>, vector<24x30xf32>
    tpu.vector_store %arg7[%c24_57, %c0_58], %33 {strides = array<i32>} : memref<192x256xf32, #tpu.memory_space<vmem>>, vector<24x30xf32>,
    %c1_59 = arith.constant 1 : index
    %c1_60 = arith.constant 1 : index
    %c0_61 = arith.constant 0 : index
    %35 = vector.load %arg6[%c1_59, %c1_60, %c0_61] : memref<8x28x30xf32, #tpu.memory_space<vmem>>, vector<1x24x30xf32>
    %36 = vector.shape_cast %35 : vector<1x24x30xf32> to vector<24x30xf32>
    %c24_62 = arith.constant 24 : index
    %c32_63 = arith.constant 32 : index
    %37 = vector.load %arg7[%c24_62, %c32_63] : memref<192x256xf32, #tpu.memory_space<vmem>>, vector<24x30xf32>
    tpu.vector_store %arg7[%c24_62, %c32_63], %36 {strides = array<i32>} : memref<192x256xf32, #tpu.memory_space<vmem>>, vector<24x30xf32>,
    %c1_64 = arith.constant 1 : index
    %c2_65 = arith.constant 2 : index
    %c0_66 = arith.constant 0 : index
    %38 = vector.load %arg6[%c1_64, %c2_65, %c0_66] : memref<8x28x30xf32, #tpu.memory_space<vmem>>, vector<1x24x30xf32>
    %39 = vector.shape_cast %38 : vector<1x24x30xf32> to vector<24x30xf32>
    %c24_67 = arith.constant 24 : index
    %c64_68 = arith.constant 64 : index
    %40 = vector.load %arg7[%c24_67, %c64_68] : memref<192x256xf32, #tpu.memory_space<vmem>>, vector<24x30xf32>
    tpu.vector_store %arg7[%c24_67, %c64_68], %39 {strides = array<i32>} : memref<192x256xf32, #tpu.memory_space<vmem>>, vector<24x30xf32>,
    %c1_69 = arith.constant 1 : index
    %c3_70 = arith.constant 3 : index
    %c0_71 = arith.constant 0 : index
    %41 = vector.load %arg6[%c1_69, %c3_70, %c0_71] : memref<8x28x30xf32, #tpu.memory_space<vmem>>, vector<1x24x30xf32>
    %42 = vector.shape_cast %41 : vector<1x24x30xf32> to vector<24x30xf32>
    %c24_72 = arith.constant 24 : index
    %c96_73 = arith.constant 96 : index
    %43 = vector.load %arg7[%c24_72, %c96_73] : memref<192x256xf32, #tpu.memory_space<vmem>>, vector<24x30xf32>
    tpu.vector_store %arg7[%c24_72, %c96_73], %42 {strides = array<i32>} : memref<192x256xf32, #tpu.memory_space<vmem>>, vector<24x30xf32>,
    %c1_74 = arith.constant 1 : index
    %c4_75 = arith.constant 4 : index
    %c0_76 = arith.constant 0 : index
    %44 = vector.load %arg6[%c1_74, %c4_75, %c0_76] : memref<8x28x30xf32, #tpu.memory_space<vmem>>, vector<1x24x30xf32>
    %45 = vector.shape_cast %44 : vector<1x24x30xf32> to vector<24x30xf32>
    %c24_77 = arith.constant 24 : index
    %c128_78 = arith.constant 128 : index
    %46 = vector.load %arg7[%c24_77, %c128_78] : memref<192x256xf32, #tpu.memory_space<vmem>>, vector<24x30xf32>
    tpu.vector_store %arg7[%c24_77, %c128_78], %45 {strides = array<i32>} : memref<192x256xf32, #tpu.memory_space<vmem>>, vector<24x30xf32>,
    %c2_79 = arith.constant 2 : index
    %c0_80 = arith.constant 0 : index
    %c0_81 = arith.constant 0 : index
    %47 = vector.load %arg6[%c2_79, %c0_80, %c0_81] : memref<8x28x30xf32, #tpu.memory_space<vmem>>, vector<1x24x30xf32>
    %48 = vector.shape_cast %47 : vector<1x24x30xf32> to vector<24x30xf32>
    %c48 = arith.constant 48 : index
    %c0_82 = arith.constant 0 : index
    %49 = vector.load %arg7[%c48, %c0_82] : memref<192x256xf32, #tpu.memory_space<vmem>>, vector<24x30xf32>
    tpu.vector_store %arg7[%c48, %c0_82], %48 {strides = array<i32>} : memref<192x256xf32, #tpu.memory_space<vmem>>, vector<24x30xf32>,
    %c2_83 = arith.constant 2 : index
    %c1_84 = arith.constant 1 : index
    %c0_85 = arith.constant 0 : index
    %50 = vector.load %arg6[%c2_83, %c1_84, %c0_85] : memref<8x28x30xf32, #tpu.memory_space<vmem>>, vector<1x24x30xf32>
    %51 = vector.shape_cast %50 : vector<1x24x30xf32> to vector<24x30xf32>
    %c48_86 = arith.constant 48 : index
    %c32_87 = arith.constant 32 : index
    %52 = vector.load %arg7[%c48_86, %c32_87] : memref<192x256xf32, #tpu.memory_space<vmem>>, vector<24x30xf32>
    tpu.vector_store %arg7[%c48_86, %c32_87], %51 {strides = array<i32>} : memref<192x256xf32, #tpu.memory_space<vmem>>, vector<24x30xf32>,
    %c2_88 = arith.constant 2 : index
    %c2_89 = arith.constant 2 : index
    %c0_90 = arith.constant 0 : index
    %53 = vector.load %arg6[%c2_88, %c2_89, %c0_90] : memref<8x28x30xf32, #tpu.memory_space<vmem>>, vector<1x24x30xf32>
    %54 = vector.shape_cast %53 : vector<1x24x30xf32> to vector<24x30xf32>
    %c48_91 = arith.constant 48 : index
    %c64_92 = arith.constant 64 : index
    %55 = vector.load %arg7[%c48_91, %c64_92] : memref<192x256xf32, #tpu.memory_space<vmem>>, vector<24x30xf32>
    tpu.vector_store %arg7[%c48_91, %c64_92], %54 {strides = array<i32>} : memref<192x256xf32, #tpu.memory_space<vmem>>, vector<24x30xf32>,
    %c2_93 = arith.constant 2 : index
    %c3_94 = arith.constant 3 : index
    %c0_95 = arith.constant 0 : index
    %56 = vector.load %arg6[%c2_93, %c3_94, %c0_95] : memref<8x28x30xf32, #tpu.memory_space<vmem>>, vector<1x24x30xf32>
    %57 = vector.shape_cast %56 : vector<1x24x30xf32> to vector<24x30xf32>
    %c48_96 = arith.constant 48 : index
    %c96_97 = arith.constant 96 : index
    %58 = vector.load %arg7[%c48_96, %c96_97] : memref<192x256xf32, #tpu.memory_space<vmem>>, vector<24x30xf32>
    tpu.vector_store %arg7[%c48_96, %c96_97], %57 {strides = array<i32>} : memref<192x256xf32, #tpu.memory_space<vmem>>, vector<24x30xf32>,
    %c2_98 = arith.constant 2 : index
    %c4_99 = arith.constant 4 : index
    %c0_100 = arith.constant 0 : index
    %59 = vector.load %arg6[%c2_98, %c4_99, %c0_100] : memref<8x28x30xf32, #tpu.memory_space<vmem>>, vector<1x24x30xf32>
    %60 = vector.shape_cast %59 : vector<1x24x30xf32> to vector<24x30xf32>
    %c48_101 = arith.constant 48 : index
    %c128_102 = arith.constant 128 : index
    %61 = vector.load %arg7[%c48_101, %c128_102] : memref<192x256xf32, #tpu.memory_space<vmem>>, vector<24x30xf32>
    tpu.vector_store %arg7[%c48_101, %c128_102], %60 {strides = array<i32>} : memref<192x256xf32, #tpu.memory_space<vmem>>, vector<24x30xf32>,
    %c3_103 = arith.constant 3 : index
    %c0_104 = arith.constant 0 : index
    %c0_105 = arith.constant 0 : index
    %62 = vector.load %arg6[%c3_103, %c0_104, %c0_105] : memref<8x28x30xf32, #tpu.memory_space<vmem>>, vector<1x24x30xf32>
    %63 = vector.shape_cast %62 : vector<1x24x30xf32> to vector<24x30xf32>
    %c72 = arith.constant 72 : index
    %c0_106 = arith.constant 0 : index
    %64 = vector.load %arg7[%c72, %c0_106] : memref<192x256xf32, #tpu.memory_space<vmem>>, vector<24x30xf32>
    tpu.vector_store %arg7[%c72, %c0_106], %63 {strides = array<i32>} : memref<192x256xf32, #tpu.memory_space<vmem>>, vector<24x30xf32>,
    %c3_107 = arith.constant 3 : index
    %c1_108 = arith.constant 1 : index
    %c0_109 = arith.constant 0 : index
    %65 = vector.load %arg6[%c3_107, %c1_108, %c0_109] : memref<8x28x30xf32, #tpu.memory_space<vmem>>, vector<1x24x30xf32>
    %66 = vector.shape_cast %65 : vector<1x24x30xf32> to vector<24x30xf32>
    %c72_110 = arith.constant 72 : index
    %c32_111 = arith.constant 32 : index
    %67 = vector.load %arg7[%c72_110, %c32_111] : memref<192x256xf32, #tpu.memory_space<vmem>>, vector<24x30xf32>
    tpu.vector_store %arg7[%c72_110, %c32_111], %66 {strides = array<i32>} : memref<192x256xf32, #tpu.memory_space<vmem>>, vector<24x30xf32>,
    %c3_112 = arith.constant 3 : index
    %c2_113 = arith.constant 2 : index
    %c0_114 = arith.constant 0 : index
    %68 = vector.load %arg6[%c3_112, %c2_113, %c0_114] : memref<8x28x30xf32, #tpu.memory_space<vmem>>, vector<1x24x30xf32>
    %69 = vector.shape_cast %68 : vector<1x24x30xf32> to vector<24x30xf32>
    %c72_115 = arith.constant 72 : index
    %c64_116 = arith.constant 64 : index
    %70 = vector.load %arg7[%c72_115, %c64_116] : memref<192x256xf32, #tpu.memory_space<vmem>>, vector<24x30xf32>
    tpu.vector_store %arg7[%c72_115, %c64_116], %69 {strides = array<i32>} : memref<192x256xf32, #tpu.memory_space<vmem>>, vector<24x30xf32>,
    %c3_117 = arith.constant 3 : index
    %c3_118 = arith.constant 3 : index
    %c0_119 = arith.constant 0 : index
    %71 = vector.load %arg6[%c3_117, %c3_118, %c0_119] : memref<8x28x30xf32, #tpu.memory_space<vmem>>, vector<1x24x30xf32>
    %72 = vector.shape_cast %71 : vector<1x24x30xf32> to vector<24x30xf32>
    %c72_120 = arith.constant 72 : index
    %c96_121 = arith.constant 96 : index
    %73 = vector.load %arg7[%c72_120, %c96_121] : memref<192x256xf32, #tpu.memory_space<vmem>>, vector<24x30xf32>
    tpu.vector_store %arg7[%c72_120, %c96_121], %72 {strides = array<i32>} : memref<192x256xf32, #tpu.memory_space<vmem>>, vector<24x30xf32>,
    %c3_122 = arith.constant 3 : index
    %c4_123 = arith.constant 4 : index
    %c0_124 = arith.constant 0 : index
    %74 = vector.load %arg6[%c3_122, %c4_123, %c0_124] : memref<8x28x30xf32, #tpu.memory_space<vmem>>, vector<1x24x30xf32>
    %75 = vector.shape_cast %74 : vector<1x24x30xf32> to vector<24x30xf32>
    %c72_125 = arith.constant 72 : index
    %c128_126 = arith.constant 128 : index
    %76 = vector.load %arg7[%c72_125, %c128_126] : memref<192x256xf32, #tpu.memory_space<vmem>>, vector<24x30xf32>
    tpu.vector_store %arg7[%c72_125, %c128_126], %75 {strides = array<i32>} : memref<192x256xf32, #tpu.memory_space<vmem>>, vector<24x30xf32>,
    %c4_127 = arith.constant 4 : index
    %c0_128 = arith.constant 0 : index
    %c0_129 = arith.constant 0 : index
    %77 = vector.load %arg6[%c4_127, %c0_128, %c0_129] : memref<8x28x30xf32, #tpu.memory_space<vmem>>, vector<1x24x30xf32>
    %78 = vector.shape_cast %77 : vector<1x24x30xf32> to vector<24x30xf32>
    %c96_130 = arith.constant 96 : index
    %c0_131 = arith.constant 0 : index
    %79 = vector.load %arg7[%c96_130, %c0_131] : memref<192x256xf32, #tpu.memory_space<vmem>>, vector<24x30xf32>
    tpu.vector_store %arg7[%c96_130, %c0_131], %78 {strides = array<i32>} : memref<192x256xf32, #tpu.memory_space<vmem>>, vector<24x30xf32>,
    %c4_132 = arith.constant 4 : index
    %c1_133 = arith.constant 1 : index
    %c0_134 = arith.constant 0 : index
    %80 = vector.load %arg6[%c4_132, %c1_133, %c0_134] : memref<8x28x30xf32, #tpu.memory_space<vmem>>, vector<1x24x30xf32>
    %81 = vector.shape_cast %80 : vector<1x24x30xf32> to vector<24x30xf32>
    %c96_135 = arith.constant 96 : index
    %c32_136 = arith.constant 32 : index
    %82 = vector.load %arg7[%c96_135, %c32_136] : memref<192x256xf32, #tpu.memory_space<vmem>>, vector<24x30xf32>
    tpu.vector_store %arg7[%c96_135, %c32_136], %81 {strides = array<i32>} : memref<192x256xf32, #tpu.memory_space<vmem>>, vector<24x30xf32>,
    %c4_137 = arith.constant 4 : index
    %c2_138 = arith.constant 2 : index
    %c0_139 = arith.constant 0 : index
    %83 = vector.load %arg6[%c4_137, %c2_138, %c0_139] : memref<8x28x30xf32, #tpu.memory_space<vmem>>, vector<1x24x30xf32>
    %84 = vector.shape_cast %83 : vector<1x24x30xf32> to vector<24x30xf32>
    %c96_140 = arith.constant 96 : index
    %c64_141 = arith.constant 64 : index
    %85 = vector.load %arg7[%c96_140, %c64_141] : memref<192x256xf32, #tpu.memory_space<vmem>>, vector<24x30xf32>
    tpu.vector_store %arg7[%c96_140, %c64_141], %84 {strides = array<i32>} : memref<192x256xf32, #tpu.memory_space<vmem>>, vector<24x30xf32>,
    %c4_142 = arith.constant 4 : index
    %c3_143 = arith.constant 3 : index
    %c0_144 = arith.constant 0 : index
    %86 = vector.load %arg6[%c4_142, %c3_143, %c0_144] : memref<8x28x30xf32, #tpu.memory_space<vmem>>, vector<1x24x30xf32>
    %87 = vector.shape_cast %86 : vector<1x24x30xf32> to vector<24x30xf32>
    %c96_145 = arith.constant 96 : index
    %c96_146 = arith.constant 96 : index
    %88 = vector.load %arg7[%c96_145, %c96_146] : memref<192x256xf32, #tpu.memory_space<vmem>>, vector<24x30xf32>
    tpu.vector_store %arg7[%c96_145, %c96_146], %87 {strides = array<i32>} : memref<192x256xf32, #tpu.memory_space<vmem>>, vector<24x30xf32>,
    %c4_147 = arith.constant 4 : index
    %c4_148 = arith.constant 4 : index
    %c0_149 = arith.constant 0 : index
    %89 = vector.load %arg6[%c4_147, %c4_148, %c0_149] : memref<8x28x30xf32, #tpu.memory_space<vmem>>, vector<1x24x30xf32>
    %90 = vector.shape_cast %89 : vector<1x24x30xf32> to vector<24x30xf32>
    %c96_150 = arith.constant 96 : index
    %c128_151 = arith.constant 128 : index
    %91 = vector.load %arg7[%c96_150, %c128_151] : memref<192x256xf32, #tpu.memory_space<vmem>>, vector<24x30xf32>
    tpu.vector_store %arg7[%c96_150, %c128_151], %90 {strides = array<i32>} : memref<192x256xf32, #tpu.memory_space<vmem>>, vector<24x30xf32>,
    %c5 = arith.constant 5 : index
    %c0_152 = arith.constant 0 : index
    %c0_153 = arith.constant 0 : index
    %92 = vector.load %arg6[%c5, %c0_152, %c0_153] : memref<8x28x30xf32, #tpu.memory_space<vmem>>, vector<1x24x30xf32>
    %93 = vector.shape_cast %92 : vector<1x24x30xf32> to vector<24x30xf32>
    %c120 = arith.constant 120 : index
    %c0_154 = arith.constant 0 : index
    %94 = vector.load %arg7[%c120, %c0_154] : memref<192x256xf32, #tpu.memory_space<vmem>>, vector<24x30xf32>
    tpu.vector_store %arg7[%c120, %c0_154], %93 {strides = array<i32>} : memref<192x256xf32, #tpu.memory_space<vmem>>, vector<24x30xf32>,
    %c5_155 = arith.constant 5 : index
    %c1_156 = arith.constant 1 : index
    %c0_157 = arith.constant 0 : index
    %95 = vector.load %arg6[%c5_155, %c1_156, %c0_157] : memref<8x28x30xf32, #tpu.memory_space<vmem>>, vector<1x24x30xf32>
    %96 = vector.shape_cast %95 : vector<1x24x30xf32> to vector<24x30xf32>
    %c120_158 = arith.constant 120 : index
    %c32_159 = arith.constant 32 : index
    %97 = vector.load %arg7[%c120_158, %c32_159] : memref<192x256xf32, #tpu.memory_space<vmem>>, vector<24x30xf32>
    tpu.vector_store %arg7[%c120_158, %c32_159], %96 {strides = array<i32>} : memref<192x256xf32, #tpu.memory_space<vmem>>, vector<24x30xf32>,
    %c5_160 = arith.constant 5 : index
    %c2_161 = arith.constant 2 : index
    %c0_162 = arith.constant 0 : index
    %98 = vector.load %arg6[%c5_160, %c2_161, %c0_162] : memref<8x28x30xf32, #tpu.memory_space<vmem>>, vector<1x24x30xf32>
    %99 = vector.shape_cast %98 : vector<1x24x30xf32> to vector<24x30xf32>
    %c120_163 = arith.constant 120 : index
    %c64_164 = arith.constant 64 : index
    %100 = vector.load %arg7[%c120_163, %c64_164] : memref<192x256xf32, #tpu.memory_space<vmem>>, vector<24x30xf32>
    tpu.vector_store %arg7[%c120_163, %c64_164], %99 {strides = array<i32>} : memref<192x256xf32, #tpu.memory_space<vmem>>, vector<24x30xf32>,
    %c5_165 = arith.constant 5 : index
    %c3_166 = arith.constant 3 : index
    %c0_167 = arith.constant 0 : index
    %101 = vector.load %arg6[%c5_165, %c3_166, %c0_167] : memref<8x28x30xf32, #tpu.memory_space<vmem>>, vector<1x24x30xf32>
    %102 = vector.shape_cast %101 : vector<1x24x30xf32> to vector<24x30xf32>
    %c120_168 = arith.constant 120 : index
    %c96_169 = arith.constant 96 : index
    %103 = vector.load %arg7[%c120_168, %c96_169] : memref<192x256xf32, #tpu.memory_space<vmem>>, vector<24x30xf32>
    tpu.vector_store %arg7[%c120_168, %c96_169], %102 {strides = array<i32>} : memref<192x256xf32, #tpu.memory_space<vmem>>, vector<24x30xf32>,
    %c5_170 = arith.constant 5 : index
    %c4_171 = arith.constant 4 : index
    %c0_172 = arith.constant 0 : index
    %104 = vector.load %arg6[%c5_170, %c4_171, %c0_172] : memref<8x28x30xf32, #tpu.memory_space<vmem>>, vector<1x24x30xf32>
    %105 = vector.shape_cast %104 : vector<1x24x30xf32> to vector<24x30xf32>
    %c120_173 = arith.constant 120 : index
    %c128_174 = arith.constant 128 : index
    %106 = vector.load %arg7[%c120_173, %c128_174] : memref<192x256xf32, #tpu.memory_space<vmem>>, vector<24x30xf32>
    tpu.vector_store %arg7[%c120_173, %c128_174], %105 {strides = array<i32>} : memref<192x256xf32, #tpu.memory_space<vmem>>, vector<24x30xf32>,
    %c6_175 = arith.constant 6 : index
    %c0_176 = arith.constant 0 : index
    %c0_177 = arith.constant 0 : index
    %107 = vector.load %arg6[%c6_175, %c0_176, %c0_177] : memref<8x28x30xf32, #tpu.memory_space<vmem>>, vector<1x24x30xf32>
    %108 = vector.shape_cast %107 : vector<1x24x30xf32> to vector<24x30xf32>
    %c144 = arith.constant 144 : index
    %c0_178 = arith.constant 0 : index
    %109 = vector.load %arg7[%c144, %c0_178] : memref<192x256xf32, #tpu.memory_space<vmem>>, vector<24x30xf32>
    tpu.vector_store %arg7[%c144, %c0_178], %108 {strides = array<i32>} : memref<192x256xf32, #tpu.memory_space<vmem>>, vector<24x30xf32>,
    %c6_179 = arith.constant 6 : index
    %c1_180 = arith.constant 1 : index
    %c0_181 = arith.constant 0 : index
    %110 = vector.load %arg6[%c6_179, %c1_180, %c0_181] : memref<8x28x30xf32, #tpu.memory_space<vmem>>, vector<1x24x30xf32>
    %111 = vector.shape_cast %110 : vector<1x24x30xf32> to vector<24x30xf32>
    %c144_182 = arith.constant 144 : index
    %c32_183 = arith.constant 32 : index
    %112 = vector.load %arg7[%c144_182, %c32_183] : memref<192x256xf32, #tpu.memory_space<vmem>>, vector<24x30xf32>
    tpu.vector_store %arg7[%c144_182, %c32_183], %111 {strides = array<i32>} : memref<192x256xf32, #tpu.memory_space<vmem>>, vector<24x30xf32>,
    %c6_184 = arith.constant 6 : index
    %c2_185 = arith.constant 2 : index
    %c0_186 = arith.constant 0 : index
    %113 = vector.load %arg6[%c6_184, %c2_185, %c0_186] : memref<8x28x30xf32, #tpu.memory_space<vmem>>, vector<1x24x30xf32>
    %114 = vector.shape_cast %113 : vector<1x24x30xf32> to vector<24x30xf32>
    %c144_187 = arith.constant 144 : index
    %c64_188 = arith.constant 64 : index
    %115 = vector.load %arg7[%c144_187, %c64_188] : memref<192x256xf32, #tpu.memory_space<vmem>>, vector<24x30xf32>
    tpu.vector_store %arg7[%c144_187, %c64_188], %114 {strides = array<i32>} : memref<192x256xf32, #tpu.memory_space<vmem>>, vector<24x30xf32>,
    %c6_189 = arith.constant 6 : index
    %c3_190 = arith.constant 3 : index
    %c0_191 = arith.constant 0 : index
    %116 = vector.load %arg6[%c6_189, %c3_190, %c0_191] : memref<8x28x30xf32, #tpu.memory_space<vmem>>, vector<1x24x30xf32>
    %117 = vector.shape_cast %116 : vector<1x24x30xf32> to vector<24x30xf32>
    %c144_192 = arith.constant 144 : index
    %c96_193 = arith.constant 96 : index
    %118 = vector.load %arg7[%c144_192, %c96_193] : memref<192x256xf32, #tpu.memory_space<vmem>>, vector<24x30xf32>
    tpu.vector_store %arg7[%c144_192, %c96_193], %117 {strides = array<i32>} : memref<192x256xf32, #tpu.memory_space<vmem>>, vector<24x30xf32>,
    %c6_194 = arith.constant 6 : index
    %c4_195 = arith.constant 4 : index
    %c0_196 = arith.constant 0 : index
    %119 = vector.load %arg6[%c6_194, %c4_195, %c0_196] : memref<8x28x30xf32, #tpu.memory_space<vmem>>, vector<1x24x30xf32>
    %120 = vector.shape_cast %119 : vector<1x24x30xf32> to vector<24x30xf32>
    %c144_197 = arith.constant 144 : index
    %c128_198 = arith.constant 128 : index
    %121 = vector.load %arg7[%c144_197, %c128_198] : memref<192x256xf32, #tpu.memory_space<vmem>>, vector<24x30xf32>
    tpu.vector_store %arg7[%c144_197, %c128_198], %120 {strides = array<i32>} : memref<192x256xf32, #tpu.memory_space<vmem>>, vector<24x30xf32>,
    %c7 = arith.constant 7 : index
    %c0_199 = arith.constant 0 : index
    %c0_200 = arith.constant 0 : index
    %122 = vector.load %arg6[%c7, %c0_199, %c0_200] : memref<8x28x30xf32, #tpu.memory_space<vmem>>, vector<1x24x30xf32>
    %123 = vector.shape_cast %122 : vector<1x24x30xf32> to vector<24x30xf32>
    %c168 = arith.constant 168 : index
    %c0_201 = arith.constant 0 : index
    %124 = vector.load %arg7[%c168, %c0_201] : memref<192x256xf32, #tpu.memory_space<vmem>>, vector<24x30xf32>
    tpu.vector_store %arg7[%c168, %c0_201], %123 {strides = array<i32>} : memref<192x256xf32, #tpu.memory_space<vmem>>, vector<24x30xf32>,
    %c7_202 = arith.constant 7 : index
    %c1_203 = arith.constant 1 : index
    %c0_204 = arith.constant 0 : index
    %125 = vector.load %arg6[%c7_202, %c1_203, %c0_204] : memref<8x28x30xf32, #tpu.memory_space<vmem>>, vector<1x24x30xf32>
    %126 = vector.shape_cast %125 : vector<1x24x30xf32> to vector<24x30xf32>
    %c168_205 = arith.constant 168 : index
    %c32_206 = arith.constant 32 : index
    %127 = vector.load %arg7[%c168_205, %c32_206] : memref<192x256xf32, #tpu.memory_space<vmem>>, vector<24x30xf32>
    tpu.vector_store %arg7[%c168_205, %c32_206], %126 {strides = array<i32>} : memref<192x256xf32, #tpu.memory_space<vmem>>, vector<24x30xf32>,
    %c7_207 = arith.constant 7 : index
    %c2_208 = arith.constant 2 : index
    %c0_209 = arith.constant 0 : index
    %128 = vector.load %arg6[%c7_207, %c2_208, %c0_209] : memref<8x28x30xf32, #tpu.memory_space<vmem>>, vector<1x24x30xf32>
    %129 = vector.shape_cast %128 : vector<1x24x30xf32> to vector<24x30xf32>
    %c168_210 = arith.constant 168 : index
    %c64_211 = arith.constant 64 : index
    %130 = vector.load %arg7[%c168_210, %c64_211] : memref<192x256xf32, #tpu.memory_space<vmem>>, vector<24x30xf32>
    tpu.vector_store %arg7[%c168_210, %c64_211], %129 {strides = array<i32>} : memref<192x256xf32, #tpu.memory_space<vmem>>, vector<24x30xf32>,
    %c7_212 = arith.constant 7 : index
    %c3_213 = arith.constant 3 : index
    %c0_214 = arith.constant 0 : index
    %131 = vector.load %arg6[%c7_212, %c3_213, %c0_214] : memref<8x28x30xf32, #tpu.memory_space<vmem>>, vector<1x24x30xf32>
    %132 = vector.shape_cast %131 : vector<1x24x30xf32> to vector<24x30xf32>
    %c168_215 = arith.constant 168 : index
    %c96_216 = arith.constant 96 : index
    %133 = vector.load %arg7[%c168_215, %c96_216] : memref<192x256xf32, #tpu.memory_space<vmem>>, vector<24x30xf32>
    tpu.vector_store %arg7[%c168_215, %c96_216], %132 {strides = array<i32>} : memref<192x256xf32, #tpu.memory_space<vmem>>, vector<24x30xf32>,
    %c7_217 = arith.constant 7 : index
    %c4_218 = arith.constant 4 : index
    %c0_219 = arith.constant 0 : index
    %134 = vector.load %arg6[%c7_217, %c4_218, %c0_219] : memref<8x28x30xf32, #tpu.memory_space<vmem>>, vector<1x24x30xf32>
    %135 = vector.shape_cast %134 : vector<1x24x30xf32> to vector<24x30xf32>
    %c168_220 = arith.constant 168 : index
    %c128_221 = arith.constant 128 : index
    %136 = vector.load %arg7[%c168_220, %c128_221] : memref<192x256xf32, #tpu.memory_space<vmem>>, vector<24x30xf32>
    tpu.vector_store %arg7[%c168_220, %c128_221], %135 {strides = array<i32>} : memref<192x256xf32, #tpu.memory_space<vmem>>, vector<24x30xf32>,
    %c0_222 = arith.constant 0 : index
    %c0_223 = arith.constant 0 : index
    %137 = vector.load %arg7[%c0_222, %c0_223] : memref<192x256xf32, #tpu.memory_space<vmem>>, vector<192x256xf32>
    %c0_224 = arith.constant 0 : index
    %c0_225 = arith.constant 0 : index
    %138 = vector.load %arg3[%c0_224, %c0_225] : memref<256x128xf32, #tpu.memory_space<vmem>>, vector<256x128xf32>
    %cst_226 = arith.constant dense<0.000000e+00> : vector<192x128xf32>
    %139 = tpu.matmul %137, %138, %cst_226 {dimension_numbers = #tpu.dot_dimension_numbers<[1], [0], [0], [1], [0, 0, 1, 1], [], []>} : vector<192x256xf32>, vector<256x128xf32>, vector<192x128xf32> -> vector<192x128xf32>
    %c0_227 = arith.constant 0 : index
    %c0_228 = arith.constant 0 : index
    %140 = vector.load %arg4[%c0_227, %c0_228] : memref<1x128xf32, #tpu.memory_space<vmem>>, vector<1x128xf32>
    %141 = vector.broadcast %140 : vector<1x128xf32> to vector<192x128xf32>
    %142 = arith.addf %139, %141 : vector<192x128xf32>
    %143 = arith.negf %142 : vector<192x128xf32>
    %144 = math.exp %143 : vector<192x128xf32>
    %cst_229 = arith.constant 1.000000e+00 : f32
    %145 = vector.broadcast %cst_229 : f32 to vector<192x128xf32>
    %146 = arith.addf %145, %144 : vector<192x128xf32>
    %147 = arith.divf %145, %146 : vector<192x128xf32>
    %148 = arith.mulf %142, %147 : vector<192x128xf32>
    %c0_230 = arith.constant 0 : index
    %c0_231 = arith.constant 0 : index
    %149 = vector.load %arg5[%c0_230, %c0_231] : memref<192x128xf32, #tpu.memory_space<vmem>>, vector<192x128xf32>
    tpu.vector_store %arg5[%c0_230, %c0_231], %148 {strides = array<i32>} : memref<192x128xf32, #tpu.memory_space<vmem>>, vector<192x128xf32>,
    return
  }
  func.func @transform_0(%arg0: i32, %arg1: i32) -> (i32, i32, i32, i32, i32) {
    %c0_i32 = arith.constant 0 : i32
    %c0_i32_0 = arith.constant 0 : i32
    %c0_i32_1 = arith.constant 0 : i32
    %c0_i32_2 = arith.constant 0 : i32
    return %arg0, %arg1, %c0_i32, %c0_i32_0, %c0_i32_1 : i32, i32, i32, i32, i32
  }
  func.func @transform_1(%arg0: i32, %arg1: i32) -> (i32, i32) {
    %c0_i32 = arith.constant 0 : i32
    %c0_i32_0 = arith.constant 0 : i32
    %c0_i32_1 = arith.constant 0 : i32
    return %c0_i32, %c0_i32_0 : i32, i32
  }
  func.func @transform_2(%arg0: i32, %arg1: i32) -> (i32, i32) {
    %c0_i32 = arith.constant 0 : i32
    %c0_i32_0 = arith.constant 0 : i32
    %c0_i32_1 = arith.constant 0 : i32
    return %c0_i32, %c0_i32_0 : i32, i32
  }
  func.func @transform_3(%arg0: i32, %arg1: i32) -> (i32, i32) {
    %c3_i32 = arith.constant 3 : i32
    %0 = arith.muli %arg0, %c3_i32 : i32
    %1 = arith.addi %0, %arg1 : i32
    %c0_i32 = arith.constant 0 : i32
    %c0_i32_0 = arith.constant 0 : i32
    return %1, %c0_i32 : i32, i32
  }
}

</mosaic_0001>

<bundles_post_ra>
// kernel: tpu_custom_call.1
= control target key start
LH: loop header
LB: loop body
LE: loop exit
PB: predicated region body
PF: predicated region fallthrough
CT: control target
= control target key end

     0   :  { %8 = vsyncpa [#allocation5], 0  ;;  %s3799_s0 = inlined_call_operand.vmem [shape: f32[2,3,12,28,6], index: 0, kind: input, shape index: {}]   ;;  %s3800_s1 = inlined_call_operand.vmem [shape: f32[256,128], index: 1, kind: input, shape index: {}]   ;;  %s3801_s2 = inlined_call_operand.vmem [shape: f32[1,128], index: 2, kind: input, shape index: {}]   ;;  %s3802_s3 = inlined_call_operand.hbm [shape: f32[1152,128], index: 3, kind: output, shape index: {}]  }
   0x1   :  { %10 = vsyncpa [#allocation5 + $0x1], 0  ;;  %s2751_s12 = smov 0   ;;  %s2753_s13 = smov 0  }
   0x2   :  { %s2755_s14 = smov 0   ;;  %s2757_s15 = smov 0  }
   0x3   :  { %s2759_s16 = smov 0   ;;  %s2761_s17 = smov 0  }
   0x4   :  { %s2763_s18 = smov 0   ;;  %s2765_s19 = smov 0  }
   0x5 LB: > { %s2199_s20 = sadd.s32 4294967295, %s2717_s19   ;;  %s25_s21 = sadd.s32 1, %s2709_s17  ;;  %s2717_s19 = sphi %s2765_s19, %s16_s19   ;;  %s2713_s18 = sphi %s2763_s18, %s3811_s18   ;;  %s2709_s17 = sphi %s2761_s17, %s3810_s17   ;;  %s2705_s16 = sphi %s2759_s16, %s3809_s16   ;;  %s2701_s15 = sphi %s2757_s15, %s3808_s15   ;;  %s2697_s14 = sphi %s2755_s14, %s3807_s14   ;;  %s2693_s13 = sphi %s2753_s13, %s3806_s13   ;;  %s2689_s12 = sphi %s2751_s12, %s3805_s12  }
   0x6   : > { %s28_s22 = sadd.s32 1, %s2713_s18  ;;  %p26_p0 = scmp.ge.s32.totalorder %s25_s21, 3 }
   0x7   : > { %s102_s23 = smul.u32 3, %s2713_s18  ;;  %s2200_s24 = sadd.s32 4294967294, %s2717_s19  }
   0x8   : > { %p119_p1 = scmp.ne.s32.totalorder %s2697_s14, %s2693_s13  ;;  %s3813_s21 = smov (%p26_p0, %s25_s21), 0 }
   0x9   : > { %s3815_s22 = smov (!%p26_p0, %s28_s22), %s2713_s18  ;;  %s103_s25 = sadd.s32 %s2709_s17, %s102_s23 }
   0xa   : > { %p120_p2 = scmp.eq.s32.totalorder %s2199_s20, 5  ;;  %p30_p3 = scmp.ge.s32.totalorder %s3815_s22, 2 }
   0xb   : > { %p125_p4 = scmp.ne.s32.totalorder %s2693_s13, %s2689_s12  ;;  %p126_p6 = scmp.eq.s32.totalorder %s2200_s24, 5 }
   0xc   : > { %p2804_p5 = por %p120_p2, %p119_p1  ;;  %s3817_s22 = smov (%p30_p3, %s3815_s22), 0 }
   0xd   : > { %p2810_p7 = por %p126_p6, %p125_p4  ;;  %p2203_p8 = scmp.ge.s32.totalorder %s2717_s19, 1 }
   0xe   : > { %s104_s28 = smul.u32 3, %s3817_s22  ;;  %p162_p9 = scmp.lt.s32.totalorder %s2717_s19, 7 }
   0xf   : > { %s109_s4 = sadd.s32 1, %s2697_s14 }
  0x10   : > { %s105_s29 = sadd.s32 %s104_s28, %s3813_s21  ;;  %p163_p10 = pnand %p2203_p8, %p162_p9 }
  0x11   : > { %s106_s30 = ssub.s32 %s103_s25, %s105_s29  ;;  %p190_p12 = scmp.lt.s32.totalorder (!%p163_p10), %s2705_s16, 1  ;;  %vm282_vm0 = vcmask (!%p163_p10), 48128   ;;  %v2722_v20 = vmov (!%p163_p10), 0.0   ;;  %vm286_vm1 = vcmask (!%p163_p10), 44032   ;;  %vm477_vm2 = vcmask (!%p163_p10), 97328  }
  0x12   : > { %p107_p11 = scmp.eq.s32.totalorder %s106_s30, 0  ;;  %166 = sbr.rel (%p163_p10) target bundleno = 813 (0x32d), region = 32  ;;  %203 = vst [vmem:[#allocation3 + $0x8] sm:$0xff] (!%p163_p10), %v2722_v20  ;;  %202 = vst [vmem:[#allocation3] sm:$0xff] (!%p163_p10), %v2722_v20  ;;  %vm672_vm3 = vcmask (!%p163_p10), 146528   ;;  %vm867_vm4 = vcmask (!%p163_p10), 195728  }
  0x13   : > { %p192_p13 = scmp.lt.s32.totalorder (!%p163_p10), %s2701_s15, 2  ;;  %s2719_s25 = smov (!%p163_p10), 6   ;;  %204 = vst [vmem:[#allocation3 + $0x10] sm:$0xff] (!%p163_p10), %v2722_v20  ;;  %205 = vst [vmem:[#allocation3 + $0x18] sm:$0xff] (!%p163_p10), %v2722_v20  ;;  %vm1062_vm5 = vcmask (!%p163_p10), 244928   ;;  %vm1099_vm6 = vcmask (!%p163_p10), 244736  }
  0x14   : > { %s2820_s5 = scalar_select %p107_p11, %s2697_s14, %s109_s4  }
  0x15   : > { %s2720_s28 = smov (!%p163_p10), 12   ;;  %s2721_s29 = smov (!%p163_p10), 18   ;;  %206 = vst [vmem:[#allocation3 + $0x20] sm:$0xff] (!%p163_p10), %v2722_v20  ;;  %207 = vst [vmem:[#allocation3 + $0x28] sm:$0xff] (!%p163_p10), %v2722_v20  ;;  %vm481_vm7 = vcmask (!%p163_p10), 93232   ;;  %vm676_vm8 = vcmask (!%p163_p10), 142432  }
  0x16   : > { %208 = vst [vmem:[#allocation3 + $0x30] sm:$0xff] (!%p163_p10), %v2722_v20  ;;  %209 = vst [vmem:[#allocation3 + $0x38] sm:$0xff] (!%p163_p10), %v2722_v20  ;;  %s2723_s30 = smov (!%p163_p10), 24   ;;  %vm871_vm9 = vcmask (!%p163_p10), 191632   ;;  %vm1066_vm10 = vcmask (!%p163_p10), 240832   ;;  %vm1118_vm11 = vcmask (!%p163_p10), 507136  }
  0x17   : > { %210 = vst [vmem:[#allocation3 + $0x40] sm:$0xff] (!%p163_p10), %v2722_v20  ;;  %211 = vst [vmem:[#allocation3 + $0x48] sm:$0xff] (!%p163_p10), %v2722_v20  ;;  %vm1137_vm12 = vcmask (!%p163_p10), 769536   ;;  %vm1156_vm13 = vcmask (!%p163_p10), 1031936   ;;  %s187_s23 = sand.u32 (!%p163_p10), 1, %s2693_s13  }
  0x18   : > { %212 = vst [vmem:[#allocation3 + $0x50] sm:$0xff] (!%p163_p10), %v2722_v20  ;;  %213 = vst [vmem:[#allocation3 + $0x58] sm:$0xff] (!%p163_p10), %v2722_v20 }
  0x19   : > { %s191_s6 = scalar_select %p190_p12, %s2705_s16, 1  ;;  %214 = vst [vmem:[#allocation3 + $0x60] sm:$0xff] %v2722_v20  ;;  %215 = vst [vmem:[#allocation3 + $0x68] sm:$0xff] %v2722_v20 }
  0x1a   : > { %s193_s7 = scalar_select %p192_p13, %s2701_s15, 2  ;;  %216 = vst [vmem:[#allocation3 + $0x70] sm:$0xff] %v2722_v20  ;;  %217 = vst [vmem:[#allocation3 + $0x78] sm:$0xff] %v2722_v20 }
  0x1b   : > { %s2444_s8 = smul.u32 144, %s191_s6  ;;  %218 = vst [vmem:[#allocation3 + $0x80] sm:$0xff] %v2722_v20  ;;  %219 = vst [vmem:[#allocation3 + $0x88] sm:$0xff] %v2722_v20 }
  0x1c   : > { %s2443_s9 = smul.u32 48, %s193_s7  ;;  %220 = vst [vmem:[#allocation3 + $0x90] sm:$0xff] %v2722_v20  ;;  %221 = vst [vmem:[#allocation3 + $0x98] sm:$0xff] %v2722_v20 }
  0x1d   : > { %222 = vst [vmem:[#allocation3 + $0xa0] sm:$0xff] %v2722_v20  ;;  %223 = vst [vmem:[#allocation3 + $0xa8] sm:$0xff] %v2722_v20 }
  0x1e   : > { %s196_s10 = sadd.s32 %s2444_s8, %s2443_s9  ;;  %224 = vst [vmem:[#allocation3 + $0xb0] sm:$0xff] %v2722_v20  ;;  %225 = vst [vmem:[#allocation3 + $0xb8] sm:$0xff] %v2722_v20 }
  0x1f   : > { %s2204_s11 = sshll.u32 %s196_s10, 3  ;;  %226 = vst [vmem:[#allocation3 + $0xc0] sm:$0xff] %v2722_v20  ;;  %227 = vst [vmem:[#allocation3 + $0xc8] sm:$0xff] %v2722_v20  ;;  %s2726_s10 = smov 64  }
  0x20   : > { %s2829_s24 = scalar_lea.vmem %s3799_s0, %s2204_s11  ;;  %228 = vst [vmem:[#allocation3 + $0xd0] sm:$0xff] %v2722_v20  ;;  %229 = vst [vmem:[#allocation3 + $0xd8] sm:$0xff] %v2722_v20 }
  0x21   : > { %v2832_v0 = vld [vmem:[%s2829_s24 + $0xa0] sm:$0xff]  ;;  %v2836_v2 = vld [vmem:[%s2829_s24 + $0xa8] sm:$0xff]  ;;  %v2882_v10 = vld [vmem:[%s2829_s24 + $0xb0] sm:$0xff]  ;;  %230 = vst [vmem:[#allocation3 + $0xe0] sm:$0xff] %v2722_v20 }
  0x22   : > { %v2205_v1 = vld [vmem:[%s2829_s24 + $0x20] sm:$0xff]  ;;  %413 = vrot.lane.b32.xlu1 %v2832_v0, %s2719_s25  ;;  %v2206_v3 = vld [vmem:[%s2829_s24 + $0x28] sm:$0xff]  ;;  %305 = vst.msk [vmem:[#allocation2 + $0xa8] sm:$0xff] %vm282_vm0, %v2836_v2  ;;  %304 = vst.msk [vmem:[#allocation2 + $0xa0] sm:$0xff] %vm282_vm0, %v2832_v0 }
  0x23   : > { %381 = vrot.lane.b32.xlu0 %v2205_v1, %s2719_s25  ;;  %v2843_v4 = vld [vmem:[%s2829_s24 + $0x48] sm:$0xff]  ;;  %288 = vst.msk [vmem:[#allocation2 + $0x20] sm:$0xff] %vm282_vm0, %v2205_v1  ;;  %v2851_v5 = vld [vmem:[%s2829_s24 + $0x40] sm:$0xff]  ;;  %289 = vst.msk [vmem:[#allocation2 + $0x28] sm:$0xff] %vm282_vm0, %v2206_v3 }
  0x24   : > { %v2854_v6 = vld [vmem:[%s2829_s24 + $0xc8] sm:$0xff]  ;;  %v2857_v7 = vld [vmem:[%s2829_s24 + $0xc0] sm:$0xff]  ;;  %293 = vst.msk [vmem:[#allocation2 + $0x48] sm:$0xff] %vm282_vm0, %v2843_v4  ;;  %292 = vst.msk [vmem:[#allocation2 + $0x40] sm:$0xff] %vm282_vm0, %v2851_v5 }
  0x25   : > { %309 = vst.msk [vmem:[#allocation2 + $0xc8] sm:$0xff] %vm282_vm0, %v2854_v6  ;;  %308 = vst.msk [vmem:[#allocation2 + $0xc0] sm:$0xff] %vm282_vm0, %v2857_v7  ;;  %v2869_v8 = vld [vmem:[%s2829_s24 + $0x88] sm:$0xff]  ;;  %v2872_v9 = vld [vmem:[%s2829_s24 + $0x80] sm:$0xff] }
  0x26   : > { %415 = vrot.lane.b32.xlu1 %v2836_v2, %s2719_s25  ;;  %300 = vst.msk [vmem:[#allocation2 + $0x80] sm:$0xff] %vm282_vm0, %v2872_v9  ;;  %301 = vst.msk [vmem:[#allocation2 + $0x88] sm:$0xff] %vm282_vm0, %v2869_v8  ;;  %v2885_v11 = vld [vmem:[%s2829_s24 + $0x30] sm:$0xff]  ;;  %v250_v13 = vld [vmem:[%s2829_s24] sm:$0xff] }
  0x27   : > { %383 = vrot.lane.b32.xlu0 %v2206_v3, %s2719_s25  ;;  %306 = vst.msk [vmem:[#allocation2 + $0xb0] sm:$0xff] %vm282_vm0, %v2882_v10  ;;  %290 = vst.msk [vmem:[#allocation2 + $0x30] sm:$0xff] %vm282_vm0, %v2885_v11  ;;  %v2892_v12 = vld [vmem:[%s2829_s24 + $0x90] sm:$0xff]  ;;  %v2906_v14 = vld [vmem:[%s2829_s24 + $0x68] sm:$0xff] }
  0x28   : > { %302 = vst.msk [vmem:[#allocation2 + $0x90] sm:$0xff] %vm282_vm0, %v2892_v12  ;;  %v2909_v15 = vld [vmem:[%s2829_s24 + $0x60] sm:$0xff]  ;;  %283 = vst.msk [vmem:[#allocation2] sm:$0xff] %vm282_vm0, %v250_v13  ;;  %v251_v16 = vld [vmem:[%s2829_s24 + $0x8] sm:$0xff] }
  0x29   : > { %284 = vst.msk [vmem:[#allocation2 + $0x8] sm:$0xff] %vm282_vm0, %v251_v16  ;;  %v2919_v17 = vld [vmem:[%s2829_s24 + $0xe8] sm:$0xff]  ;;  %v2922_v18 = vld [vmem:[%s2829_s24 + $0xe0] sm:$0xff]  ;;  %v252_v19 = vld [vmem:[%s2829_s24 + $0x10] sm:$0xff] }
  0x2a   : > { %578 = vrot.lane.b32.xlu1 %v2843_v4, %s2720_s28  ;;  %285 = vst.msk [vmem:[#allocation2 + $0x10] sm:$0xff] %vm282_vm0, %v252_v19  ;;  %231 = vst [vmem:[#allocation3 + $0xe8] sm:$0xff] %v2722_v20  ;;  %v2935_v21 = vld [vmem:[%s2829_s24 + $0x108] sm:$0xff]  ;;  %v2938_v22 = vld [vmem:[%s2829_s24 + $0x100] sm:$0xff] }
  0x2b   : > { %576 = vrot.lane.b32.xlu0 %v2851_v5, %s2720_s28  ;;  %232 = vst [vmem:[#allocation3 + $0xf0] sm:$0xff] %v2722_v20  ;;  %233 = vst [vmem:[#allocation3 + $0xf8] sm:$0xff] %v2722_v20  ;;  %v2949_v23 = vld [vmem:[%s2829_s24 + $0xd0] sm:$0xff]  ;;  %v269_v25 = vld [vmem:[%s2829_s24 + $0x98] sm:$0xf] }
  0x2c   : > { %234 = vst [vmem:[#allocation3 + $0x100] sm:$0xff] %v2722_v20  ;;  %235 = vst [vmem:[#allocation3 + $0x108] sm:$0xff] %v2722_v20  ;;  %v2239_v24 = vld [vmem:[%s2829_s24 + $0x50] sm:$0xff]  ;;  %v253_v26 = vld [vmem:[%s2829_s24 + $0x18] sm:$0xf] }
  0x2d   : > { %236 = vst [vmem:[#allocation3 + $0x110] sm:$0xff] %v2722_v20  ;;  %237 = vst [vmem:[#allocation3 + $0x118] sm:$0xff] %v2722_v20  ;;  %v2960_v27 = vld [vmem:[%s2829_s24 + $0xf0] sm:$0xff]  ;;  %v2224_v30 = vld [vmem:[%s2829_s24 + $0xb8] sm:$0xf] }
  0x2e   : > { %610 = vrot.lane.b32.xlu1 %v2854_v6, %s2720_s28  ;;  %238 = vst [vmem:[#allocation3 + $0x120] sm:$0xff] %v2722_v20  ;;  %239 = vst [vmem:[#allocation3 + $0x128] sm:$0xff] %v2722_v20  ;;  %v2963_v28 = vld [vmem:[%s2829_s24 + $0x70] sm:$0xff]  ;;  %v2208_v31 = vld [vmem:[%s2829_s24 + $0x38] sm:$0xf] }
  0x2f   : > { %608 = vrot.lane.b32.xlu0 %v2857_v7, %s2720_s28  ;;  %240 = vst [vmem:[#allocation3 + $0x130] sm:$0xff] %v2722_v20  ;;  %241 = vst [vmem:[#allocation3 + $0x138] sm:$0xff] %v2722_v20  ;;  %v2970_v29 = vld [vmem:[%s2829_s24 + $0x110] sm:$0xff]  ;;  %v2256_v32 = vld [vmem:[%s2829_s24 + $0xd8] sm:$0xf] }
  0x30   : > { %242 = vst [vmem:[#allocation3 + $0x140] sm:$0xff] %v2722_v20  ;;  %243 = vst [vmem:[#allocation3 + $0x148] sm:$0xff] %v2722_v20  ;;  %v2240_v33 = vld [vmem:[%s2829_s24 + $0x58] sm:$0xf]  ;;  %v3021_v38 = vld [vmem:[%s2829_s24 + $0x128] sm:$0xff] }
  0x31   : > { %244 = vst [vmem:[#allocation3 + $0x150] sm:$0xff] %v2722_v20  ;;  %245 = vst [vmem:[#allocation3 + $0x158] sm:$0xff] %v2722_v20  ;;  %v2288_v34 = vld [vmem:[%s2829_s24 + $0xf8] sm:$0xf]  ;;  %v3024_v39 = vld [vmem:[%s2829_s24 + $0x120] sm:$0xff] }
  0x32   : > { %773 = vrot.lane.b32.xlu1 %v2906_v14, %s2721_s29  ;;  %246 = vst [vmem:[#allocation3 + $0x160] sm:$0xff] %v2722_v20  ;;  %247 = vst [vmem:[#allocation3 + $0x168] sm:$0xff] %v2722_v20  ;;  %v2272_v35 = vld [vmem:[%s2829_s24 + $0x78] sm:$0xf]  ;;  %v3046_v42 = vld [vmem:[%s2829_s24 + $0x130] sm:$0xff] }
  0x33   : > { %771 = vrot.lane.b32.xlu0 %v2909_v15, %s2721_s29  ;;  %248 = vst [vmem:[#allocation3 + $0x170] sm:$0xff] %v2722_v20  ;;  %249 = vst [vmem:[#allocation3 + $0x178] sm:$0xff] %v2722_v20  ;;  %v2320_v36 = vld [vmem:[%s2829_s24 + $0x118] sm:$0xf] }
  0x34   : > { %303 = vst.msk [vmem:[#allocation2 + $0x98] sm:$0xf] %vm286_vm1, %v269_v25  ;;  %287 = vst.msk [vmem:[#allocation2 + $0x18] sm:$0xf] %vm286_vm1, %v253_v26  ;;  %v2304_v37 = vld [vmem:[%s2829_s24 + $0x98] sm:$0xf] }
  0x35   : > { %v273_v40 = vld [vmem:[%s2829_s24 + $0xb8] sm:$0xf] }
  0x36   : > { %805 = vrot.lane.b32.xlu1 %v2919_v17, %s2721_s29  ;;  %v257_v41 = vld [vmem:[%s2829_s24 + $0x38] sm:$0xf]  ;;  %307 = vst.msk [vmem:[#allocation2 + $0xb8] sm:$0xf] %vm286_vm1, %v273_v40 }
  0x37   : > { %803 = vrot.lane.b32.xlu0 %v2922_v18, %s2721_s29  ;;  %291 = vst.msk [vmem:[#allocation2 + $0x38] sm:$0xf] %vm286_vm1, %v257_v41  ;;  %v2228_v43 = vld [vmem:[%s2829_s24 + $0xd8] sm:$0xf] }
  0x38   : > { %v2212_v44 = vld [vmem:[%s2829_s24 + $0x58] sm:$0xf] }
  0x39   : > { %v2260_v45 = vld [vmem:[%s2829_s24 + $0xf8] sm:$0xf] }
  0x3a   : > { %968 = vrot.lane.b32.xlu1 %v2869_v8, %s2723_s30  ;;  %v2244_v46 = vld [vmem:[%s2829_s24 + $0x78] sm:$0xf] }
  0x3b   : > { %966 = vrot.lane.b32.xlu0 %v2872_v9, %s2723_s30  ;;  %v2292_v49 = vld [vmem:[%s2829_s24 + $0x118] sm:$0xf] }
  0x3c   : > { %v2276_v50 = vld [vmem:[%s2829_s24 + $0x98] sm:$0xf] }
  0x3d   : > { %v2324_v53 = vld [vmem:[%s2829_s24 + $0x138] sm:$0xf] }
  0x3e   : > { %1000 = vrot.lane.b32.xlu1 %v2935_v21, %s2723_s30  ;;  %v2308_v54 = vld [vmem:[%s2829_s24 + $0xb8] sm:$0xf] }
  0x3f   : > { %998 = vrot.lane.b32.xlu0 %v2938_v22, %s2723_s30 }
  0x42   : > { %417 = vrot.lane.b32.xlu1 %v2882_v10, %s2719_s25 }
  0x43   : > { %385 = vrot.lane.b32.xlu0 %v2885_v11, %s2719_s25 }
  0x46   : > { %612 = vrot.lane.b32.xlu1 %v2949_v23, %s2720_s28 }
  0x47   : > { %580 = vrot.lane.b32.xlu0 %v2239_v24, %s2720_s28 }
  0x4a   : > { %807 = vrot.lane.b32.xlu1 %v2960_v27, %s2721_s29 }
  0x4b   : > { %775 = vrot.lane.b32.xlu0 %v2963_v28, %s2721_s29 }
  0x4e   : > { %1002 = vrot.lane.b32.xlu1 %v2970_v29, %s2723_s30 }
  0x4f   : > { %970 = vrot.lane.b32.xlu0 %v2892_v12, %s2723_s30 }
  0x52   : > { %419 = vrot.lane.b32.xlu1 %v2224_v30, %s2719_s25 }
  0x53   : > { %387 = vrot.lane.b32.xlu0 %v2208_v31, %s2719_s25  ;;  %v3127_v31 = vld [vmem:[%s2829_s24 + $0x148] sm:$0xff] }
  0x56   : > { %614 = vrot.lane.b32.xlu1 %v2256_v32, %s2720_s28  ;;  %v3130_v32 = vld [vmem:[%s2829_s24 + $0x140] sm:$0xff] }
  0x57   : > { %582 = vrot.lane.b32.xlu0 %v2240_v33, %s2720_s28 }
  0x5a   : > { %809 = vrot.lane.b32.xlu1 %v2288_v34, %s2721_s29 }
  0x5b   : > { %777 = vrot.lane.b32.xlu0 %v2272_v35, %s2721_s29 }
  0x5e   : > { %1004 = vrot.lane.b32.xlu1 %v2320_v36, %s2723_s30 }
  0x5f   : > { %972 = vrot.lane.b32.xlu0 %v2304_v37, %s2723_s30 }
  0x62   : > { %391 = vrot.lane.b32.xlu1 %v2843_v4, %s2719_s25 }
  0x63   : > { %389 = vrot.lane.b32.xlu0 %v2851_v5, %s2719_s25 }
  0x66   : > { %423 = vrot.lane.b32.xlu1 %v2854_v6, %s2719_s25 }
  0x67   : > { %421 = vrot.lane.b32.xlu0 %v2857_v7, %s2719_s25 }
  0x6a   : > { %586 = vrot.lane.b32.xlu1 %v2906_v14, %s2720_s28 }
  0x6b   : > { %584 = vrot.lane.b32.xlu0 %v2909_v15, %s2720_s28 }
  0x6e   : > { %618 = vrot.lane.b32.xlu1 %v2919_v17, %s2720_s28 }
  0x6f   : > { %616 = vrot.lane.b32.xlu0 %v2922_v18, %s2720_s28 }
  0x72   : > { %781 = vrot.lane.b32.xlu1 %v2869_v8, %s2721_s29 }
  0x73   : > { %779 = vrot.lane.b32.xlu0 %v2872_v9, %s2721_s29 }
  0x76   : > { %813 = vrot.lane.b32.xlu1 %v2935_v21, %s2721_s29 }
  0x77   : > { %811 = vrot.lane.b32.xlu0 %v2938_v22, %s2721_s29 }
  0x7a   : > { %976 = vrot.lane.b32.xlu1 %v2836_v2, %s2723_s30 }
  0x7b   : > { %974 = vrot.lane.b32.xlu0 %v2832_v0, %s2723_s30 }
  0x7e   : > { %1008 = vrot.lane.b32.xlu1 %v3021_v38, %s2723_s30 }
  0x7f   : > { %1006 = vrot.lane.b32.xlu0 %v3024_v39, %s2723_s30 }
  0x82   : > { %425 = vrot.lane.b32.xlu1 %v2949_v23, %s2719_s25 }
  0x83   : > { %393 = vrot.lane.b32.xlu0 %v2239_v24, %s2719_s25 }
  0x86   : > { %620 = vrot.lane.b32.xlu1 %v2960_v27, %s2720_s28 }
  0x87   : > { %588 = vrot.lane.b32.xlu0 %v2963_v28, %s2720_s28 }
  0x8a   : > { %815 = vrot.lane.b32.xlu1 %v2970_v29, %s2721_s29 }
  0x8b   : > { %783 = vrot.lane.b32.xlu0 %v2892_v12, %s2721_s29 }
  0x8e   : > { %1010 = vrot.lane.b32.xlu1 %v3046_v42, %s2723_s30 }
  0x8f   : > { %978 = vrot.lane.b32.xlu0 %v2882_v10, %s2723_s30 }
  0x92   : > { %427 = vrot.lane.b32.xlu1 %v2228_v43, %s2719_s25 }
  0x93   : > { %395 = vrot.lane.b32.xlu0 %v2212_v44, %s2719_s25  ;;  %v277_v44 = vld [vmem:[%s2829_s24 + $0xd8] sm:$0xf] }
  0x94   : > { %v414_v47 = vpop.permute.xlu1 %413  ;;  %311 = vst.msk [vmem:[#allocation2 + $0xd8] sm:$0xf] %vm286_vm1, %v277_v44 }
  0x95   : > { %v382_v48 = vpop.permute.xlu0 %381  ;;  %495 = vst.msk [vmem:[#allocation2 + $0x80] sm:$0xff] %vm477_vm2, %v414_v47 }
  0x96   : > { %478 = vst.msk [vmem:[#allocation2] sm:$0xff] %vm477_vm2, %v382_v48  ;;  %622 = vrot.lane.b32.xlu1 %v2260_v45, %s2720_s28  ;;  %v261_v45 = vld [vmem:[%s2829_s24 + $0x58] sm:$0xf] }
  0x97   : > { %590 = vrot.lane.b32.xlu0 %v2244_v46, %s2720_s28  ;;  %295 = vst.msk [vmem:[#allocation2 + $0x58] sm:$0xf] %vm286_vm1, %v261_v45 }
  0x98   : > { %v416_v51 = vpop.permute.xlu1 %415 }
  0x99   : > { %v384_v52 = vpop.permute.xlu0 %383  ;;  %496 = vst.msk [vmem:[#allocation2 + $0x88] sm:$0xff] %vm477_vm2, %v416_v51 }
  0x9a   : > { %479 = vst.msk [vmem:[#allocation2 + $0x8] sm:$0xff] %vm477_vm2, %v384_v52  ;;  %817 = vrot.lane.b32.xlu1 %v2292_v49, %s2721_s29 }
  0x9b   : > { %785 = vrot.lane.b32.xlu0 %v2276_v50, %s2721_s29  ;;  %v3163_v50 = vld [vmem:[%s2829_s24 + $0x150] sm:$0xff] }
  0x9c   : > { %v579_v55 = vpop.permute.xlu1 %578 }
  0x9d   : > { %v577_v56 = vpop.permute.xlu0 %576  ;;  %674 = vst.msk [vmem:[#allocation2 + $0x8] sm:$0xff] %vm672_vm3, %v579_v55  ;;  %v2216_v55 = vld [vmem:[%s2829_s24 + $0x78] sm:$0xf] }
  0x9e   : > { %673 = vst.msk [vmem:[#allocation2] sm:$0xff] %vm672_vm3, %v577_v56  ;;  %1012 = vrot.lane.b32.xlu1 %v2324_v53, %s2723_s30 }
  0x9f   : > { %980 = vrot.lane.b32.xlu0 %v2308_v54, %s2723_s30  ;;  %v2232_v54 = vld [vmem:[%s2829_s24 + $0xf8] sm:$0xf] }
  0xa0   : > { %v611_v57 = vpop.permute.xlu1 %610 }
  0xa1   : > { %v609_v58 = vpop.permute.xlu0 %608  ;;  %691 = vst.msk [vmem:[#allocation2 + $0x88] sm:$0xff] %vm672_vm3, %v611_v57 }
  0xa2   : > { %690 = vst.msk [vmem:[#allocation2 + $0x80] sm:$0xff] %vm672_vm3, %v609_v58  ;;  %399 = vrot.lane.b32.xlu1 %v2906_v14, %s2719_s25  ;;  %v276_v14 = vld [vmem:[%s2829_s24 + $0xd0] sm:$0xff]  ;;  %v2264_v58 = vld [vmem:[%s2829_s24 + $0x118] sm:$0xf] }
  0xa3   : > { %397 = vrot.lane.b32.xlu0 %v2909_v15, %s2719_s25  ;;  %v260_v15 = vld [vmem:[%s2829_s24 + $0x50] sm:$0xff]  ;;  %310 = vst.msk [vmem:[#allocation2 + $0xd0] sm:$0xff] %vm282_vm0, %v276_v14  ;;  %v279_v14 = vld [vmem:[%s2829_s24 + $0xe8] sm:$0xff] }
  0xa4   : > { %v774_v59 = vpop.permute.xlu1 %773  ;;  %294 = vst.msk [vmem:[#allocation2 + $0x50] sm:$0xff] %vm282_vm0, %v260_v15  ;;  %v2328_v15 = vld [vmem:[%s2829_s24 + $0x158] sm:$0xf]  ;;  %313 = vst.msk [vmem:[#allocation2 + $0xe8] sm:$0xff] %vm282_vm0, %v279_v14 }
  0xa5   : > { %v772_v60 = vpop.permute.xlu0 %771  ;;  %869 = vst.msk [vmem:[#allocation2 + $0x8] sm:$0xff] %vm867_vm4, %v774_v59  ;;  %v2248_v59 = vld [vmem:[%s2829_s24 + $0x98] sm:$0xf] }
  0xa6   : > { %868 = vst.msk [vmem:[#allocation2] sm:$0xff] %vm867_vm4, %v772_v60  ;;  %431 = vrot.lane.b32.xlu1 %v2919_v17, %s2719_s25  ;;  %v1698_v14 = vld [vmem:[%s3800_s1 + $0x78] sm:$0xff] }
  0xa7   : > { %429 = vrot.lane.b32.xlu0 %v2922_v18, %s2719_s25 }
  0xa8   : > { %v806_v61 = vpop.permute.xlu1 %805 }
  0xa9   : > { %v804_v62 = vpop.permute.xlu0 %803  ;;  %886 = vst.msk [vmem:[#allocation2 + $0x88] sm:$0xff] %vm867_vm4, %v806_v61 }
  0xaa   : > { %885 = vst.msk [vmem:[#allocation2 + $0x80] sm:$0xff] %vm867_vm4, %v804_v62  ;;  %594 = vrot.lane.b32.xlu1 %v2869_v8, %s2720_s28  ;;  %v263_v62 = vld [vmem:[%s2829_s24 + $0x68] sm:$0xff] }
  0xab   : > { %592 = vrot.lane.b32.xlu0 %v2872_v9, %s2720_s28  ;;  %297 = vst.msk [vmem:[#allocation2 + $0x68] sm:$0xff] %vm282_vm0, %v263_v62  ;;  %v2330_v62 = vld [vmem:[%s2829_s24 + $0x168] sm:$0xff] }
  0xac   : > { %v969_v63 = vpop.permute.xlu1 %968 }
  0xad   : > { %v967_v1 = vpop.permute.xlu0 %966  ;;  %1064 = vst.msk [vmem:[#allocation2 + $0x8] sm:$0xff] %vm1062_vm5, %v969_v63  ;;  %v262_v63 = vld [vmem:[%s2829_s24 + $0x60] sm:$0xff] }
  0xae   : > { %1063 = vst.msk [vmem:[#allocation2] sm:$0xff] %vm1062_vm5, %v967_v1  ;;  %626 = vrot.lane.b32.xlu1 %v2935_v21, %s2720_s28  ;;  %v2296_v1 = vld [vmem:[%s2829_s24 + $0x138] sm:$0xf] }
  0xaf   : > { %624 = vrot.lane.b32.xlu0 %v2938_v22, %s2720_s28  ;;  %296 = vst.msk [vmem:[#allocation2 + $0x60] sm:$0xff] %vm282_vm0, %v262_v63  ;;  %v2329_v63 = vld [vmem:[%s2829_s24 + $0x160] sm:$0xff] }
  0xb0   : > { %v1001_v3 = vpop.permute.xlu1 %1000 }
  0xb1   : > { %v999_v4 = vpop.permute.xlu0 %998  ;;  %1081 = vst.msk [vmem:[#allocation2 + $0x88] sm:$0xff] %vm1062_vm5, %v1001_v3  ;;  %v2280_v3 = vld [vmem:[%s2829_s24 + $0xb8] sm:$0xf] }
  0xb2   : > { %1080 = vst.msk [vmem:[#allocation2 + $0x80] sm:$0xff] %vm1062_vm5, %v999_v4  ;;  %789 = vrot.lane.b32.xlu1 %v2836_v2, %s2721_s29 }
  0xb3   : > { %787 = vrot.lane.b32.xlu0 %v2832_v0, %s2721_s29 }
  0xb4   : > { %v418_v11 = vpop.permute.xlu1 %417  ;;  %v1097_v19 = vld [vmem:[#allocation2 + $0x8] sm:$0xff] }
  0xb5   : > { %v1160_v5 = vld [vmem:[#allocation2 + $0x4] sm:$0xff]  ;;  %v386_v13 = vpop.permute.xlu0 %385  ;;  %497 = vst.msk [vmem:[#allocation2 + $0x90] sm:$0xff] %vm477_vm2, %v418_v11 }
  0xb6   : > { %480 = vst.msk [vmem:[#allocation2 + $0x10] sm:$0xff] %vm477_vm2, %v386_v13  ;;  %821 = vrot.lane.b32.xlu1 %v3021_v38, %s2721_s29  ;;  %v1096_v16 = vld [vmem:[#allocation2] sm:$0xff] }
  0xb7   : > { %1163 = vst.msk [vmem:[#allocation3 + $0x8] sm:$0xff] %vm1099_vm6, %v1160_v5  ;;  %819 = vrot.lane.b32.xlu0 %v3024_v39, %s2721_s29  ;;  %1100 = vst.msk [vmem:[#allocation3] sm:$0xff] %vm1099_vm6, %v1096_v16  ;;  %v2312_v16 = vld [vmem:[%s2829_s24 + $0xd8] sm:$0xf] }
  0xb8   : > { %1101 = vst.msk [vmem:[#allocation3 + $0x10] sm:$0xff] %vm1099_vm6, %v1097_v19  ;;  %v613_v24 = vpop.permute.xlu1 %612  ;;  %v1369_v30 = vld [vmem:[#allocation2 + $0x88] sm:$0xff]  ;;  %v278_v19 = vld [vmem:[%s2829_s24 + $0xe0] sm:$0xff] }
  0xb9   : > { %v1428_v20 = vld [vmem:[#allocation2 + $0x84] sm:$0xff]  ;;  %v581_v25 = vpop.permute.xlu0 %580  ;;  %692 = vst.msk [vmem:[#allocation2 + $0x90] sm:$0xff] %vm672_vm3, %v613_v24 }
  0xba   : > { %675 = vst.msk [vmem:[#allocation2 + $0x10] sm:$0xff] %vm672_vm3, %v581_v25  ;;  %v1368_v26 = vld [vmem:[#allocation2 + $0x80] sm:$0xff]  ;;  %984 = vrot.lane.b32.xlu1 %v2854_v6, %s2723_s30 }
  0xbb   : > { %1431 = vst.msk [vmem:[#allocation3 + $0xc8] sm:$0xff] %vm1099_vm6, %v1428_v20  ;;  %982 = vrot.lane.b32.xlu0 %v2857_v7, %s2723_s30  ;;  %1371 = vst.msk [vmem:[#allocation3 + $0xc0] sm:$0xff] %vm1099_vm6, %v1368_v26 }
  0xbc   : > { %1372 = vst.msk [vmem:[#allocation3 + $0xd0] sm:$0xff] %vm1099_vm6, %v1369_v30  ;;  %v808_v33 = vpop.permute.xlu1 %807 }
  0xbd   : > { %v776_v34 = vpop.permute.xlu0 %775  ;;  %887 = vst.msk [vmem:[#allocation2 + $0x90] sm:$0xff] %vm867_vm4, %v808_v33 }
  0xbe   : > { %v1636_v35 = vld [vmem:[#allocation3 + $0x8] sm:$0xff]  ;;  %870 = vst.msk [vmem:[#allocation2 + $0x10] sm:$0xff] %vm867_vm4, %v776_v34  ;;  %1016 = vrot.lane.b32.xlu1 %v3127_v31, %s2723_s30  ;;  %v1683_v34 = vld [vmem:[%s3800_s1] sm:$0xff] }
  0xbf   : > { %1786 = vmatprep.mubr.f32.mxu0 %v1636_v35  ;;  %1014 = vrot.lane.b32.xlu0 %v3130_v32, %s2723_s30  ;;  %312 = vst.msk [vmem:[#allocation2 + $0xe0] sm:$0xff] %vm282_vm0, %v278_v19  ;;  %v1684_v35 = vld [vmem:[%s3800_s1 + $0x8] sm:$0xff] }
  0xc0   : > { %v1003_v36 = vpop.permute.xlu1 %1002 }
  0xc1   : > { %v971_v37 = vpop.permute.xlu0 %970  ;;  %1082 = vst.msk [vmem:[#allocation2 + $0x90] sm:$0xff] %vm1062_vm5, %v1003_v36 }
  0xc2   : > { %v1660_v40 = vld [vmem:[#allocation3 + $0xc8] sm:$0xff]  ;;  %1065 = vst.msk [vmem:[#allocation2 + $0x10] sm:$0xff] %vm1062_vm5, %v971_v37  ;;  %433 = vrot.lane.b32.xlu1 %v2960_v27, %s2719_s25 }
  0xc3   : > { %1846 = vmatprep.mubr.f32.mxu1 %v1660_v40  ;;  %401 = vrot.lane.b32.xlu0 %v2963_v28, %s2719_s25 }
  0xc4   : > { %v420_v41 = vpop.permute.xlu1 %419 }
  0xc5   : > { %v388_v43 = vpop.permute.xlu0 %387  ;;  %498 = vst.msk [vmem:[#allocation2 + $0x98] sm:$0xf] %vm481_vm7, %v420_v41 }
  0xc6   : > { %482 = vst.msk [vmem:[#allocation2 + $0x18] sm:$0xf] %vm481_vm7, %v388_v43  ;;  %628 = vrot.lane.b32.xlu1 %v2970_v29, %s2720_s28 }
  0xc7   : > { %596 = vrot.lane.b32.xlu0 %v2892_v12, %s2720_s28 }
  0xc8   : > { %v1429_v28 = vld [vmem:[#allocation2 + $0x8c] sm:$0xff]  ;;  %v615_v47 = vpop.permute.xlu1 %614 }
  0xc9   : > { %v1161_v46 = vld [vmem:[#allocation2 + $0xc] sm:$0xff]  ;;  %v583_v48 = vpop.permute.xlu0 %582  ;;  %1432 = vst.msk [vmem:[#allocation3 + $0xd8] sm:$0xff] %vm1099_vm6, %v1429_v28 }
  0xca   : > { %1164 = vst.msk [vmem:[#allocation3 + $0x18] sm:$0xff] %vm1099_vm6, %v1161_v46  ;;  %823 = vrot.lane.b32.xlu1 %v3046_v42, %s2721_s29  ;;  %v1370_v49 = vld [vmem:[#allocation2 + $0x90] sm:$0xff] }
  0xcb   : > { %693 = vst.msk [vmem:[#allocation2 + $0x98] sm:$0xf] %vm676_vm8, %v615_v47  ;;  %677 = vst.msk [vmem:[#allocation2 + $0x18] sm:$0xf] %vm676_vm8, %v583_v48  ;;  %791 = vrot.lane.b32.xlu0 %v2882_v10, %s2721_s29  ;;  %v1098_v51 = vld [vmem:[#allocation2 + $0x10] sm:$0xff] }
  0xcc   : > { %1373 = vst.msk [vmem:[#allocation3 + $0xe0] sm:$0xff] %vm1099_vm6, %v1370_v49  ;;  %v810_v52 = vpop.permute.xlu1 %809  ;;  %1102 = vst.msk [vmem:[#allocation3 + $0x20] sm:$0xff] %vm1099_vm6, %v1098_v51  ;;  %v280_v51 = vld [vmem:[%s2829_s24 + $0xf0] sm:$0xff] }
  0xcd   : > { %v778_v53 = vpop.permute.xlu0 %777  ;;  %888 = vst.msk [vmem:[#allocation2 + $0x98] sm:$0xf] %vm871_vm9, %v810_v52  ;;  %v264_v52 = vld [vmem:[%s2829_s24 + $0x70] sm:$0xff] }
  0xce   : > { %872 = vst.msk [vmem:[#allocation2 + $0x18] sm:$0xf] %vm871_vm9, %v778_v53  ;;  %1018 = vrot.lane.b32.xlu1 %v3163_v50, %s2723_s30 }
  0xcf   : > { %986 = vrot.lane.b32.xlu0 %v2949_v23, %s2723_s30  ;;  %314 = vst.msk [vmem:[#allocation2 + $0xf0] sm:$0xff] %vm282_vm0, %v280_v51  ;;  %298 = vst.msk [vmem:[#allocation2 + $0x70] sm:$0xff] %vm282_vm0, %v264_v52  ;;  %v2284_v51 = vld [vmem:[%s2829_s24 + $0xd8] sm:$0xf] }
  0xd0   : > { %v1005_v56 = vpop.permute.xlu1 %1004 }
  0xd1   : > { %v973_v57 = vpop.permute.xlu0 %972  ;;  %1083 = vst.msk [vmem:[#allocation2 + $0x98] sm:$0xf] %vm1066_vm10, %v1005_v56 }
  0xd2   : > { %1067 = vst.msk [vmem:[#allocation2 + $0x18] sm:$0xf] %vm1066_vm10, %v973_v57  ;;  %435 = vrot.lane.b32.xlu1 %v2232_v54, %s2719_s25  ;;  %v1693_v57 = vld [vmem:[%s3800_s1 + $0x50] sm:$0xff] }
  0xd3   : > { %403 = vrot.lane.b32.xlu0 %v2216_v55, %s2719_s25 }
  0xd4   : > { %v392_v60 = vpop.permute.xlu1 %391 }
  0xd5   : > { %v390_v61 = vpop.permute.xlu0 %389  ;;  %484 = vst.msk [vmem:[#allocation2 + $0x28] sm:$0xff] %vm477_vm2, %v392_v60 }
  0xd6   : > { %483 = vst.msk [vmem:[#allocation2 + $0x20] sm:$0xff] %vm477_vm2, %v390_v61  ;;  %630 = vrot.lane.b32.xlu1 %v2264_v58, %s2720_s28  ;;  %v1694_v58 = vld [vmem:[%s3800_s1 + $0x58] sm:$0xff] }
  0xd7   : > { %598 = vrot.lane.b32.xlu0 %v2248_v59, %s2720_s28  ;;  %v2378_v59 = vpack.c.bf16 %v1694_v58, %v1693_v57 }
  0xd8   : > { %v1430_v4 = vld [vmem:[#allocation2 + $0x94] sm:$0xff]  ;;  %v424_v11 = vpop.permute.xlu1 %423 }
  0xd9   : > { %v1162_v5 = vld [vmem:[#allocation2 + $0x14] sm:$0xff]  ;;  %v422_v13 = vpop.permute.xlu0 %421  ;;  %1433 = vst.msk [vmem:[#allocation3 + $0xe8] sm:$0xff] %vm1099_vm6, %v1430_v4 }
  0xda   : > { %1165 = vst.msk [vmem:[#allocation3 + $0x28] sm:$0xff] %vm1099_vm6, %v1162_v5  ;;  %825 = vrot.lane.b32.xlu1 %v2296_v1, %s2721_s29 }
  0xdb   : > { %500 = vst.msk [vmem:[#allocation2 + $0xa8] sm:$0xff] %vm477_vm2, %v424_v11  ;;  %499 = vst.msk [vmem:[#allocation2 + $0xa0] sm:$0xff] %vm477_vm2, %v422_v13  ;;  %793 = vrot.lane.b32.xlu0 %v2280_v3, %s2721_s29  ;;  %v1697_v13 = vld [vmem:[%s3800_s1 + $0x70] sm:$0xff] }
  0xdc   : > { %v587_v20 = vpop.permute.xlu1 %586 }
  0xdd   : > { %v585_v24 = vpop.permute.xlu0 %584  ;;  %679 = vst.msk [vmem:[#allocation2 + $0x28] sm:$0xff] %vm672_vm3, %v587_v20  ;;  %v281_v20 = vld [vmem:[%s2829_s24 + $0xf8] sm:$0xf] }
  0xde   : > { %678 = vst.msk [vmem:[#allocation2 + $0x20] sm:$0xff] %vm672_vm3, %v585_v24  ;;  %1020 = vrot.lane.b32.xlu1 %v2328_v15, %s2723_s30  ;;  %v2384_v15 = vpack.c.bf16 %v1698_v14, %v1697_v13  ;;  %v265_v24 = vld [vmem:[%s2829_s24 + $0x78] sm:$0xf]  ;;  %v1392_v14 = vld [vmem:[#allocation2 + $0x82] sm:$0xff] }
  0xdf   : > { %988 = vrot.lane.b32.xlu0 %v2312_v16, %s2723_s30  ;;  %315 = vst.msk [vmem:[#allocation2 + $0xf8] sm:$0xf] %vm286_vm1, %v281_v20  ;;  %299 = vst.msk [vmem:[#allocation2 + $0x78] sm:$0xf] %vm286_vm1, %v265_v24  ;;  %v1141_v20 = vld [vmem:[#allocation2 + $0x3] sm:$0xff] }
  0xe0   : > { %v619_v25 = vpop.permute.xlu1 %618 }
  0xe1   : > { %v617_v26 = vpop.permute.xlu0 %616  ;;  %695 = vst.msk [vmem:[#allocation2 + $0xa8] sm:$0xff] %vm672_vm3, %v619_v25 }
  0xe2   : > { %694 = vst.msk [vmem:[#allocation2 + $0xa0] sm:$0xff] %vm672_vm3, %v617_v26  ;;  %407 = vrot.lane.b32.xlu1 %v2869_v8, %s2719_s25  ;;  %v2363_v8 = vpack.c.bf16 %v1684_v35, %v1683_v34  ;;  %v1701_v34 = vld [vmem:[%s3800_s1 + $0x90] sm:$0xff]  ;;  %v1702_v35 = vld [vmem:[%s3800_s1 + $0x98] sm:$0xff] }
  0xe3   : > { %405 = vrot.lane.b32.xlu0 %v2872_v9, %s2719_s25  ;;  %v2724_v9 = vmov 0.0|0.0  }
  0xe4   : > { %v782_v30 = vpop.permute.xlu1 %781  ;;  %2362 = vmatprep.subr.bf16.mxu0 %v2724_v9  ;;  %2410 = vmatprep.subr.bf16.mxu1 %v2724_v9 }
  0xe5   : > { %v780_v33 = vpop.permute.xlu0 %779  ;;  %874 = vst.msk [vmem:[#allocation2 + $0x28] sm:$0xff] %vm867_vm4, %v782_v30  ;;  %2364 = vmatpush1.bf16.msra.mxu0 %v2363_v8  ;;  %2426 = vmatpush1.bf16.msra.mxu1 %v2363_v8 }
  0xe6   : > { %873 = vst.msk [vmem:[#allocation2 + $0x20] sm:$0xff] %vm867_vm4, %v780_v33  ;;  %439 = vrot.lane.b32.xlu1 %v2935_v21, %s2719_s25  ;;  %2365 = vmatprep.subr.bf16.mxu0 %v2724_v9  ;;  %v1685_v21 = vld [vmem:[%s3800_s1 + $0x10] sm:$0xff] }
  0xe7   : > { %437 = vrot.lane.b32.xlu0 %v2938_v22, %s2719_s25  ;;  %2411 = vmatprep.subr.bf16.mxu1 %v2724_v9  ;;  %v1686_v22 = vld [vmem:[%s3800_s1 + $0x18] sm:$0xff] }
  0xe8   : > { %v814_v36 = vpop.permute.xlu1 %813  ;;  %v2366_v40 = vpack.c.bf16 %v1686_v22, %v1685_v21  ;;  %v1703_v21 = vld [vmem:[%s3800_s1 + $0xa0] sm:$0xff]  ;;  %v1704_v22 = vld [vmem:[%s3800_s1 + $0xa8] sm:$0xff] }
  0xe9   : > { %v812_v37 = vpop.permute.xlu0 %811  ;;  %890 = vst.msk [vmem:[#allocation2 + $0xa8] sm:$0xff] %vm867_vm4, %v814_v36 }
  0xea   : > { %889 = vst.msk [vmem:[#allocation2 + $0xa0] sm:$0xff] %vm867_vm4, %v812_v37  ;;  %602 = vrot.lane.b32.xlu1 %v2836_v2, %s2720_s28  ;;  %2367 = vmatpush1.bf16.msra.mxu0 %v2366_v40  ;;  %v1687_v2 = vld [vmem:[%s3800_s1 + $0x20] sm:$0xff] }
  0xeb   : > { %600 = vrot.lane.b32.xlu0 %v2832_v0, %s2720_s28  ;;  %2427 = vmatpush1.bf16.msra.mxu1 %v2366_v40  ;;  %v1688_v0 = vld [vmem:[%s3800_s1 + $0x28] sm:$0xff]  ;;  %v2236_v40 = vld [vmem:[%s2829_s24 + $0x118] sm:$0xf] }
  0xec   : > { %v977_v41 = vpop.permute.xlu1 %976  ;;  %2368 = vmatprep.subr.bf16.mxu0 %v2724_v9  ;;  %2412 = vmatprep.subr.bf16.mxu1 %v2724_v9  ;;  %v2369_v44 = vpack.c.bf16 %v1688_v0, %v1687_v2 }
  0xed   : > { %v975_v43 = vpop.permute.xlu0 %974  ;;  %1069 = vst.msk [vmem:[#allocation2 + $0x28] sm:$0xff] %vm1062_vm5, %v977_v41  ;;  %v2220_v41 = vld [vmem:[%s2829_s24 + $0x98] sm:$0xf] }
  0xee   : > { %1068 = vst.msk [vmem:[#allocation2 + $0x20] sm:$0xff] %vm1062_vm5, %v975_v43  ;;  %634 = vrot.lane.b32.xlu1 %v3021_v38, %s2720_s28  ;;  %2370 = vmatpush1.bf16.msra.mxu0 %v2369_v44  ;;  %v1689_v38 = vld [vmem:[%s3800_s1 + $0x30] sm:$0xff]  ;;  %v2393_v43 = vpack.c.bf16 %v1704_v22, %v1703_v21 }
  0xef   : > { %632 = vrot.lane.b32.xlu0 %v3024_v39, %s2720_s28  ;;  %2428 = vmatpush1.bf16.msra.mxu1 %v2369_v44  ;;  %v1690_v39 = vld [vmem:[%s3800_s1 + $0x38] sm:$0xff] }
  0xf0   : > { %v1009_v45 = vpop.permute.xlu1 %1008  ;;  %2371 = vmatprep.subr.bf16.mxu0 %v2724_v9  ;;  %2413 = vmatprep.subr.bf16.mxu1 %v2724_v9  ;;  %v2372_v46 = vpack.c.bf16 %v1690_v39, %v1689_v38  ;;  %v1706_v44 = vld [vmem:[%s3800_s1 + $0xb8] sm:$0xff] }
  0xf1   : > { %v1007_v28 = vpop.permute.xlu0 %1006  ;;  %1085 = vst.msk [vmem:[#allocation2 + $0xa8] sm:$0xff] %vm1062_vm5, %v1009_v45  ;;  %v2268_v45 = vld [vmem:[%s2829_s24 + $0x138] sm:$0xf] }
  0xf2   : > { %1084 = vst.msk [vmem:[#allocation2 + $0xa0] sm:$0xff] %vm1062_vm5, %v1007_v28  ;;  %797 = vrot.lane.b32.xlu1 %v2854_v6, %s2721_s29  ;;  %2373 = vmatpush1.bf16.msra.mxu0 %v2372_v46  ;;  %v1691_v6 = vld [vmem:[%s3800_s1 + $0x40] sm:$0xff]  ;;  %v2252_v28 = vld [vmem:[%s2829_s24 + $0xb8] sm:$0xf] }
  0xf3   : > { %795 = vrot.lane.b32.xlu0 %v2857_v7, %s2721_s29  ;;  %2429 = vmatpush1.bf16.msra.mxu1 %v2372_v46  ;;  %v1692_v7 = vld [vmem:[%s3800_s1 + $0x48] sm:$0xff] }
  0xf4   : > { %v426_v48 = vpop.permute.xlu1 %425  ;;  %2374 = vmatprep.subr.bf16.mxu0 %v2724_v9  ;;  %2414 = vmatprep.subr.bf16.mxu1 %v2724_v9  ;;  %v2375_v54 = vpack.c.bf16 %v1692_v7, %v1691_v6 }
  0xf5   : > { %v1227_v47 = vld [vmem:[#allocation2 + $0x24] sm:$0xff]  ;;  %v394_v49 = vpop.permute.xlu0 %393  ;;  %501 = vst.msk [vmem:[#allocation2 + $0xb0] sm:$0xff] %vm477_vm2, %v426_v48 }
  0xf6   : > { %1230 = vst.msk [vmem:[#allocation3 + $0x38] sm:$0xff] %vm1099_vm6, %v1227_v47  ;;  %829 = vrot.lane.b32.xlu1 %v3127_v31, %s2721_s29  ;;  %v1167_v53 = vld [vmem:[#allocation2 + $0x20] sm:$0xff]  ;;  %v1168_v31 = vld [vmem:[#allocation2 + $0x28] sm:$0xff]  ;;  %2376 = vmatpush1.bf16.msra.mxu0 %v2375_v54 }
  0xf7   : > { %485 = vst.msk [vmem:[#allocation2 + $0x30] sm:$0xff] %vm477_vm2, %v394_v49  ;;  %827 = vrot.lane.b32.xlu0 %v3130_v32, %s2721_s29  ;;  %2430 = vmatpush1.bf16.msra.mxu1 %v2375_v54  ;;  %v1707_v47 = vld [vmem:[%s3800_s1 + $0xc0] sm:$0xff]  ;;  %v1708_v48 = vld [vmem:[%s3800_s1 + $0xc8] sm:$0xff]  ;;  %v2300_v49 = vld [vmem:[%s2829_s24 + $0x158] sm:$0xf] }
  0xf8   : > { %1170 = vst.msk [vmem:[#allocation3 + $0x30] sm:$0xff] %vm1099_vm6, %v1167_v53  ;;  %v621_v32 = vpop.permute.xlu1 %620  ;;  %1171 = vst.msk [vmem:[#allocation3 + $0x40] sm:$0xff] %vm1099_vm6, %v1168_v31  ;;  %v1436_v61 = vld [vmem:[#allocation2 + $0xa8] sm:$0xff]  ;;  %2377 = vmatprep.subr.bf16.mxu0 %v2724_v9  ;;  %2415 = vmatprep.subr.bf16.mxu1 %v2724_v9  ;;  %v2399_v52 = vpack.c.bf16 %v1708_v48, %v1707_v47  ;;  %v1709_v31 = vld [vmem:[%s3800_s1 + $0xd0] sm:$0xff] }
  0xf9   : > { %v1495_v55 = vld [vmem:[#allocation2 + $0xa4] sm:$0xff]  ;;  %v589_v56 = vpop.permute.xlu0 %588  ;;  %696 = vst.msk [vmem:[#allocation2 + $0xb0] sm:$0xff] %vm672_vm3, %v621_v32  ;;  %v2316_v32 = vld [vmem:[%s2829_s24 + $0xf8] sm:$0xf] }
  0xfa   : > { %1498 = vst.msk [vmem:[#allocation3 + $0xf8] sm:$0xff] %vm1099_vm6, %v1495_v55  ;;  %992 = vrot.lane.b32.xlu1 %v2919_v17, %s2723_s30  ;;  %v1435_v60 = vld [vmem:[#allocation2 + $0xa0] sm:$0xff]  ;;  %1439 = vst.msk [vmem:[#allocation3 + $0x100] sm:$0xff] %vm1099_vm6, %v1436_v61  ;;  %2379 = vmatpush1.bf16.msra.mxu0 %v2378_v59  ;;  %v2332_v55 = vld [vmem:[%s2829_s24 + $0x178] sm:$0xf] }
  0xfb   : > { %680 = vst.msk [vmem:[#allocation2 + $0x30] sm:$0xff] %vm672_vm3, %v589_v56  ;;  %990 = vrot.lane.b32.xlu0 %v2922_v18, %s2723_s30  ;;  %2431 = vmatpush1.bf16.msra.mxu1 %v2378_v59  ;;  %v1695_v17 = vld [vmem:[%s3800_s1 + $0x60] sm:$0xff]  ;;  %v1696_v18 = vld [vmem:[%s3800_s1 + $0x68] sm:$0xff]  ;;  %v1710_v56 = vld [vmem:[%s3800_s1 + $0xd8] sm:$0xff] }
  0xfc   : > { %1438 = vst.msk [vmem:[#allocation3 + $0xf0] sm:$0xff] %vm1099_vm6, %v1435_v60  ;;  %v816_v1 = vpop.permute.xlu1 %815  ;;  %v2381_v4 = vpack.c.bf16 %v1696_v18, %v1695_v17  ;;  %2380 = vmatprep.subr.bf16.mxu0 %v2724_v9  ;;  %2416 = vmatprep.subr.bf16.mxu1 %v2724_v9  ;;  %v2402_v59 = vpack.c.bf16 %v1710_v56, %v1709_v31  ;;  %v1711_v60 = vld [vmem:[%s3800_s1 + $0xe0] sm:$0xff]  ;;  %v1712_v61 = vld [vmem:[%s3800_s1 + $0xe8] sm:$0xff]  ;;  %v1713_v18 = vld [vmem:[%s3800_s1 + $0xf0] sm:$0xff] }
  0xfd   : > { %v784_v3 = vpop.permute.xlu0 %783  ;;  %891 = vst.msk [vmem:[#allocation2 + $0xb0] sm:$0xff] %vm867_vm4, %v816_v1  ;;  %v1374_v17 = vld [vmem:[#allocation2 + $0x81] sm:$0xff] }
  0xfe   : > { %875 = vst.msk [vmem:[#allocation2 + $0x30] sm:$0xff] %vm867_vm4, %v784_v3  ;;  %1024 = vrot.lane.b32.xlu1 %v2330_v62, %s2723_s30  ;;  %2382 = vmatpush1.bf16.msra.mxu0 %v2381_v4  ;;  %v2405_v62 = vpack.c.bf16 %v1712_v61, %v1711_v60  ;;  %v1103_v3 = vld [vmem:[#allocation2 + $0x1] sm:$0xff] }
  0xff   : > { %1022 = vrot.lane.b32.xlu0 %v2329_v63, %s2723_s30  ;;  %2432 = vmatpush1.bf16.msra.mxu1 %v2381_v4  ;;  %v1714_v4 = vld [vmem:[%s3800_s1 + $0xf8] sm:$0xff]  ;;  %v1191_v31 = vld [vmem:[#allocation2 + $0x22] sm:$0xff] }
 0x100   : > { %v1011_v5 = vpop.permute.xlu1 %1010  ;;  %2383 = vmatprep.subr.bf16.mxu0 %v2724_v9  ;;  %2417 = vmatprep.subr.bf16.mxu1 %v2724_v9 }
 0x101   : > { %v979_v11 = vpop.permute.xlu0 %978  ;;  %1086 = vst.msk [vmem:[#allocation2 + $0xb0] sm:$0xff] %vm1062_vm5, %v1011_v5  ;;  %v2408_v5 = vpack.c.bf16 %v1714_v4, %v1713_v18 }
 0x102   : > { %1070 = vst.msk [vmem:[#allocation2 + $0x30] sm:$0xff] %vm1062_vm5, %v979_v11  ;;  %441 = vrot.lane.b32.xlu1 %v2970_v29, %s2719_s25  ;;  %2385 = vmatpush1.bf16.msra.mxu0 %v2384_v15  ;;  %v1699_v29 = vld [vmem:[%s3800_s1 + $0x80] sm:$0xff] }
 0x103   : > { %409 = vrot.lane.b32.xlu0 %v2892_v12, %s2719_s25  ;;  %2433 = vmatpush1.bf16.msra.mxu1 %v2384_v15  ;;  %v1700_v12 = vld [vmem:[%s3800_s1 + $0x88] sm:$0xff] }
 0x104   : > { %v428_v16 = vpop.permute.xlu1 %427  ;;  %2386 = vmatprep.subr.bf16.mxu0 %v2724_v9  ;;  %2418 = vmatprep.subr.bf16.mxu1 %v2724_v9  ;;  %v2387_v25 = vpack.c.bf16 %v1700_v12, %v1699_v29  ;;  %v1122_v15 = vld [vmem:[#allocation2 + $0x2] sm:$0xff] }
 0x105   : > { %v396_v19 = vpop.permute.xlu0 %395  ;;  %502 = vst.msk [vmem:[#allocation2 + $0xb8] sm:$0xf] %vm481_vm7, %v428_v16  ;;  %v1375_v12 = vld [vmem:[#allocation2 + $0x89] sm:$0xff] }
 0x106   : > { %486 = vst.msk [vmem:[#allocation2 + $0x38] sm:$0xf] %vm481_vm7, %v396_v19  ;;  %636 = vrot.lane.b32.xlu1 %v3046_v42, %s2720_s28  ;;  %2388 = vmatpush1.bf16.msra.mxu0 %v2387_v25 }
 0x107   : > { %604 = vrot.lane.b32.xlu0 %v2882_v10, %s2720_s28  ;;  %2434 = vmatpush1.bf16.msra.mxu1 %v2387_v25  ;;  %v2331_v10 = vld [vmem:[%s2829_s24 + $0x170] sm:$0xff]  ;;  %s2107_s24 = smul.u32 3, %s2705_s16 }
 0x108   : > { %v1496_v26 = vld [vmem:[#allocation2 + $0xac] sm:$0xff]  ;;  %v623_v42 = vpop.permute.xlu1 %622  ;;  %2389 = vmatprep.subr.bf16.mxu0 %v2724_v9  ;;  %2419 = vmatprep.subr.bf16.mxu1 %v2724_v9 }
 0x109   : > { %v1228_v30 = vld [vmem:[#allocation2 + $0x2c] sm:$0xff]  ;;  %v591_v33 = vpop.permute.xlu0 %590  ;;  %1499 = vst.msk [vmem:[#allocation3 + $0x108] sm:$0xff] %vm1099_vm6, %v1496_v26  ;;  %s2108_s6 = sadd.s32 %s2701_s15, %s2107_s24  ;;  %s3747_s15 = scalar_lea.sflag [#allocation5], %s187_s23 }
 0x10a   : > { %1231 = vst.msk [vmem:[#allocation3 + $0x48] sm:$0xff] %vm1099_vm6, %v1228_v30  ;;  %831 = vrot.lane.b32.xlu1 %v3163_v50, %s2721_s29  ;;  %v1437_v8 = vld [vmem:[#allocation2 + $0xb0] sm:$0xff]  ;;  %s2361_s7 = smul.u32 3072, %s2108_s6 }
 0x10b   : > { %697 = vst.msk [vmem:[#allocation2 + $0xb8] sm:$0xf] %vm676_vm8, %v623_v42  ;;  %681 = vst.msk [vmem:[#allocation2 + $0x38] sm:$0xf] %vm676_vm8, %v591_v33  ;;  %799 = vrot.lane.b32.xlu0 %v2949_v23, %s2721_s29  ;;  %v1169_v50 = vld [vmem:[#allocation2 + $0x30] sm:$0xff]  ;;  %v2390_v23 = vpack.c.bf16 %v1702_v35, %v1701_v34 }
 0x10c   : > { %v818_v36 = vpop.permute.xlu1 %817  ;;  %1440 = vst.msk [vmem:[#allocation3 + $0x110] sm:$0xff] %vm1099_vm6, %v1437_v8  ;;  %1172 = vst.msk [vmem:[#allocation3 + $0x50] sm:$0xff] %vm1099_vm6, %v1169_v50  ;;  %v1104_v25 = vld [vmem:[#allocation2 + $0x9] sm:$0xff] }
 0x10d   : > { %v786_v37 = vpop.permute.xlu0 %785  ;;  %892 = vst.msk [vmem:[#allocation2 + $0xb8] sm:$0xf] %vm871_vm9, %v818_v36  ;;  %2391 = vmatpush1.bf16.msra.mxu0 %v2390_v23  ;;  %2435 = vmatpush1.bf16.msra.mxu1 %v2390_v23  ;;  %v1393_v42 = vld [vmem:[#allocation2 + $0x8a] sm:$0xff] }
 0x10e   : > { %876 = vst.msk [vmem:[#allocation2 + $0x38] sm:$0xf] %vm871_vm9, %v786_v37  ;;  %1026 = vrot.lane.b32.xlu1 %v2331_v10, %s2723_s30  ;;  %2392 = vmatprep.subr.bf16.mxu0 %v2724_v9  ;;  %v1123_v33 = vld [vmem:[#allocation2 + $0xa] sm:$0xff] }
 0x10f   : > { %994 = vrot.lane.b32.xlu0 %v2960_v27, %s2723_s30  ;;  %2420 = vmatprep.subr.bf16.mxu1 %v2724_v9  ;;  %v1705_v27 = vld [vmem:[%s3800_s1 + $0xb0] sm:$0xff] }
 0x110   : > { %v1013_v2 = vpop.permute.xlu1 %1012  ;;  %v2396_v38 = vpack.c.bf16 %v1706_v44, %v1705_v27  ;;  %v1411_v8 = vld [vmem:[#allocation2 + $0x8b] sm:$0xff] }
 0x111   : > { %v981_v0 = vpop.permute.xlu0 %980  ;;  %1087 = vst.msk [vmem:[#allocation2 + $0xb8] sm:$0xf] %vm1066_vm10, %v1013_v2  ;;  %2394 = vmatpush1.bf16.msra.mxu0 %v2393_v43  ;;  %2436 = vmatpush1.bf16.msra.mxu1 %v2393_v43  ;;  %v1142_v50 = vld [vmem:[#allocation2 + $0xb] sm:$0xff] }
 0x112   : > { %1071 = vst.msk [vmem:[#allocation2 + $0x38] sm:$0xf] %vm1066_vm10, %v981_v0  ;;  %443 = vrot.lane.b32.xlu1 %v2236_v40, %s2719_s25  ;;  %2395 = vmatprep.subr.bf16.mxu0 %v2724_v9  ;;  %v1376_v40 = vld [vmem:[#allocation2 + $0x91] sm:$0xff] }
 0x113   : > { %411 = vrot.lane.b32.xlu0 %v2220_v41, %s2719_s25  ;;  %2421 = vmatprep.subr.bf16.mxu1 %v2724_v9  ;;  %s2725_s25 = smov 32   ;;  %v1105_v41 = vld [vmem:[#allocation2 + $0x11] sm:$0xff] }
 0x114   : > { %v400_v39 = vpop.permute.xlu1 %399  ;;  %v1394_v44 = vld [vmem:[#allocation2 + $0x92] sm:$0xff]  ;;  %v1192_v18 = vld [vmem:[#allocation2 + $0x2a] sm:$0xff] }
 0x115   : > { %v398_v46 = vpop.permute.xlu0 %397  ;;  %488 = vst.msk [vmem:[#allocation2 + $0x48] sm:$0xff] %vm477_vm2, %v400_v39  ;;  %2397 = vmatpush1.bf16.msra.mxu0 %v2396_v38  ;;  %2437 = vmatpush1.bf16.msra.mxu1 %v2396_v38  ;;  %v1412_v39 = vld [vmem:[#allocation2 + $0x93] sm:$0xff] }
 0x116   : > { %487 = vst.msk [vmem:[#allocation2 + $0x40] sm:$0xff] %vm477_vm2, %v398_v46  ;;  %638 = vrot.lane.b32.xlu1 %v2268_v45, %s2720_s28  ;;  %2398 = vmatprep.subr.bf16.mxu0 %v2724_v9  ;;  %v1124_v45 = vld [vmem:[#allocation2 + $0x12] sm:$0xff] }
 0x117   : > { %606 = vrot.lane.b32.xlu0 %v2252_v28, %s2720_s28  ;;  %2422 = vmatprep.subr.bf16.mxu1 %v2724_v9  ;;  %s2727_s28 = smov 96   ;;  %v1143_v46 = vld [vmem:[#allocation2 + $0x13] sm:$0xff] }
 0x118   : > { %v1497_v6 = vld [vmem:[#allocation2 + $0xb4] sm:$0xff]  ;;  %v432_v53 = vpop.permute.xlu1 %431 }
 0x119   : > { %v1229_v7 = vld [vmem:[#allocation2 + $0x34] sm:$0xff]  ;;  %v430_v54 = vpop.permute.xlu0 %429  ;;  %1500 = vst.msk [vmem:[#allocation3 + $0x118] sm:$0xff] %vm1099_vm6, %v1497_v6  ;;  %2400 = vmatpush1.bf16.msra.mxu0 %v2399_v52  ;;  %2438 = vmatpush1.bf16.msra.mxu1 %v2399_v52 }
 0x11a   : > { %1232 = vst.msk [vmem:[#allocation3 + $0x58] sm:$0xff] %vm1099_vm6, %v1229_v7  ;;  %833 = vrot.lane.b32.xlu1 %v2300_v49, %s2721_s29  ;;  %2401 = vmatprep.subr.bf16.mxu0 %v2724_v9  ;;  %v1441_v49 = vld [vmem:[#allocation2 + $0xa1] sm:$0xff] }
 0x11b   : > { %504 = vst.msk [vmem:[#allocation2 + $0xc8] sm:$0xff] %vm477_vm2, %v432_v53  ;;  %503 = vst.msk [vmem:[#allocation2 + $0xc0] sm:$0xff] %vm477_vm2, %v430_v54  ;;  %801 = vrot.lane.b32.xlu0 %v2284_v51, %s2721_s29  ;;  %2423 = vmatprep.subr.bf16.mxu1 %v2724_v9  ;;  %v1173_v51 = vld [vmem:[#allocation2 + $0x21] sm:$0xff]  ;;  %s2442_s29 = smul.u32 192, %s187_s23 }
 0x11c   : > { %v595_v57 = vpop.permute.xlu1 %594  ;;  %v1459_v54 = vld [vmem:[#allocation2 + $0xa2] sm:$0xff] }
 0x11d   : > { %v593_v58 = vpop.permute.xlu0 %592  ;;  %683 = vst.msk [vmem:[#allocation2 + $0x48] sm:$0xff] %vm672_vm3, %v595_v57  ;;  %2403 = vmatpush1.bf16.msra.mxu0 %v2402_v59  ;;  %2439 = vmatpush1.bf16.msra.mxu1 %v2402_v59  ;;  %v1209_v59 = vld [vmem:[#allocation2 + $0x23] sm:$0xff]  ;;  %s3691_s4 = scalar_lea.vmem [#allocation4], %s2442_s29 }
 0x11e   : > { %682 = vst.msk [vmem:[#allocation2 + $0x40] sm:$0xff] %vm672_vm3, %v593_v58  ;;  %1028 = vrot.lane.b32.xlu1 %v2332_v55, %s2723_s30  ;;  %2404 = vmatprep.subr.bf16.mxu0 %v2724_v9  ;;  %v1477_v58 = vld [vmem:[#allocation2 + $0xa3] sm:$0xff]  ;;  %s2115_s8 = sshll.u32 %s3691_s4, 4  ;;  %s3742_s8 = int_to_ptr.vmem [resolvable:$true] %s2115_s8 }
 0x11f   : > { %996 = vrot.lane.b32.xlu0 %v2316_v32, %s2723_s30  ;;  %2424 = vmatprep.subr.bf16.mxu1 %v2724_v9  ;;  %s2623_s16 = scalar_lea.vmem %s3742_s8, 3072 }
 0x120   : > { %v627_v63 = vpop.permute.xlu1 %626  ;;  %p2624_p0 = scmp.ne.s32.totalorder %s3742_s8, %s2623_s16 }
 0x121   : > { %v625_v1 = vpop.permute.xlu0 %624  ;;  %699 = vst.msk [vmem:[#allocation2 + $0xc8] sm:$0xff] %vm672_vm3, %v627_v63  ;;  %2406 = vmatpush1.bf16.msra.mxu0 %v2405_v62  ;;  %2440 = vmatpush1.bf16.msra.mxu1 %v2405_v62  ;;  %v1442_v62 = vld [vmem:[#allocation2 + $0xa9] sm:$0xff] }
 0x122   : > { %698 = vst.msk [vmem:[#allocation2 + $0xc0] sm:$0xff] %vm672_vm3, %v625_v1  ;;  %1380 = vrot.lane.b32.xlu1 %v1374_v17, %s2725_s25  ;;  %2407 = vmatprep.subr.bf16.mxu0 %v2724_v9  ;;  %v1174_v63 = vld [vmem:[#allocation2 + $0x29] sm:$0xff]  ;;  %p2625_p1 = pnand %p2624_p0, %p2804_p5 }
 0x123   : > { %1109 = vrot.lane.b32.xlu0 %v1103_v3, %s2725_s25  ;;  %2425 = vmatprep.subr.bf16.mxu1 %v2724_v9  ;;  %v1410_v9 = vld [vmem:[#allocation2 + $0x83] sm:$0xff] }
 0x124   : > { %v790_v11 = vpop.permute.xlu1 %789  ;;  %v1460_v17 = vld [vmem:[#allocation2 + $0xaa] sm:$0xff]  ;;  %p2626_p2 = pneg %p2625_p1 }
 0x125   : > { %v788_v13 = vpop.permute.xlu0 %787  ;;  %878 = vst.msk [vmem:[#allocation2 + $0x48] sm:$0xff] %vm867_vm4, %v790_v11  ;;  %2409 = vmatpush1.bf16.msra.mxu0 %v2408_v5  ;;  %2441 = vmatpush1.bf16.msra.mxu1 %v2408_v5 }
 0x126   : > { %877 = vst.msk [vmem:[#allocation2 + $0x40] sm:$0xff] %vm867_vm4, %v788_v13  ;;  %1398 = vrot.lane.b32.xlu1 %v1392_v14, %s2726_s10  ;;  %v1478_v14 = vld [vmem:[#allocation2 + $0xab] sm:$0xff] }
 0x127   : > { %1128 = vrot.lane.b32.xlu0 %v1122_v15, %s2726_s10  ;;  %v1210_v15 = vld [vmem:[#allocation2 + $0x2b] sm:$0xff] }
 0x128   : > { %v822_v16 = vpop.permute.xlu1 %821 }
 0x129   : > { %v820_v19 = vpop.permute.xlu0 %819  ;;  %894 = vst.msk [vmem:[#allocation2 + $0xc8] sm:$0xff] %vm867_vm4, %v822_v16 }
 0x12a   : > { %893 = vst.msk [vmem:[#allocation2 + $0xc0] sm:$0xff] %vm867_vm4, %v820_v19  ;;  %1416 = vrot.lane.b32.xlu1 %v1410_v9, %s2727_s28  ;;  %v1443_v9 = vld [vmem:[#allocation2 + $0xb1] sm:$0xff] }
 0x12b   : > { %1147 = vrot.lane.b32.xlu0 %v1141_v20, %s2727_s28  ;;  %v1175_v20 = vld [vmem:[#allocation2 + $0x31] sm:$0xff] }
 0x12c   : > { %v985_v24 = vpop.permute.xlu1 %984 }
 0x12d   : > { %v983_v29 = vpop.permute.xlu0 %982  ;;  %1073 = vst.msk [vmem:[#allocation2 + $0x48] sm:$0xff] %vm1062_vm5, %v985_v24 }
 0x12e   : > { %1072 = vst.msk [vmem:[#allocation2 + $0x40] sm:$0xff] %vm1062_vm5, %v983_v29  ;;  %1382 = vrot.lane.b32.xlu1 %v1375_v12, %s2725_s25  ;;  %v1461_v12 = vld [vmem:[#allocation2 + $0xb2] sm:$0xff] }
 0x12f   : > { %1111 = vrot.lane.b32.xlu0 %v1104_v25, %s2725_s25  ;;  %v1193_v25 = vld [vmem:[#allocation2 + $0x32] sm:$0xff] }
 0x130   : > { %v1017_v26 = vpop.permute.xlu1 %1016 }
 0x131   : > { %v1015_v30 = vpop.permute.xlu0 %1014  ;;  %1089 = vst.msk [vmem:[#allocation2 + $0xc8] sm:$0xff] %vm1062_vm5, %v1017_v26 }
 0x132   : > { %1088 = vst.msk [vmem:[#allocation2 + $0xc0] sm:$0xff] %vm1062_vm5, %v1015_v30  ;;  %1400 = vrot.lane.b32.xlu1 %v1393_v42, %s2726_s10  ;;  %v1479_v42 = vld [vmem:[#allocation2 + $0xb3] sm:$0xff] }
 0x133   : > { %1130 = vrot.lane.b32.xlu0 %v1123_v33, %s2726_s10  ;;  %v1211_v33 = vld [vmem:[#allocation2 + $0x33] sm:$0xff] }
 0x134   : > { %v434_v34 = vpop.permute.xlu1 %433  ;;  %v1235_v37 = vld [vmem:[#allocation2 + $0x48] sm:$0xff] }
 0x135   : > { %v1294_v10 = vld [vmem:[#allocation2 + $0x44] sm:$0xff]  ;;  %v402_v35 = vpop.permute.xlu0 %401  ;;  %505 = vst.msk [vmem:[#allocation2 + $0xd0] sm:$0xff] %vm477_vm2, %v434_v34 }
 0x136   : > { %1297 = vst.msk [vmem:[#allocation3 + $0x68] sm:$0xff] %vm1099_vm6, %v1294_v10  ;;  %v1234_v36 = vld [vmem:[#allocation2 + $0x40] sm:$0xff]  ;;  %1418 = vrot.lane.b32.xlu1 %v1411_v8, %s2727_s28  ;;  %1238 = vst.msk [vmem:[#allocation3 + $0x70] sm:$0xff] %vm1099_vm6, %v1235_v37 }
 0x137   : > { %489 = vst.msk [vmem:[#allocation2 + $0x50] sm:$0xff] %vm477_vm2, %v402_v35  ;;  %1149 = vrot.lane.b32.xlu0 %v1142_v50, %s2727_s28  ;;  %v1240_v8 = vld [vmem:[#allocation2 + $0x41] sm:$0xff] }
 0x138   : > { %1237 = vst.msk [vmem:[#allocation3 + $0x60] sm:$0xff] %vm1099_vm6, %v1234_v36  ;;  %v629_v21 = vpop.permute.xlu1 %628  ;;  %v1503_v2 = vld [vmem:[#allocation2 + $0xc8] sm:$0xff] }
 0x139   : > { %v1562_v23 = vld [vmem:[#allocation2 + $0xc4] sm:$0xff]  ;;  %v597_v22 = vpop.permute.xlu0 %596  ;;  %700 = vst.msk [vmem:[#allocation2 + $0xd0] sm:$0xff] %vm672_vm3, %v629_v21 }
 0x13a   : > { %1565 = vst.msk [vmem:[#allocation3 + $0x128] sm:$0xff] %vm1099_vm6, %v1562_v23  ;;  %v1502_v43 = vld [vmem:[#allocation2 + $0xc0] sm:$0xff]  ;;  %1384 = vrot.lane.b32.xlu1 %v1376_v40, %s2725_s25  ;;  %1506 = vst.msk [vmem:[#allocation3 + $0x130] sm:$0xff] %vm1099_vm6, %v1503_v2 }
 0x13b   : > { %684 = vst.msk [vmem:[#allocation2 + $0x50] sm:$0xff] %vm672_vm3, %v597_v22  ;;  %1113 = vrot.lane.b32.xlu0 %v1105_v41, %s2725_s25  ;;  %v1508_v35 = vld [vmem:[#allocation2 + $0xc1] sm:$0xff] }
 0x13c   : > { %1505 = vst.msk [vmem:[#allocation3 + $0x120] sm:$0xff] %vm1099_vm6, %v1502_v43  ;;  %v824_v0 = vpop.permute.xlu1 %823  ;;  %v1526_v37 = vld [vmem:[#allocation2 + $0xc2] sm:$0xff] }
 0x13d   : > { %v792_v27 = vpop.permute.xlu0 %791  ;;  %895 = vst.msk [vmem:[#allocation2 + $0xd0] sm:$0xff] %vm867_vm4, %v824_v0  ;;  %v1258_v23 = vld [vmem:[#allocation2 + $0x42] sm:$0xff] }
 0x13e   : > { %879 = vst.msk [vmem:[#allocation2 + $0x50] sm:$0xff] %vm867_vm4, %v792_v27  ;;  %1402 = vrot.lane.b32.xlu1 %v1394_v44, %s2726_s10  ;;  %v1544_v40 = vld [vmem:[#allocation2 + $0xc3] sm:$0xff] }
 0x13f   : > { %1132 = vrot.lane.b32.xlu0 %v1124_v45, %s2726_s10  ;;  %v1276_v41 = vld [vmem:[#allocation2 + $0x43] sm:$0xff] }
 0x140   : > { %v1019_v28 = vpop.permute.xlu1 %1018 }
 0x141   : > { %v987_v38 = vpop.permute.xlu0 %986  ;;  %1090 = vst.msk [vmem:[#allocation2 + $0xd0] sm:$0xff] %vm1062_vm5, %v1019_v28 }
 0x142   : > { %1074 = vst.msk [vmem:[#allocation2 + $0x50] sm:$0xff] %vm1062_vm5, %v987_v38  ;;  %1420 = vrot.lane.b32.xlu1 %v1412_v39, %s2727_s28 }
 0x143   : > { %1151 = vrot.lane.b32.xlu0 %v1143_v46, %s2727_s28 }
 0x144   : > { %v436_v47 = vpop.permute.xlu1 %435 }
 0x145   : > { %v404_v48 = vpop.permute.xlu0 %403  ;;  %506 = vst.msk [vmem:[#allocation2 + $0xd8] sm:$0xf] %vm481_vm7, %v436_v47 }
 0x146   : > { %490 = vst.msk [vmem:[#allocation2 + $0x58] sm:$0xf] %vm481_vm7, %v404_v48  ;;  %1447 = vrot.lane.b32.xlu1 %v1441_v49, %s2725_s25 }
 0x147   : > { %1179 = vrot.lane.b32.xlu0 %v1173_v51, %s2725_s25 }
 0x148   : > { %v1563_v52 = vld [vmem:[#allocation2 + $0xcc] sm:$0xff]  ;;  %v631_v7 = vpop.permute.xlu1 %630 }
 0x149   : > { %v1295_v6 = vld [vmem:[#allocation2 + $0x4c] sm:$0xff]  ;;  %v599_v53 = vpop.permute.xlu0 %598  ;;  %1566 = vst.msk [vmem:[#allocation3 + $0x138] sm:$0xff] %vm1099_vm6, %v1563_v52 }
 0x14a   : > { %1298 = vst.msk [vmem:[#allocation3 + $0x78] sm:$0xff] %vm1099_vm6, %v1295_v6  ;;  %1465 = vrot.lane.b32.xlu1 %v1459_v54, %s2726_s10  ;;  %v1504_v55 = vld [vmem:[#allocation2 + $0xd0] sm:$0xff] }
 0x14b   : > { %701 = vst.msk [vmem:[#allocation2 + $0xd8] sm:$0xf] %vm676_vm8, %v631_v7  ;;  %685 = vst.msk [vmem:[#allocation2 + $0x58] sm:$0xf] %vm676_vm8, %v599_v53  ;;  %1197 = vrot.lane.b32.xlu0 %v1191_v31, %s2726_s10  ;;  %v1236_v32 = vld [vmem:[#allocation2 + $0x50] sm:$0xff] }
 0x14c   : > { %1507 = vst.msk [vmem:[#allocation3 + $0x140] sm:$0xff] %vm1099_vm6, %v1504_v55  ;;  %v826_v56 = vpop.permute.xlu1 %825  ;;  %1239 = vst.msk [vmem:[#allocation3 + $0x80] sm:$0xff] %vm1099_vm6, %v1236_v32  ;;  %v1509_v27 = vld [vmem:[#allocation2 + $0xc9] sm:$0xff] }
 0x14d   : > { %v794_v57 = vpop.permute.xlu0 %793  ;;  %896 = vst.msk [vmem:[#allocation2 + $0xd8] sm:$0xf] %vm871_vm9, %v826_v56  ;;  %v1241_v44 = vld [vmem:[#allocation2 + $0x49] sm:$0xff] }
 0x14e   : > { %880 = vst.msk [vmem:[#allocation2 + $0x58] sm:$0xf] %vm871_vm9, %v794_v57  ;;  %1483 = vrot.lane.b32.xlu1 %v1477_v58, %s2727_s28  ;;  %v1527_v47 = vld [vmem:[#allocation2 + $0xca] sm:$0xff] }
 0x14f   : > { %1215 = vrot.lane.b32.xlu0 %v1209_v59, %s2727_s28  ;;  %v1259_v48 = vld [vmem:[#allocation2 + $0x4a] sm:$0xff] }
 0x150   : > { %v1021_v60 = vpop.permute.xlu1 %1020  ;;  %v1545_v7 = vld [vmem:[#allocation2 + $0xcb] sm:$0xff] }
 0x151   : > { %v989_v61 = vpop.permute.xlu0 %988  ;;  %1091 = vst.msk [vmem:[#allocation2 + $0xd8] sm:$0xf] %vm1066_vm10, %v1021_v60  ;;  %v1277_v53 = vld [vmem:[#allocation2 + $0x4b] sm:$0xff] }
 0x152   : > { %1075 = vst.msk [vmem:[#allocation2 + $0x58] sm:$0xf] %vm1066_vm10, %v989_v61  ;;  %1449 = vrot.lane.b32.xlu1 %v1442_v62, %s2725_s25 }
 0x153   : > { %1181 = vrot.lane.b32.xlu0 %v1174_v63, %s2725_s25 }
 0x154   : > { %v408_v1 = vpop.permute.xlu1 %407 }
 0x155   : > { %v406_v3 = vpop.permute.xlu0 %405  ;;  %492 = vst.msk [vmem:[#allocation2 + $0x68] sm:$0xff] %vm477_vm2, %v408_v1 }
 0x156   : > { %491 = vst.msk [vmem:[#allocation2 + $0x60] sm:$0xff] %vm477_vm2, %v406_v3  ;;  %1467 = vrot.lane.b32.xlu1 %v1460_v17, %s2726_s10 }
 0x157   : > { %1199 = vrot.lane.b32.xlu0 %v1192_v18, %s2726_s10 }
 0x158   : > { %v1564_v4 = vld [vmem:[#allocation2 + $0xd4] sm:$0xff]  ;;  %v440_v11 = vpop.permute.xlu1 %439 }
 0x159   : > { %v1296_v5 = vld [vmem:[#allocation2 + $0x54] sm:$0xff]  ;;  %v438_v13 = vpop.permute.xlu0 %437  ;;  %1567 = vst.msk [vmem:[#allocation3 + $0x148] sm:$0xff] %vm1099_vm6, %v1564_v4 }
 0x15a   : > { %1299 = vst.msk [vmem:[#allocation3 + $0x88] sm:$0xff] %vm1099_vm6, %v1296_v5  ;;  %1485 = vrot.lane.b32.xlu1 %v1478_v14, %s2727_s28  ;;  %v1510_v55 = vld [vmem:[#allocation2 + $0xd1] sm:$0xff] }
 0x15b   : > { %508 = vst.msk [vmem:[#allocation2 + $0xe8] sm:$0xff] %vm477_vm2, %v440_v11  ;;  %507 = vst.msk [vmem:[#allocation2 + $0xe0] sm:$0xff] %vm477_vm2, %v438_v13  ;;  %1217 = vrot.lane.b32.xlu0 %v1210_v15, %s2727_s28  ;;  %v1242_v32 = vld [vmem:[#allocation2 + $0x51] sm:$0xff] }
 0x15c   : > { %v603_v16 = vpop.permute.xlu1 %602  ;;  %v1528_v58 = vld [vmem:[#allocation2 + $0xd2] sm:$0xff] }
 0x15d   : > { %v601_v19 = vpop.permute.xlu0 %600  ;;  %687 = vst.msk [vmem:[#allocation2 + $0x68] sm:$0xff] %vm672_vm3, %v603_v16  ;;  %v1260_v59 = vld [vmem:[#allocation2 + $0x52] sm:$0xff] }
 0x15e   : > { %686 = vst.msk [vmem:[#allocation2 + $0x60] sm:$0xff] %vm672_vm3, %v601_v19  ;;  %1451 = vrot.lane.b32.xlu1 %v1443_v9, %s2725_s25  ;;  %v1546_v1 = vld [vmem:[#allocation2 + $0xd3] sm:$0xff] }
 0x15f   : > { %1183 = vrot.lane.b32.xlu0 %v1175_v20, %s2725_s25  ;;  %v1278_v3 = vld [vmem:[#allocation2 + $0x53] sm:$0xff] }
 0x160   : > { %v635_v24 = vpop.permute.xlu1 %634 }
 0x161   : > { %v633_v29 = vpop.permute.xlu0 %632  ;;  %703 = vst.msk [vmem:[#allocation2 + $0xe8] sm:$0xff] %vm672_vm3, %v635_v24 }
 0x162   : > { %702 = vst.msk [vmem:[#allocation2 + $0xe0] sm:$0xff] %vm672_vm3, %v633_v29  ;;  %1469 = vrot.lane.b32.xlu1 %v1461_v12, %s2726_s10 }
 0x163   : > { %1201 = vrot.lane.b32.xlu0 %v1193_v25, %s2726_s10 }
 0x164   : > { %v798_v26 = vpop.permute.xlu1 %797 }
 0x165   : > { %v796_v30 = vpop.permute.xlu0 %795  ;;  %882 = vst.msk [vmem:[#allocation2 + $0x68] sm:$0xff] %vm867_vm4, %v798_v26 }
 0x166   : > { %881 = vst.msk [vmem:[#allocation2 + $0x60] sm:$0xff] %vm867_vm4, %v796_v30  ;;  %1487 = vrot.lane.b32.xlu1 %v1479_v42, %s2727_s28 }
 0x167   : > { %1219 = vrot.lane.b32.xlu0 %v1211_v33, %s2727_s28 }
 0x168   : > { %v830_v10 = vpop.permute.xlu1 %829 }
 0x169   : > { %v828_v34 = vpop.permute.xlu0 %827  ;;  %898 = vst.msk [vmem:[#allocation2 + $0xe8] sm:$0xff] %vm867_vm4, %v830_v10 }
 0x16a   : > { %897 = vst.msk [vmem:[#allocation2 + $0xe0] sm:$0xff] %vm867_vm4, %v828_v34  ;;  %1514 = vrot.lane.b32.xlu1 %v1508_v35, %s2725_s25 }
 0x16b   : > { %1246 = vrot.lane.b32.xlu0 %v1240_v8, %s2725_s25 }
 0x16c   : > { %v993_v50 = vpop.permute.xlu1 %992 }
 0x16d   : > { %v991_v36 = vpop.permute.xlu0 %990  ;;  %1077 = vst.msk [vmem:[#allocation2 + $0x68] sm:$0xff] %vm1062_vm5, %v993_v50 }
 0x16e   : > { %1076 = vst.msk [vmem:[#allocation2 + $0x60] sm:$0xff] %vm1062_vm5, %v991_v36  ;;  %1532 = vrot.lane.b32.xlu1 %v1526_v37, %s2726_s10 }
 0x16f   : > { %1264 = vrot.lane.b32.xlu0 %v1258_v23, %s2726_s10 }
 0x170   : > { %v1025_v21 = vpop.permute.xlu1 %1024 }
 0x171   : > { %v1023_v22 = vpop.permute.xlu0 %1022  ;;  %1093 = vst.msk [vmem:[#allocation2 + $0xe8] sm:$0xff] %vm1062_vm5, %v1025_v21 }
 0x172   : > { %1092 = vst.msk [vmem:[#allocation2 + $0xe0] sm:$0xff] %vm1062_vm5, %v1023_v22  ;;  %1550 = vrot.lane.b32.xlu1 %v1544_v40, %s2727_s28 }
 0x173   : > { %1282 = vrot.lane.b32.xlu0 %v1276_v41, %s2727_s28 }
 0x174   : > { %v442_v2 = vpop.permute.xlu1 %441  ;;  %v1302_v28 = vld [vmem:[#allocation2 + $0x68] sm:$0xff] }
 0x175   : > { %v1361_v43 = vld [vmem:[#allocation2 + $0x64] sm:$0xff]  ;;  %v410_v0 = vpop.permute.xlu0 %409  ;;  %509 = vst.msk [vmem:[#allocation2 + $0xf0] sm:$0xff] %vm477_vm2, %v442_v2  ;;  %v1662_v2 = vld [vmem:[#allocation3 + $0xd8] sm:$0xff] }
 0x176   : > { %1364 = vst.msk [vmem:[#allocation3 + $0x98] sm:$0xff] %vm1099_vm6, %v1361_v43  ;;  %v1301_v45 = vld [vmem:[#allocation2 + $0x60] sm:$0xff]  ;;  %1516 = vrot.lane.b32.xlu1 %v1509_v27, %s2725_s25  ;;  %1305 = vst.msk [vmem:[#allocation3 + $0xa0] sm:$0xff] %vm1099_vm6, %v1302_v28  ;;  %v1638_v27 = vld [vmem:[#allocation3 + $0x18] sm:$0xff] }
 0x177   : > { %493 = vst.msk [vmem:[#allocation2 + $0x70] sm:$0xff] %vm477_vm2, %v410_v0  ;;  %1248 = vrot.lane.b32.xlu0 %v1241_v44, %s2725_s25  ;;  %v1307_v13 = vld [vmem:[#allocation2 + $0x61] sm:$0xff] }
 0x178   : > { %1304 = vst.msk [vmem:[#allocation3 + $0x90] sm:$0xff] %vm1099_vm6, %v1301_v45  ;;  %v637_v39 = vpop.permute.xlu1 %636  ;;  %v1570_v51 = vld [vmem:[#allocation2 + $0xe8] sm:$0xff] }
 0x179   : > { %v1629_v38 = vld [vmem:[#allocation2 + $0xe4] sm:$0xff]  ;;  %v605_v46 = vpop.permute.xlu0 %604  ;;  %704 = vst.msk [vmem:[#allocation2 + $0xf0] sm:$0xff] %vm672_vm3, %v637_v39 }
 0x17a   : > { %1632 = vst.msk [vmem:[#allocation3 + $0x158] sm:$0xff] %vm1099_vm6, %v1629_v38  ;;  %v1569_v49 = vld [vmem:[#allocation2 + $0xe0] sm:$0xff]  ;;  %1534 = vrot.lane.b32.xlu1 %v1527_v47, %s2726_s10  ;;  %1573 = vst.msk [vmem:[#allocation3 + $0x160] sm:$0xff] %vm1099_vm6, %v1570_v51 }
 0x17b   : > { %688 = vst.msk [vmem:[#allocation2 + $0x70] sm:$0xff] %vm672_vm3, %v605_v46  ;;  %1266 = vrot.lane.b32.xlu0 %v1259_v48, %s2726_s10  ;;  %v1575_v11 = vld [vmem:[#allocation2 + $0xe1] sm:$0xff] }
 0x17c   : > { %1572 = vst.msk [vmem:[#allocation3 + $0x150] sm:$0xff] %vm1099_vm6, %v1569_v49  ;;  %v832_v52 = vpop.permute.xlu1 %831  ;;  %v1593_v16 = vld [vmem:[#allocation2 + $0xe2] sm:$0xff] }
 0x17d   : > { %v800_v6 = vpop.permute.xlu0 %799  ;;  %899 = vst.msk [vmem:[#allocation2 + $0xf0] sm:$0xff] %vm867_vm4, %v832_v52  ;;  %v1325_v19 = vld [vmem:[#allocation2 + $0x62] sm:$0xff] }
 0x17e   : > { %883 = vst.msk [vmem:[#allocation2 + $0x70] sm:$0xff] %vm867_vm4, %v800_v6  ;;  %1552 = vrot.lane.b32.xlu1 %v1545_v7, %s2727_s28  ;;  %v1611_v24 = vld [vmem:[#allocation2 + $0xe3] sm:$0xff] }
 0x17f   : > { %1284 = vrot.lane.b32.xlu0 %v1277_v53, %s2727_s28  ;;  %v1343_v29 = vld [vmem:[#allocation2 + $0x63] sm:$0xff] }
 0x180   : > { %v1027_v54 = vpop.permute.xlu1 %1026  ;;  %v1640_v7 = vld [vmem:[#allocation3 + $0x28] sm:$0xff] }
 0x181   : > { %v995_v31 = vpop.permute.xlu0 %994  ;;  %1094 = vst.msk [vmem:[#allocation2 + $0xf0] sm:$0xff] %vm1062_vm5, %v1027_v54  ;;  %v1664_v53 = vld [vmem:[#allocation3 + $0xe8] sm:$0xff] }
 0x182   : > { %1078 = vst.msk [vmem:[#allocation2 + $0x70] sm:$0xff] %vm1062_vm5, %v995_v31  ;;  %1518 = vrot.lane.b32.xlu1 %v1510_v55, %s2725_s25 }
 0x183   : > { %1250 = vrot.lane.b32.xlu0 %v1242_v32, %s2725_s25 }
 0x184   : > { %v444_v56 = vpop.permute.xlu1 %443 }
 0x185   : > { %v412_v57 = vpop.permute.xlu0 %411  ;;  %510 = vst.msk [vmem:[#allocation2 + $0xf8] sm:$0xf] %vm481_vm7, %v444_v56 }
 0x186   : > { %494 = vst.msk [vmem:[#allocation2 + $0x78] sm:$0xf] %vm481_vm7, %v412_v57  ;;  %1536 = vrot.lane.b32.xlu1 %v1528_v58, %s2726_s10 }
 0x187   : > { %1268 = vrot.lane.b32.xlu0 %v1260_v59, %s2726_s10 }
 0x188   : > { %v1630_v60 = vld [vmem:[#allocation2 + $0xec] sm:$0xff]  ;;  %v639_v62 = vpop.permute.xlu1 %638 }
 0x189   : > { %v1362_v61 = vld [vmem:[#allocation2 + $0x6c] sm:$0xff]  ;;  %v607_v63 = vpop.permute.xlu0 %606  ;;  %1633 = vst.msk [vmem:[#allocation3 + $0x168] sm:$0xff] %vm1099_vm6, %v1630_v60  ;;  %v1642_v60 = vld [vmem:[#allocation3 + $0x38] sm:$0xff] }
 0x18a   : > { %1365 = vst.msk [vmem:[#allocation3 + $0xa8] sm:$0xff] %vm1099_vm6, %v1362_v61  ;;  %1554 = vrot.lane.b32.xlu1 %v1546_v1, %s2727_s28  ;;  %v1571_v17 = vld [vmem:[#allocation2 + $0xf0] sm:$0xff]  ;;  %v1666_v61 = vld [vmem:[#allocation3 + $0xf8] sm:$0xff] }
 0x18b   : > { %705 = vst.msk [vmem:[#allocation2 + $0xf8] sm:$0xf] %vm676_vm8, %v639_v62  ;;  %689 = vst.msk [vmem:[#allocation2 + $0x78] sm:$0xf] %vm676_vm8, %v607_v63  ;;  %1286 = vrot.lane.b32.xlu0 %v1278_v3, %s2727_s28  ;;  %v1303_v18 = vld [vmem:[#allocation2 + $0x70] sm:$0xff] }
 0x18c   : > { %1574 = vst.msk [vmem:[#allocation3 + $0x170] sm:$0xff] %vm1099_vm6, %v1571_v17  ;;  %v834_v4 = vpop.permute.xlu1 %833  ;;  %1306 = vst.msk [vmem:[#allocation3 + $0xb0] sm:$0xff] %vm1099_vm6, %v1303_v18  ;;  %v1576_v42 = vld [vmem:[#allocation2 + $0xe9] sm:$0xff] }
 0x18d   : > { %v802_v5 = vpop.permute.xlu0 %801  ;;  %900 = vst.msk [vmem:[#allocation2 + $0xf8] sm:$0xf] %vm871_vm9, %v834_v4  ;;  %v1308_v33 = vld [vmem:[#allocation2 + $0x69] sm:$0xff] }
 0x18e   : > { %884 = vst.msk [vmem:[#allocation2 + $0x78] sm:$0xf] %vm871_vm9, %v802_v5  ;;  %1581 = vrot.lane.b32.xlu1 %v1575_v11, %s2725_s25  ;;  %v1594_v35 = vld [vmem:[#allocation2 + $0xea] sm:$0xff] }
 0x18f   : > { %1313 = vrot.lane.b32.xlu0 %v1307_v13, %s2725_s25  ;;  %v1326_v8 = vld [vmem:[#allocation2 + $0x6a] sm:$0xff] }
 0x190   : > { %v1029_v14 = vpop.permute.xlu1 %1028  ;;  %v1612_v37 = vld [vmem:[#allocation2 + $0xeb] sm:$0xff] }
 0x191   : > { %v997_v15 = vpop.permute.xlu0 %996  ;;  %1095 = vst.msk [vmem:[#allocation2 + $0xf8] sm:$0xf] %vm1066_vm10, %v1029_v14  ;;  %v1344_v23 = vld [vmem:[#allocation2 + $0x6b] sm:$0xff] }
 0x192   : > { %1079 = vst.msk [vmem:[#allocation2 + $0x78] sm:$0xf] %vm1066_vm10, %v997_v15  ;;  %1599 = vrot.lane.b32.xlu1 %v1593_v16, %s2726_s10  ;;  %v1644_v11 = vld [vmem:[#allocation3 + $0x48] sm:$0xff] }
 0x193   : > { %1331 = vrot.lane.b32.xlu0 %v1325_v19, %s2726_s10  ;;  %v1668_v13 = vld [vmem:[#allocation3 + $0x108] sm:$0xff] }
 0x194   : > { %v1381_v9 = vpop.permute.xlu1 %1380 }
 0x195   : > { %v1110_v20 = vpop.permute.xlu0 %1109  ;;  %1389 = vst.msk [vmem:[#allocation3 + $0xc0] sm:$0xff] %vm1118_vm11, %v1381_v9 }
 0x196   : > { %1119 = vst.msk [vmem:[#allocation3] sm:$0xff] %vm1118_vm11, %v1110_v20  ;;  %1617 = vrot.lane.b32.xlu1 %v1611_v24, %s2727_s28 }
 0x197   : > { %1349 = vrot.lane.b32.xlu0 %v1343_v29, %s2727_s28 }
 0x198   : > { %v1631_v12 = vld [vmem:[#allocation2 + $0xf4] sm:$0xff]  ;;  %v1399_v26 = vpop.permute.xlu1 %1398 }
 0x199   : > { %v1363_v25 = vld [vmem:[#allocation2 + $0x74] sm:$0xff]  ;;  %v1129_v30 = vpop.permute.xlu0 %1128  ;;  %1634 = vst.msk [vmem:[#allocation3 + $0x178] sm:$0xff] %vm1099_vm6, %v1631_v12 }
 0x19a   : > { %1366 = vst.msk [vmem:[#allocation3 + $0xb8] sm:$0xff] %vm1099_vm6, %v1363_v25  ;;  %1583 = vrot.lane.b32.xlu1 %v1576_v42, %s2725_s25  ;;  %v1577_v43 = vld [vmem:[#allocation2 + $0xf1] sm:$0xff] }
 0x19b   : > { %1407 = vst.msk [vmem:[#allocation3 + $0xc0] sm:$0xff] %vm1137_vm12, %v1399_v26  ;;  %1138 = vst.msk [vmem:[#allocation3] sm:$0xff] %vm1137_vm12, %v1129_v30  ;;  %1315 = vrot.lane.b32.xlu0 %v1308_v33, %s2725_s25  ;;  %v1309_v0 = vld [vmem:[#allocation2 + $0x71] sm:$0xff] }
 0x19c   : > { %v1417_v10 = vpop.permute.xlu1 %1416  ;;  %v1595_v28 = vld [vmem:[#allocation2 + $0xf2] sm:$0xff] }
 0x19d   : > { %v1148_v34 = vpop.permute.xlu0 %1147  ;;  %1425 = vst.msk [vmem:[#allocation3 + $0xc0] sm:$0xff] %vm1156_vm13, %v1417_v10  ;;  %v1327_v38 = vld [vmem:[#allocation2 + $0x72] sm:$0xff] }
 0x19e   : > { %1157 = vst.msk [vmem:[#allocation3] sm:$0xff] %vm1156_vm13, %v1148_v34  ;;  %1601 = vrot.lane.b32.xlu1 %v1594_v35, %s2726_s10  ;;  %v1613_v47 = vld [vmem:[#allocation2 + $0xf3] sm:$0xff] }
 0x19f   : > { %1333 = vrot.lane.b32.xlu0 %v1326_v8, %s2726_s10  ;;  %v1345_v48 = vld [vmem:[#allocation2 + $0x73] sm:$0xff] }
 0x1a0   : > { %v1383_v50 = vpop.permute.xlu1 %1382  ;;  %v1646_v12 = vld [vmem:[#allocation3 + $0x58] sm:$0xff] }
 0x1a1   : > { %v1112_v36 = vpop.permute.xlu0 %1111  ;;  %1390 = vst.msk [vmem:[#allocation3 + $0xd0] sm:$0xff] %vm1118_vm11, %v1383_v50  ;;  %v1670_v25 = vld [vmem:[#allocation3 + $0x118] sm:$0xff]  ;;  %v1648_v50 = vld [vmem:[#allocation3 + $0x68] sm:$0xff] }
 0x1a2   : > { %1120 = vst.msk [vmem:[#allocation3 + $0x10] sm:$0xff] %vm1118_vm11, %v1112_v36  ;;  %1619 = vrot.lane.b32.xlu1 %v1612_v37, %s2727_s28  ;;  %v1672_v36 = vld [vmem:[#allocation3 + $0x128] sm:$0xff] }
 0x1a3   : > { %1351 = vrot.lane.b32.xlu0 %v1344_v23, %s2727_s28 }
 0x1a4   : > { %v1401_v21 = vpop.permute.xlu1 %1400  ;;  %v1659_v41 = vld [vmem:[#allocation3 + $0xc0] sm:$0xff] }
 0x1a5   : > { %v1131_v22 = vpop.permute.xlu0 %1130  ;;  %v1635_v40 = vld [vmem:[#allocation3] sm:$0xff]  ;;  %1408 = vst.msk [vmem:[#allocation3 + $0xd0] sm:$0xff] %vm1137_vm12, %v1401_v21  ;;  %1847 = vmatmul.mubr.f32.vlgmr.msra.gmra.mrb[0].mxu1 %v1659_v41 }
 0x1a6   : > { %1139 = vst.msk [vmem:[#allocation3 + $0x10] sm:$0xff] %vm1137_vm12, %v1131_v22  ;;  %1787 = vmatmul.mubr.f32.vlgmr.msra.gmra.mrb[0].mxu0 %v1635_v40  ;;  %1585 = vrot.lane.b32.xlu1 %v1577_v43, %s2725_s25 }
 0x1a7   : > { %1851 = vmatprep.mubr.f32.mxu1 %v1662_v2  ;;  %1317 = vrot.lane.b32.xlu0 %v1309_v0, %s2725_s25  ;;  %v1650_v0 = vld [vmem:[#allocation3 + $0x78] sm:$0xff]  ;;  %s3739_s25 = scalar_lea.hbm %s3802_s3, %s2361_s7 }
 0x1a8   : > { %1791 = vmatprep.mubr.f32.mxu0 %v1638_v27  ;;  %v1419_v44 = vpop.permute.xlu1 %1418  ;;  %v1674_v27 = vld [vmem:[#allocation3 + $0x138] sm:$0xff] }
 0x1a9   : > { %v1150_v45 = vpop.permute.xlu0 %1149  ;;  %1426 = vst.msk [vmem:[#allocation3 + $0xd0] sm:$0xff] %vm1156_vm13, %v1419_v44 }
 0x1aa   : > { %1158 = vst.msk [vmem:[#allocation3 + $0x10] sm:$0xff] %vm1156_vm13, %v1150_v45  ;;  %1603 = vrot.lane.b32.xlu1 %v1595_v28, %s2726_s10 }
 0x1ab   : > { %1335 = vrot.lane.b32.xlu0 %v1327_v38, %s2726_s10  ;;  %s2728_s10 = smov [#allocation4]  }
 0x1ac   : > { %v1385_v39 = vpop.permute.xlu1 %1384 }
 0x1ad   : > { %v1114_v46 = vpop.permute.xlu0 %1113  ;;  %1391 = vst.msk [vmem:[#allocation3 + $0xe0] sm:$0xff] %vm1118_vm11, %v1385_v39 }
 0x1ae   : > { %1121 = vst.msk [vmem:[#allocation3 + $0x20] sm:$0xff] %vm1118_vm11, %v1114_v46  ;;  %1621 = vrot.lane.b32.xlu1 %v1613_v47, %s2727_s28 }
 0x1af   : > { %1353 = vrot.lane.b32.xlu0 %v1345_v48, %s2727_s28  ;;  %s2627_s28 = sshll.u32 %s2728_s10, 4  ;;  %s2628_s28 = int_to_ptr.vmem [resolvable:$false] %s2627_s28 }
 0x1b0   : > { %v1403_v49 = vpop.permute.xlu1 %1402  ;;  %v1661_v6 = vld [vmem:[#allocation3 + $0xd0] sm:$0xff]  ;;  %s2629_s11 = scalar_lea.vmem %s2628_s28, 6144  ;;  %p2630_p3 = scmp.lt.s32.totalorder %s3742_s8, %s2628_s28 }
 0x1b1   : > { %v1133_v51 = vpop.permute.xlu0 %1132  ;;  %v1637_v52 = vld [vmem:[#allocation3 + $0x10] sm:$0xff]  ;;  %1409 = vst.msk [vmem:[#allocation3 + $0xe0] sm:$0xff] %vm1137_vm12, %v1403_v49  ;;  %1852 = vmatmul.mubr.f32.gmra.mrb[2].mxu1 %v1661_v6  ;;  %v1652_v49 = vld [vmem:[#allocation3 + $0x88] sm:$0xff]  ;;  %p2631_p4 = scmp.lt.s32.totalorder %s2629_s11, %s2623_s16 }
 0x1b2   : > { %1140 = vst.msk [vmem:[#allocation3 + $0x20] sm:$0xff] %vm1137_vm12, %v1133_v51  ;;  %1792 = vmatmul.mubr.f32.gmra.mrb[2].mxu0 %v1637_v52  ;;  %1856 = vmatprep.mubr.f32.mxu1 %v1664_v53  ;;  %v1676_v51 = vld [vmem:[#allocation3 + $0x148] sm:$0xff] }
 0x1b3   : > { %1796 = vmatprep.mubr.f32.mxu0 %v1640_v7  ;;  %p2632_p6 = por %p2631_p4, %p2630_p3 }
 0x1b4   : > { %v1421_v54 = vpop.permute.xlu1 %1420 }
 0x1b5   : > { %v1152_v31 = vpop.permute.xlu0 %1151  ;;  %1427 = vst.msk [vmem:[#allocation3 + $0xe0] sm:$0xff] %vm1156_vm13, %v1421_v54  ;;  %p2633_p8 = pnand %p2632_p6, %p2626_p2 }
 0x1b6   : > { %1159 = vst.msk [vmem:[#allocation3 + $0x20] sm:$0xff] %vm1156_vm13, %v1152_v31 }
 0x1b8   : > { %v1448_v55 = vpop.permute.xlu1 %1447 }
 0x1b9   : > { %v1180_v32 = vpop.permute.xlu0 %1179  ;;  %1456 = vst.msk [vmem:[#allocation3 + $0xf0] sm:$0xff] %vm1118_vm11, %v1448_v55 }
 0x1ba   : > { %1188 = vst.msk [vmem:[#allocation3 + $0x30] sm:$0xff] %vm1118_vm11, %v1180_v32 }
 0x1bc   : > { %v1466_v56 = vpop.permute.xlu1 %1465  ;;  %v1663_v59 = vld [vmem:[#allocation3 + $0xe0] sm:$0xff] }
 0x1bd   : > { %v1198_v57 = vpop.permute.xlu0 %1197  ;;  %v1639_v58 = vld [vmem:[#allocation3 + $0x20] sm:$0xff]  ;;  %1474 = vst.msk [vmem:[#allocation3 + $0xf0] sm:$0xff] %vm1137_vm12, %v1466_v56  ;;  %1857 = vmatmul.mubr.f32.gmra.mrb[4].mxu1 %v1663_v59  ;;  %v1654_v56 = vld [vmem:[#allocation3 + $0x98] sm:$0xff] }
 0x1be   : > { %1206 = vst.msk [vmem:[#allocation3 + $0x30] sm:$0xff] %vm1137_vm12, %v1198_v57  ;;  %1797 = vmatmul.mubr.f32.gmra.mrb[4].mxu0 %v1639_v58  ;;  %1861 = vmatprep.mubr.f32.mxu1 %v1666_v61  ;;  %v1678_v57 = vld [vmem:[#allocation3 + $0x158] sm:$0xff] }
 0x1bf   : > { %1801 = vmatprep.mubr.f32.mxu0 %v1642_v60 }
 0x1c0   : > { %v1484_v62 = vpop.permute.xlu1 %1483 }
 0x1c1   : > { %v1216_v63 = vpop.permute.xlu0 %1215  ;;  %1492 = vst.msk [vmem:[#allocation3 + $0xf0] sm:$0xff] %vm1156_vm13, %v1484_v62 }
 0x1c2   : > { %1224 = vst.msk [vmem:[#allocation3 + $0x30] sm:$0xff] %vm1156_vm13, %v1216_v63 }
 0x1c4   : > { %v1450_v1 = vpop.permute.xlu1 %1449 }
 0x1c5   : > { %v1182_v3 = vpop.permute.xlu0 %1181  ;;  %1457 = vst.msk [vmem:[#allocation3 + $0x100] sm:$0xff] %vm1118_vm11, %v1450_v1 }
 0x1c6   : > { %1189 = vst.msk [vmem:[#allocation3 + $0x40] sm:$0xff] %vm1118_vm11, %v1182_v3 }
 0x1c8   : > { %v1468_v17 = vpop.permute.xlu1 %1467  ;;  %v1665_v5 = vld [vmem:[#allocation3 + $0xf0] sm:$0xff] }
 0x1c9   : > { %v1200_v18 = vpop.permute.xlu0 %1199  ;;  %v1641_v4 = vld [vmem:[#allocation3 + $0x30] sm:$0xff]  ;;  %1475 = vst.msk [vmem:[#allocation3 + $0x100] sm:$0xff] %vm1137_vm12, %v1468_v17  ;;  %1862 = vmatmul.mubr.f32.gmra.mrb[6].mxu1 %v1665_v5  ;;  %v1656_v17 = vld [vmem:[#allocation3 + $0xa8] sm:$0xff] }
 0x1ca   : > { %1207 = vst.msk [vmem:[#allocation3 + $0x40] sm:$0xff] %vm1137_vm12, %v1200_v18  ;;  %1802 = vmatmul.mubr.f32.gmra.mrb[6].mxu0 %v1641_v4  ;;  %1866 = vmatprep.mubr.f32.mxu1 %v1668_v13  ;;  %v1680_v18 = vld [vmem:[#allocation3 + $0x168] sm:$0xff] }
 0x1cb   : > { %1806 = vmatprep.mubr.f32.mxu0 %v1644_v11 }
 0x1cc   : > { %v1486_v14 = vpop.permute.xlu1 %1485 }
 0x1cd   : > { %v1218_v15 = vpop.permute.xlu0 %1217  ;;  %1493 = vst.msk [vmem:[#allocation3 + $0x100] sm:$0xff] %vm1156_vm13, %v1486_v14 }
 0x1ce   : > { %1225 = vst.msk [vmem:[#allocation3 + $0x40] sm:$0xff] %vm1156_vm13, %v1218_v15 }
 0x1d0   : > { %v1452_v16 = vpop.permute.xlu1 %1451 }
 0x1d1   : > { %v1184_v19 = vpop.permute.xlu0 %1183  ;;  %1458 = vst.msk [vmem:[#allocation3 + $0x110] sm:$0xff] %vm1118_vm11, %v1452_v16 }
 0x1d2   : > { %1190 = vst.msk [vmem:[#allocation3 + $0x50] sm:$0xff] %vm1118_vm11, %v1184_v19 }
 0x1d4   : > { %v1470_v9 = vpop.permute.xlu1 %1469  ;;  %v1667_v29 = vld [vmem:[#allocation3 + $0x100] sm:$0xff] }
 0x1d5   : > { %v1202_v20 = vpop.permute.xlu0 %1201  ;;  %v1643_v24 = vld [vmem:[#allocation3 + $0x40] sm:$0xff]  ;;  %1476 = vst.msk [vmem:[#allocation3 + $0x110] sm:$0xff] %vm1137_vm12, %v1470_v9  ;;  %1867 = vmatmul.mubr.f32.gmra.mrb[8].mxu1 %v1667_v29  ;;  %v1658_v9 = vld [vmem:[#allocation3 + $0xb8] sm:$0xff] }
 0x1d6   : > { %1208 = vst.msk [vmem:[#allocation3 + $0x50] sm:$0xff] %vm1137_vm12, %v1202_v20  ;;  %1807 = vmatmul.mubr.f32.gmra.mrb[8].mxu0 %v1643_v24  ;;  %1871 = vmatprep.mubr.f32.mxu1 %v1670_v25  ;;  %v1682_v20 = vld [vmem:[#allocation3 + $0x178] sm:$0xff] }
 0x1d7   : > { %1811 = vmatprep.mubr.f32.mxu0 %v1646_v12 }
 0x1d8   : > { %v1488_v26 = vpop.permute.xlu1 %1487 }
 0x1d9   : > { %v1220_v30 = vpop.permute.xlu0 %1219  ;;  %1494 = vst.msk [vmem:[#allocation3 + $0x110] sm:$0xff] %vm1156_vm13, %v1488_v26  ;;  %v3680_v26 = vld [vmem:[%s3801_s2] ss:$0 sm:$0xff] }
 0x1da   : > { %1226 = vst.msk [vmem:[#allocation3 + $0x50] sm:$0xff] %vm1156_vm13, %v1220_v30 }
 0x1dc   : > { %v1515_v42 = vpop.permute.xlu1 %1514 }
 0x1dd   : > { %v1247_v33 = vpop.permute.xlu0 %1246  ;;  %1523 = vst.msk [vmem:[#allocation3 + $0x120] sm:$0xff] %vm1118_vm11, %v1515_v42 }
 0x1de   : > { %1255 = vst.msk [vmem:[#allocation3 + $0x60] sm:$0xff] %vm1118_vm11, %v1247_v33 }
 0x1e0   : > { %v1533_v10 = vpop.permute.xlu1 %1532  ;;  %v1669_v8 = vld [vmem:[#allocation3 + $0x110] sm:$0xff] }
 0x1e1   : > { %v1265_v34 = vpop.permute.xlu0 %1264  ;;  %v1645_v35 = vld [vmem:[#allocation3 + $0x50] sm:$0xff]  ;;  %1541 = vst.msk [vmem:[#allocation3 + $0x120] sm:$0xff] %vm1137_vm12, %v1533_v10  ;;  %1872 = vmatmul.mubr.f32.gmra.mrb[10].mxu1 %v1669_v8 }
 0x1e2   : > { %1273 = vst.msk [vmem:[#allocation3 + $0x60] sm:$0xff] %vm1137_vm12, %v1265_v34  ;;  %1812 = vmatmul.mubr.f32.gmra.mrb[10].mxu0 %v1645_v35  ;;  %1876 = vmatprep.mubr.f32.mxu1 %v1672_v36 }
 0x1e3   : > { %1816 = vmatprep.mubr.f32.mxu0 %v1648_v50 }
 0x1e4   : > { %v1551_v37 = vpop.permute.xlu1 %1550 }
 0x1e5   : > { %v1283_v23 = vpop.permute.xlu0 %1282  ;;  %1559 = vst.msk [vmem:[#allocation3 + $0x120] sm:$0xff] %vm1156_vm13, %v1551_v37 }
 0x1e6   : > { %1291 = vst.msk [vmem:[#allocation3 + $0x60] sm:$0xff] %vm1156_vm13, %v1283_v23 }
 0x1e8   : > { %v1517_v21 = vpop.permute.xlu1 %1516 }
 0x1e9   : > { %v1249_v22 = vpop.permute.xlu0 %1248  ;;  %1524 = vst.msk [vmem:[#allocation3 + $0x130] sm:$0xff] %vm1118_vm11, %v1517_v21 }
 0x1ea   : > { %1256 = vst.msk [vmem:[#allocation3 + $0x70] sm:$0xff] %vm1118_vm11, %v1249_v22 }
 0x1ec   : > { %v1535_v40 = vpop.permute.xlu1 %1534  ;;  %v1671_v2 = vld [vmem:[#allocation3 + $0x120] sm:$0xff] }
 0x1ed   : > { %v1267_v41 = vpop.permute.xlu0 %1266  ;;  %v1647_v43 = vld [vmem:[#allocation3 + $0x60] sm:$0xff]  ;;  %1542 = vst.msk [vmem:[#allocation3 + $0x130] sm:$0xff] %vm1137_vm12, %v1535_v40  ;;  %1877 = vmatmul.mubr.f32.gmra.mrb[12].mxu1 %v1671_v2 }
 0x1ee   : > { %1274 = vst.msk [vmem:[#allocation3 + $0x70] sm:$0xff] %vm1137_vm12, %v1267_v41  ;;  %1817 = vmatmul.mubr.f32.gmra.mrb[12].mxu0 %v1647_v43  ;;  %1881 = vmatprep.mubr.f32.mxu1 %v1674_v27 }
 0x1ef   : > { %1821 = vmatprep.mubr.f32.mxu0 %v1650_v0 }
 0x1f0   : > { %v1553_v44 = vpop.permute.xlu1 %1552 }
 0x1f1   : > { %v1285_v45 = vpop.permute.xlu0 %1284  ;;  %1560 = vst.msk [vmem:[#allocation3 + $0x130] sm:$0xff] %vm1156_vm13, %v1553_v44 }
 0x1f2   : > { %1292 = vst.msk [vmem:[#allocation3 + $0x70] sm:$0xff] %vm1156_vm13, %v1285_v45 }
 0x1f4   : > { %v1519_v28 = vpop.permute.xlu1 %1518 }
 0x1f5   : > { %v1251_v38 = vpop.permute.xlu0 %1250  ;;  %1525 = vst.msk [vmem:[#allocation3 + $0x140] sm:$0xff] %vm1118_vm11, %v1519_v28 }
 0x1f6   : > { %1257 = vst.msk [vmem:[#allocation3 + $0x80] sm:$0xff] %vm1118_vm11, %v1251_v38 }
 0x1f8   : > { %v1537_v39 = vpop.permute.xlu1 %1536  ;;  %v1673_v48 = vld [vmem:[#allocation3 + $0x130] sm:$0xff] }
 0x1f9   : > { %v1269_v46 = vpop.permute.xlu0 %1268  ;;  %v1649_v47 = vld [vmem:[#allocation3 + $0x70] sm:$0xff]  ;;  %1543 = vst.msk [vmem:[#allocation3 + $0x140] sm:$0xff] %vm1137_vm12, %v1537_v39  ;;  %1882 = vmatmul.mubr.f32.gmra.mrb[14].mxu1 %v1673_v48 }
 0x1fa   : > { %1275 = vst.msk [vmem:[#allocation3 + $0x80] sm:$0xff] %vm1137_vm12, %v1269_v46  ;;  %1822 = vmatmul.mubr.f32.gmra.mrb[14].mxu0 %v1649_v47  ;;  %1886 = vmatprep.mubr.f32.mxu1 %v1676_v51 }
 0x1fb   : > { %1826 = vmatprep.mubr.f32.mxu0 %v1652_v49 }
 0x1fc   : > { %v1555_v52 = vpop.permute.xlu1 %1554 }
 0x1fd   : > { %v1287_v6 = vpop.permute.xlu0 %1286  ;;  %1561 = vst.msk [vmem:[#allocation3 + $0x140] sm:$0xff] %vm1156_vm13, %v1555_v52 }
 0x1fe   : > { %1293 = vst.msk [vmem:[#allocation3 + $0x80] sm:$0xff] %vm1156_vm13, %v1287_v6 }
 0x200   : > { %v1582_v7 = vpop.permute.xlu1 %1581 }
 0x201   : > { %v1314_v53 = vpop.permute.xlu0 %1313  ;;  %1590 = vst.msk [vmem:[#allocation3 + $0x150] sm:$0xff] %vm1118_vm11, %v1582_v7 }
 0x202   : > { %1322 = vst.msk [vmem:[#allocation3 + $0x90] sm:$0xff] %vm1118_vm11, %v1314_v53 }
 0x204   : > { %v1600_v54 = vpop.permute.xlu1 %1599  ;;  %v1675_v32 = vld [vmem:[#allocation3 + $0x140] sm:$0xff] }
 0x205   : > { %v1332_v31 = vpop.permute.xlu0 %1331  ;;  %v1651_v55 = vld [vmem:[#allocation3 + $0x80] sm:$0xff]  ;;  %1608 = vst.msk [vmem:[#allocation3 + $0x150] sm:$0xff] %vm1137_vm12, %v1600_v54  ;;  %1887 = vmatmul.mubr.f32.gmra.mrb[16].mxu1 %v1675_v32 }
 0x206   : > { %1340 = vst.msk [vmem:[#allocation3 + $0x90] sm:$0xff] %vm1137_vm12, %v1332_v31  ;;  %1827 = vmatmul.mubr.f32.gmra.mrb[16].mxu0 %v1651_v55  ;;  %1891 = vmatprep.mubr.f32.mxu1 %v1678_v57 }
 0x207   : > { %1831 = vmatprep.mubr.f32.mxu0 %v1654_v56 }
 0x208   : > { %v1618_v58 = vpop.permute.xlu1 %1617 }
 0x209   : > { %v1350_v59 = vpop.permute.xlu0 %1349  ;;  %1626 = vst.msk [vmem:[#allocation3 + $0x150] sm:$0xff] %vm1156_vm13, %v1618_v58 }
 0x20a   : > { %1358 = vst.msk [vmem:[#allocation3 + $0x90] sm:$0xff] %vm1156_vm13, %v1350_v59 }
 0x20c   : > { %v1584_v60 = vpop.permute.xlu1 %1583 }
 0x20d   : > { %v1316_v61 = vpop.permute.xlu0 %1315  ;;  %1591 = vst.msk [vmem:[#allocation3 + $0x160] sm:$0xff] %vm1118_vm11, %v1584_v60 }
 0x20e   : > { %1323 = vst.msk [vmem:[#allocation3 + $0xa0] sm:$0xff] %vm1118_vm11, %v1316_v61 }
 0x210   : > { %v1602_v62 = vpop.permute.xlu1 %1601  ;;  %v1677_v3 = vld [vmem:[#allocation3 + $0x150] sm:$0xff] }
 0x211   : > { %v1334_v63 = vpop.permute.xlu0 %1333  ;;  %v1653_v1 = vld [vmem:[#allocation3 + $0x90] sm:$0xff]  ;;  %1609 = vst.msk [vmem:[#allocation3 + $0x160] sm:$0xff] %vm1137_vm12, %v1602_v62  ;;  %1892 = vmatmul.mubr.f32.gmra.mrb[18].mxu1 %v1677_v3 }
 0x212   : > { %1341 = vst.msk [vmem:[#allocation3 + $0xa0] sm:$0xff] %vm1137_vm12, %v1334_v63  ;;  %1832 = vmatmul.mubr.f32.gmra.mrb[18].mxu0 %v1653_v1  ;;  %1896 = vmatprep.mubr.f32.mxu1 %v1680_v18 }
 0x213   : > { %1836 = vmatprep.mubr.f32.mxu0 %v1656_v17 }
 0x214   : > { %v1620_v4 = vpop.permute.xlu1 %1619 }
 0x215   : > { %v1352_v5 = vpop.permute.xlu0 %1351  ;;  %1627 = vst.msk [vmem:[#allocation3 + $0x160] sm:$0xff] %vm1156_vm13, %v1620_v4 }
 0x216   : > { %1359 = vst.msk [vmem:[#allocation3 + $0xa0] sm:$0xff] %vm1156_vm13, %v1352_v5 }
 0x218   : > { %v1586_v11 = vpop.permute.xlu1 %1585 }
 0x219   : > { %1592 = vst.msk [vmem:[#allocation3 + $0x170] sm:$0xff] %vm1118_vm11, %v1586_v11  ;;  %v1318_v13 = vpop.permute.xlu0 %1317 }
 0x21a   : > { %1324 = vst.msk [vmem:[#allocation3 + $0xb0] sm:$0xff] %vm1118_vm11, %v1318_v13 }
 0x21c   : > { %v1604_v14 = vpop.permute.xlu1 %1603  ;;  %v1679_v16 = vld [vmem:[#allocation3 + $0x160] sm:$0xff] }
 0x21d   : > { %v1655_v15 = vld [vmem:[#allocation3 + $0xa0] sm:$0xff]  ;;  %1610 = vst.msk [vmem:[#allocation3 + $0x170] sm:$0xff] %vm1137_vm12, %v1604_v14  ;;  %v1336_v19 = vpop.permute.xlu0 %1335  ;;  %1897 = vmatmul.mubr.f32.gmra.mrb[20].mxu1 %v1679_v16 }
 0x21e   : > { %1837 = vmatmul.mubr.f32.gmra.mrb[20].mxu0 %v1655_v15  ;;  %1342 = vst.msk [vmem:[#allocation3 + $0xb0] sm:$0xff] %vm1137_vm12, %v1336_v19  ;;  %1901 = vmatprep.mubr.f32.mxu1 %v1682_v20 }
 0x21f   : > { %1841 = vmatprep.mubr.f32.mxu0 %v1658_v9 }
 0x220   : > { %v1622_v24 = vpop.permute.xlu1 %1621 }
 0x221   : > { %1628 = vst.msk [vmem:[#allocation3 + $0x170] sm:$0xff] %vm1156_vm13, %v1622_v24  ;;  %v1354_v29 = vpop.permute.xlu0 %1353 }
 0x222   : > { %1360 = vst.msk [vmem:[#allocation3 + $0xb0] sm:$0xff] %vm1156_vm13, %v1354_v29 }
 0x228   : > { %v1681_v12 = vld [vmem:[#allocation3 + $0x170] sm:$0xff] }
 0x229   : > { %v1657_v25 = vld [vmem:[#allocation3 + $0xb0] sm:$0xff]  ;;  %1902 = vmatmul.mubr.f32.gmra.mrb[22].mxu1 %v1681_v12 }
 0x22a   : > { %1842 = vmatmul.mubr.f32.gmra.mrb[22].mxu0 %v1657_v25 }
 0x278   : > { %v1848_v42 = vpop.f32.mrb[0].mxu1 }
 0x279   : > { %v1788_v30 = vpop.f32.mrb[0].mxu0  ;;  %v1849_v10 = vadd.f32 %v3680_v26, %v1848_v42  ;;  %v1850_v35 = vpop.f32.mrb[1].mxu1 }
 0x27a   : > { %v1789_v33 = vadd.f32 %v3680_v26, %v1788_v30  ;;  %v1790_v34 = vpop.f32.mrb[1].mxu0 }
 0x27b   : > { %v2346_v50 = vmul.f32 -1.442695, %v1849_v10 }
 0x27c   : > { %v2334_v8 = vmul.f32 -1.442695, %v1789_v33 }
 0x27e   : > { %2527 = vpow2.f32 %v2334_v8 }
 0x27f   : > { %2529 = vpow2.f32 %v2346_v50 }
 0x284   : > { %v1853_v37 = vpop.f32.mrb[2].mxu1 }
 0x285   : > { %v1793_v36 = vpop.f32.mrb[2].mxu0  ;;  %v1854_v21 = vadd.f32 %v3680_v26, %v1853_v37  ;;  %v1855_v40 = vpop.f32.mrb[3].mxu1 }
 0x286   : > { %v1794_v23 = vadd.f32 %v3680_v26, %v1793_v36  ;;  %v1795_v22 = vpop.f32.mrb[3].mxu0 }
 0x287   : > { %v2347_v27 = vmul.f32 -1.442695, %v1854_v21 }
 0x288   : > { %v2528_v41 = vpop.eup %2527  ;;  %v2335_v43 = vmul.f32 -1.442695, %v1794_v23 }
 0x289   : > { %v2530_v2 = vpop.eup %2529  ;;  %v1979_v0 = vadd.f32 1.0, %v2528_v41 }
 0x28a   : > { %v1991_v44 = vadd.f32 1.0, %v2530_v2  ;;  %2531 = vpow2.f32 %v2335_v43 }
 0x28b   : > { %2533 = vrcp.f32 %v1979_v0 }
 0x28c   : > { %2535 = vrcp.f32 %v1991_v44 }
 0x28d   : > { %2537 = vpow2.f32 %v2347_v27 }
 0x290   : > { %v1858_v28 = vpop.f32.mrb[4].mxu1 }
 0x291   : > { %v1798_v45 = vpop.f32.mrb[4].mxu0  ;;  %v1859_v39 = vadd.f32 %v3680_v26, %v1858_v28  ;;  %v1860_v47 = vpop.f32.mrb[5].mxu1 }
 0x292   : > { %v1799_v38 = vadd.f32 %v3680_v26, %v1798_v45  ;;  %v1800_v46 = vpop.f32.mrb[5].mxu0 }
 0x293   : > { %v2348_v51 = vmul.f32 -1.442695, %v1859_v39 }
 0x294   : > { %v2532_v48 = vpop.eup %2531  ;;  %v2336_v49 = vmul.f32 -1.442695, %v1799_v38 }
 0x295   : > { %v2534_v52 = vpop.eup %2533  ;;  %v1980_v6 = vadd.f32 1.0, %v2532_v48 }
 0x296   : > { %v2536_v7 = vpop.eup %2535  ;;  %v2051_v53 = vmul.f32 %v2534_v52, %v1789_v33  ;;  %2539 = vpow2.f32 %v2336_v49 }
 0x297   : > { %v2538_v54 = vpop.eup %2537  ;;  %v2063_v31 = vmul.f32 %v2536_v7, %v1849_v10  ;;  %2541 = vrcp.f32 %v1980_v6 }
 0x298   : > { %2075 = vst [vmem:[%s3691_s4] sm:$0xff] %v2051_v53  ;;  %v1992_v55 = vadd.f32 1.0, %v2538_v54  ;;  %2543 = vpow2.f32 %v2348_v51 }
 0x299   : > { %2087 = vst [vmem:[%s3691_s4 + $0x60] sm:$0xff] %v2063_v31 }
 0x29a   : > { %2545 = vrcp.f32 %v1992_v55 }
 0x29c   : > { %v1863_v56 = vpop.f32.mrb[6].mxu1 }
 0x29d   : > { %v1803_v32 = vpop.f32.mrb[6].mxu0  ;;  %v1864_v58 = vadd.f32 %v3680_v26, %v1863_v56  ;;  %v1865_v60 = vpop.f32.mrb[7].mxu1 }
 0x29e   : > { %v1804_v57 = vadd.f32 %v3680_v26, %v1803_v32  ;;  %v1805_v59 = vpop.f32.mrb[7].mxu0 }
 0x29f   : > { %v2349_v63 = vmul.f32 -1.442695, %v1864_v58 }
 0x2a0   : > { %v2540_v61 = vpop.eup %2539  ;;  %v2337_v62 = vmul.f32 -1.442695, %v1804_v57 }
 0x2a1   : > { %v2542_v1 = vpop.eup %2541  ;;  %v1981_v3 = vadd.f32 1.0, %v2540_v61 }
 0x2a2   : > { %v2544_v17 = vpop.eup %2543  ;;  %v2052_v18 = vmul.f32 %v2542_v1, %v1794_v23  ;;  %2547 = vpow2.f32 %v2337_v62 }
 0x2a3   : > { %2549 = vrcp.f32 %v1981_v3  ;;  %v1993_v4 = vadd.f32 1.0, %v2544_v17 }
 0x2a4   : > { %v2546_v5 = vpop.eup %2545  ;;  %2076 = vst [vmem:[%s3691_s4 + $0x8] sm:$0xff] %v2052_v18  ;;  %2551 = vpow2.f32 %v2349_v63 }
 0x2a5   : > { %v2064_v11 = vmul.f32 %v2546_v5, %v1854_v21  ;;  %2553 = vrcp.f32 %v1993_v4 }
 0x2a7   : > { %2088 = vst [vmem:[%s3691_s4 + $0x68] sm:$0xff] %v2064_v11 }
 0x2a8   : > { %v1868_v14 = vpop.f32.mrb[8].mxu1 }
 0x2a9   : > { %v1808_v13 = vpop.f32.mrb[8].mxu0  ;;  %v1869_v16 = vadd.f32 %v3680_v26, %v1868_v14  ;;  %v1870_v9 = vpop.f32.mrb[9].mxu1 }
 0x2aa   : > { %v1809_v15 = vadd.f32 %v3680_v26, %v1808_v13  ;;  %v1810_v19 = vpop.f32.mrb[9].mxu0 }
 0x2ab   : > { %v2350_v29 = vmul.f32 -1.442695, %v1869_v16 }
 0x2ac   : > { %v2548_v20 = vpop.eup %2547  ;;  %v2338_v24 = vmul.f32 -1.442695, %v1809_v15 }
 0x2ad   : > { %v2550_v12 = vpop.eup %2549  ;;  %v1982_v25 = vadd.f32 1.0, %v2548_v20 }
 0x2ae   : > { %v2552_v30 = vpop.eup %2551  ;;  %v2053_v42 = vmul.f32 %v2550_v12, %v1799_v38  ;;  %2555 = vpow2.f32 %v2338_v24 }
 0x2af   : > { %v2554_v33 = vpop.eup %2553  ;;  %2557 = vrcp.f32 %v1982_v25  ;;  %v1994_v10 = vadd.f32 1.0, %v2552_v30 }
 0x2b0   : > { %2077 = vst [vmem:[%s3691_s4 + $0x10] sm:$0xff] %v2053_v42  ;;  %v2065_v34 = vmul.f32 %v2554_v33, %v1859_v39  ;;  %2559 = vpow2.f32 %v2350_v29 }
 0x2b1   : > { %2561 = vrcp.f32 %v1994_v10 }
 0x2b2   : > { %2089 = vst [vmem:[%s3691_s4 + $0x70] sm:$0xff] %v2065_v34 }
 0x2b4   : > { %v1873_v8 = vpop.f32.mrb[10].mxu1 }
 0x2b5   : > { %v1813_v35 = vpop.f32.mrb[10].mxu0  ;;  %v1874_v36 = vadd.f32 %v3680_v26, %v1873_v8  ;;  %v1875_v23 = vpop.f32.mrb[11].mxu1 }
 0x2b6   : > { %v1814_v50 = vadd.f32 %v3680_v26, %v1813_v35  ;;  %v1815_v37 = vpop.f32.mrb[11].mxu0 }
 0x2b7   : > { %v2351_v40 = vmul.f32 -1.442695, %v1874_v36 }
 0x2b8   : > { %v2556_v21 = vpop.eup %2555  ;;  %v2339_v22 = vmul.f32 -1.442695, %v1814_v50 }
 0x2b9   : > { %v2558_v41 = vpop.eup %2557  ;;  %v1983_v43 = vadd.f32 1.0, %v2556_v21 }
 0x2ba   : > { %v2560_v2 = vpop.eup %2559  ;;  %v2054_v0 = vmul.f32 %v2558_v41, %v1804_v57  ;;  %2563 = vpow2.f32 %v2339_v22 }
 0x2bb   : > { %v2562_v27 = vpop.eup %2561  ;;  %2565 = vrcp.f32 %v1983_v43  ;;  %v1995_v44 = vadd.f32 1.0, %v2560_v2 }
 0x2bc   : > { %2078 = vst [vmem:[%s3691_s4 + $0x18] sm:$0xff] %v2054_v0  ;;  %v2066_v45 = vmul.f32 %v2562_v27, %v1864_v58  ;;  %2567 = vpow2.f32 %v2351_v40 }
 0x2bd   : > { %2569 = vrcp.f32 %v1995_v44 }
 0x2be   : > { %2090 = vst [vmem:[%s3691_s4 + $0x78] sm:$0xff] %v2066_v45 }
 0x2c0   : > { %v1878_v38 = vpop.f32.mrb[12].mxu1 }
 0x2c1   : > { %v1818_v28 = vpop.f32.mrb[12].mxu0  ;;  %v1879_v46 = vadd.f32 %v3680_v26, %v1878_v38  ;;  %v1880_v48 = vpop.f32.mrb[13].mxu1 }
 0x2c2   : > { %v1819_v39 = vadd.f32 %v3680_v26, %v1818_v28  ;;  %v1820_v47 = vpop.f32.mrb[13].mxu0 }
 0x2c3   : > { %v2352_v52 = vmul.f32 -1.442695, %v1879_v46 }
 0x2c4   : > { %v2564_v49 = vpop.eup %2563  ;;  %v2340_v51 = vmul.f32 -1.442695, %v1819_v39 }
 0x2c5   : > { %v2566_v6 = vpop.eup %2565  ;;  %v1984_v7 = vadd.f32 1.0, %v2564_v49 }
 0x2c6   : > { %v2568_v53 = vpop.eup %2567  ;;  %v2055_v54 = vmul.f32 %v2566_v6, %v1809_v15  ;;  %2571 = vpow2.f32 %v2340_v51 }
 0x2c7   : > { %v2570_v31 = vpop.eup %2569  ;;  %2573 = vrcp.f32 %v1984_v7  ;;  %v1996_v55 = vadd.f32 1.0, %v2568_v53 }
 0x2c8   : > { %2079 = vst [vmem:[%s3691_s4 + $0x20] sm:$0xff] %v2055_v54  ;;  %v2067_v32 = vmul.f32 %v2570_v31, %v1869_v16  ;;  %2575 = vpow2.f32 %v2352_v52 }
 0x2c9   : > { %2577 = vrcp.f32 %v1996_v55 }
 0x2ca   : > { %2091 = vst [vmem:[%s3691_s4 + $0x80] sm:$0xff] %v2067_v32 }
 0x2cc   : > { %v1883_v57 = vpop.f32.mrb[14].mxu1 }
 0x2cd   : > { %v1823_v56 = vpop.f32.mrb[14].mxu0  ;;  %v1884_v59 = vadd.f32 %v3680_v26, %v1883_v57  ;;  %v1885_v61 = vpop.f32.mrb[15].mxu1 }
 0x2ce   : > { %v1824_v58 = vadd.f32 %v3680_v26, %v1823_v56  ;;  %v1825_v60 = vpop.f32.mrb[15].mxu0 }
 0x2cf   : > { %v2353_v1 = vmul.f32 -1.442695, %v1884_v59 }
 0x2d0   : > { %v2572_v62 = vpop.eup %2571  ;;  %v2341_v63 = vmul.f32 -1.442695, %v1824_v58 }
 0x2d1   : > { %v2574_v3 = vpop.eup %2573  ;;  %v1985_v17 = vadd.f32 1.0, %v2572_v62 }
 0x2d2   : > { %v2576_v18 = vpop.eup %2575  ;;  %v2056_v4 = vmul.f32 %v2574_v3, %v1814_v50  ;;  %2579 = vpow2.f32 %v2341_v63 }
 0x2d3   : > { %v2578_v5 = vpop.eup %2577  ;;  %2581 = vrcp.f32 %v1985_v17  ;;  %v1997_v11 = vadd.f32 1.0, %v2576_v18 }
 0x2d4   : > { %2080 = vst [vmem:[%s3691_s4 + $0x28] sm:$0xff] %v2056_v4  ;;  %v2068_v13 = vmul.f32 %v2578_v5, %v1874_v36  ;;  %2583 = vpow2.f32 %v2353_v1 }
 0x2d5   : > { %2585 = vrcp.f32 %v1997_v11 }
 0x2d6   : > { %2092 = vst [vmem:[%s3691_s4 + $0x88] sm:$0xff] %v2068_v13 }
 0x2d8   : > { %v1888_v15 = vpop.f32.mrb[16].mxu1 }
 0x2d9   : > { %v1828_v14 = vpop.f32.mrb[16].mxu0  ;;  %v1889_v19 = vadd.f32 %v3680_v26, %v1888_v15  ;;  %v1890_v20 = vpop.f32.mrb[17].mxu1 }
 0x2da   : > { %v1829_v16 = vadd.f32 %v3680_v26, %v1828_v14  ;;  %v1830_v9 = vpop.f32.mrb[17].mxu0 }
 0x2db   : > { %v2354_v12 = vmul.f32 -1.442695, %v1889_v19 }
 0x2dc   : > { %v2580_v24 = vpop.eup %2579  ;;  %v2342_v29 = vmul.f32 -1.442695, %v1829_v16 }
 0x2dd   : > { %v2582_v25 = vpop.eup %2581  ;;  %v1986_v30 = vadd.f32 1.0, %v2580_v24 }
 0x2de   : > { %v2584_v42 = vpop.eup %2583  ;;  %v2057_v33 = vmul.f32 %v2582_v25, %v1819_v39  ;;  %2587 = vpow2.f32 %v2342_v29 }
 0x2df   : > { %v2586_v10 = vpop.eup %2585  ;;  %2589 = vrcp.f32 %v1986_v30  ;;  %v1998_v34 = vadd.f32 1.0, %v2584_v42 }
 0x2e0   : > { %2081 = vst [vmem:[%s3691_s4 + $0x30] sm:$0xff] %v2057_v33  ;;  %v2069_v35 = vmul.f32 %v2586_v10, %v1879_v46  ;;  %2591 = vpow2.f32 %v2354_v12 }
 0x2e1   : > { %2593 = vrcp.f32 %v1998_v34 }
 0x2e2   : > { %2093 = vst [vmem:[%s3691_s4 + $0x90] sm:$0xff] %v2069_v35 }
 0x2e4   : > { %v1893_v50 = vpop.f32.mrb[18].mxu1 }
 0x2e5   : > { %v1833_v8 = vpop.f32.mrb[18].mxu0  ;;  %v1894_v37 = vadd.f32 %v3680_v26, %v1893_v50  ;;  %v1895_v21 = vpop.f32.mrb[19].mxu1 }
 0x2e6   : > { %v1834_v36 = vadd.f32 %v3680_v26, %v1833_v8  ;;  %v1835_v23 = vpop.f32.mrb[19].mxu0 }
 0x2e7   : > { %v2355_v41 = vmul.f32 -1.442695, %v1894_v37 }
 0x2e8   : > { %v2588_v22 = vpop.eup %2587  ;;  %v2343_v40 = vmul.f32 -1.442695, %v1834_v36 }
 0x2e9   : > { %v2590_v43 = vpop.eup %2589  ;;  %v1987_v2 = vadd.f32 1.0, %v2588_v22 }
 0x2ea   : > { %v2592_v0 = vpop.eup %2591  ;;  %v2058_v27 = vmul.f32 %v2590_v43, %v1824_v58  ;;  %2595 = vpow2.f32 %v2343_v40 }
 0x2eb   : > { %v2594_v44 = vpop.eup %2593  ;;  %2597 = vrcp.f32 %v1987_v2  ;;  %v1999_v45 = vadd.f32 1.0, %v2592_v0 }
 0x2ec   : > { %2082 = vst [vmem:[%s3691_s4 + $0x38] sm:$0xff] %v2058_v27  ;;  %v2070_v28 = vmul.f32 %v2594_v44, %v1884_v59  ;;  %2599 = vpow2.f32 %v2355_v41 }
 0x2ed   : > { %2601 = vrcp.f32 %v1999_v45 }
 0x2ee   : > { %2094 = vst [vmem:[%s3691_s4 + $0x98] sm:$0xff] %v2070_v28 }
 0x2f0   : > { %v1898_v39 = vpop.f32.mrb[20].mxu1 }
 0x2f1   : > { %v1838_v38 = vpop.f32.mrb[20].mxu0  ;;  %v1899_v47 = vadd.f32 %v3680_v26, %v1898_v39  ;;  %v1900_v49 = vpop.f32.mrb[21].mxu1 }
 0x2f2   : > { %v1839_v46 = vadd.f32 %v3680_v26, %v1838_v38  ;;  %v1840_v48 = vpop.f32.mrb[21].mxu0 }
 0x2f3   : > { %v2356_v6 = vmul.f32 -1.442695, %v1899_v47 }
 0x2f4   : > { %v2596_v51 = vpop.eup %2595  ;;  %v2344_v52 = vmul.f32 -1.442695, %v1839_v46 }
 0x2f5   : > { %v2598_v7 = vpop.eup %2597  ;;  %v1988_v53 = vadd.f32 1.0, %v2596_v51 }
 0x2f6   : > { %v2600_v54 = vpop.eup %2599  ;;  %v2059_v31 = vmul.f32 %v2598_v7, %v1829_v16  ;;  %2603 = vpow2.f32 %v2344_v52 }
 0x2f7   : > { %v2602_v55 = vpop.eup %2601  ;;  %2605 = vrcp.f32 %v1988_v53  ;;  %v2000_v32 = vadd.f32 1.0, %v2600_v54 }
 0x2f8   : > { %2083 = vst [vmem:[%s3691_s4 + $0x40] sm:$0xff] %v2059_v31  ;;  %v2071_v56 = vmul.f32 %v2602_v55, %v1889_v19  ;;  %2607 = vpow2.f32 %v2356_v6 }
 0x2f9   : > { %2609 = vrcp.f32 %v2000_v32 }
 0x2fa   : > { %2095 = vst [vmem:[%s3691_s4 + $0xa0] sm:$0xff] %v2071_v56 }
 0x2fc   : > { %v1903_v57 = vpop.f32.mrb[22].mxu1 }
 0x2fd   : > { %v1843_v58 = vpop.f32.mrb[22].mxu0  ;;  %v1904_v59 = vadd.f32 %v3680_v26, %v1903_v57  ;;  %v1905_v60 = vpop.f32.mrb[23].mxu1 }
 0x2fe   : > { %v1844_v61 = vadd.f32 %v3680_v26, %v1843_v58  ;;  %v1845_v62 = vpop.f32.mrb[23].mxu0 }
 0x2ff   : > { %v2357_v1 = vmul.f32 -1.442695, %v1904_v59 }
 0x300   : > { %v2604_v63 = vpop.eup %2603  ;;  %v2345_v18 = vmul.f32 -1.442695, %v1844_v61 }
 0x301   : > { %v2606_v3 = vpop.eup %2605  ;;  %v1989_v17 = vadd.f32 1.0, %v2604_v63  ;;  %2611 = vpow2.f32 %v2357_v1 }
 0x302   : > { %v2608_v4 = vpop.eup %2607  ;;  %v2060_v5 = vmul.f32 %v2606_v3, %v1834_v36 }
 0x303   : > { %v2610_v11 = vpop.eup %2609  ;;  %2613 = vrcp.f32 %v1989_v17  ;;  %v2001_v13 = vadd.f32 1.0, %v2608_v4 }
 0x304   : > { %2084 = vst [vmem:[%s3691_s4 + $0x48] sm:$0xff] %v2060_v5  ;;  %v2072_v14 = vmul.f32 %v2610_v11, %v1894_v37  ;;  %2615 = vpow2.f32 %v2345_v18 }
 0x305   : > { %2617 = vrcp.f32 %v2001_v13 }
 0x306   : > { %2096 = vst [vmem:[%s3691_s4 + $0xa8] sm:$0xff] %v2072_v14 }
 0x30b   : > { %v2612_v26 = vpop.eup %2611 }
 0x30c   : > { %v2002_v16 = vadd.f32 1.0, %v2612_v26 }
 0x30d   : > { %v2614_v15 = vpop.eup %2613 }
 0x30e   : > { %v2616_v19 = vpop.eup %2615  ;;  %v2061_v9 = vmul.f32 %v2614_v15, %v1839_v46  ;;  %2619 = vrcp.f32 %v2002_v16 }
 0x30f   : > { %v2618_v20 = vpop.eup %2617  ;;  %v1990_v24 = vadd.f32 1.0, %v2616_v19 }
 0x310   : > { %2085 = vst [vmem:[%s3691_s4 + $0x50] sm:$0xff] %v2061_v9  ;;  %v2073_v29 = vmul.f32 %v2618_v20, %v1899_v47 }
 0x311   : > { %2621 = vrcp.f32 %v1990_v24 }
 0x312   : > { %2097 = vst [vmem:[%s3691_s4 + $0xb0] sm:$0xff] %v2073_v29 }
 0x318   : > { %v2620_v12 = vpop.eup %2619 }
 0x319   : > { %v2074_v25 = vmul.f32 %v2620_v12, %v1904_v59 }
 0x31b   : > { %v2622_v30 = vpop.eup %2621  ;;  %2098 = vst [vmem:[%s3691_s4 + $0xb8] sm:$0xff] %v2074_v25 }
 0x31c   : > { %v2062_v42 = vmul.f32 %v2622_v30, %v1844_v61 }
 0x31e   : > { %2086 = vst [vmem:[%s3691_s4 + $0x58] sm:$0xff] %v2062_v42 }
 0x31f   : > { %2636 = shalt.err (!%p2633_p8)
}
 0x320   : > { %s2637_s20 = scalar_lea.hbm %s3739_s25, 3072  ;;  %s2641_s4 = scalar_lea.hbm %s3802_s3, 18432 }
 0x321   : > { %p2638_p9 = scmp.ne.s32.totalorder %s3739_s25, %s2637_s20  ;;  %p2642_p12 = scmp.lt.u32.totalorder %s3739_s25, %s3802_s3 }
 0x322   : > { %p2643_p13 = scmp.lt.u32.totalorder %s2641_s4, %s2637_s20  ;;  %p2645_p1 = scmp.lt.u32.totalorder %s2637_s20, %s3739_s25 }
 0x323   : > { %p2639_p10 = pnand %p2638_p9, %p2804_p5 }
 0x324   : > { %p2644_p0 = por %p2643_p13, %p2642_p12 }
 0x325   : > { %p2640_p11 = pneg %p2639_p10 }
 0x326   : > { %p2646_p2 = por %p2645_p1, %p2644_p0 }
 0x328   : > { %p2647_p3 = pnand %p2646_p2, %p2640_p11 }
 0x32a   : > { %2650 = shalt.err (!%p2647_p3)
}
 0x32b   : > { %s2729_s7 = smov 128   ;;  %s2730_s30 = smov 8  }
 0x32c   : > { %2445 = dma.vmem_to_hbm [thread:$0]  (%p2804_p5), %s3742_s8, 3072, %s3739_s25, %s3747_s15, %s2729_s7, %s2729_s7, %s2730_s30  }
 0x32d PF: > { %p2451_p4 = scmp.ge.s32.totalorder %s2717_s19, 2  ;;  %s2130_s9 = sand.u32 1, %s2689_s12  }
 0x32e   : > { %s2131_s16 = scalar_lea.sflag [#allocation5], %s2130_s9 }
 0x32f   : > { %p2448_p6 = pnand %p2451_p4, %p2810_p7 }
 0x331   : > { %2684 = dma.done.wait (!%p2448_p6), %s2131_s16, 3072  }
 0x332   : > { %2686 = vsyncadd (!%p2448_p6), %s2131_s16, 4294964224  ;;  %s16_s19 = sadd.s32 1, %s2717_s19   ;;  %s3805_s12 = smov %s2693_s13 }
 0x333   : > { %p13_p8 = scmp.ge.s32.totalorder %s16_s19, 8   ;;  %s3806_s13 = smov %s2697_s14 }
 0x334   : > { %s3807_s14 = smov %s2820_s5  ;;  %s3808_s15 = smov %s2709_s17 }
 0x335   : > { %s3809_s16 = smov %s2713_s18  ;;  %s3810_s17 = smov %s3813_s21 }
 0x336   : > { %s3811_s18 = smov %s3817_s22  ;;  %15 = sbr.rel (!%p13_p8) target bundleno = 5 (0x5), region = 78 }
 0x33d   :  { %2136 = vsyncpa [#allocation5], 1 }
 0x33e   :  { %2138 = vsyncpa [#allocation5 + $0x1], 1 }

</bundles_post_ra>
